<compile_context>
chip_gen: v7x
topology: tpu7x:2x2x1
jax: 0.10.0
libtpu: 0.0.40
codegen_flags: <defaults>
</compile_context>

<pallas_src>
import jax
import jax.numpy as jnp
import numpy as np
from jax.experimental import pallas as pl
from jax.experimental.pallas import tpu as pltpu

NEG_SLOPE = 0.01   # nn.LeakyReLU() default
EPS = 1e-12        # F.normalize default eps


def _dsup_kernel(xm_ref, xt_ref, xb_ref, e0_ref, e1_ref, g0_ref, g1_ref,
                 w1_ref, b1_ref, wt_ref, bt_ref, wd_ref, bd_ref, w2_ref, b2_ref,
                 o_ref, xwin_ref):
    """Fused DSUp forward for one (batch, row-tile) grid step.

    xm_ref : (1, Cin, TH, W)   main input row block
    xt_ref : (1, Cin, TH, W)   row block above (clamped) - supplies the 1-row top halo
    xb_ref : (1, Cin, TH, W)   row block below (clamped) - supplies the 1-row bottom halo
    e0/e1  : (W, Wo+2)         constant 0/1 column interleave (+ left/right reflect cols)
    g0/g1  : (2TH+2, TH+2)     constant 0/1 row interleave (+ top/bottom reflect rows)
    w*/b*  : SMEM scalar tables (1x1 convs, depthwise taps, biases)
    o_ref  : (1, Cout, 2TH, Wo)
    xwin   : (Cin, TH+2, W)    VMEM scratch: input rows incl. 1-row halo each side
    """
    _, cin, TH, W = xm_ref.shape
    _, cout, THo, Wo = o_ref.shape            # THo = 2*TH, Wo = 2*W

    t = pl.program_id(1)
    nt = pl.num_programs(1)

    # ---- gather the TH+2 input rows this tile needs (reflection handled by clamping:
    #      at the image border the reflected upsampled row is phase-1/phase-0 of the
    #      first/last in-tile row, which is exactly what the clamp selects). ----
    top_row = jnp.where(t > 0, TH - 1, 0)          # last row of previous block / row 0
    bot_row = jnp.where(t < nt - 1, 0, TH - 1)     # first row of next block / row H-1
    xwin_ref[:, 0:1, :] = xt_ref[0, :, pl.ds(top_row, 1), :]
    xwin_ref[:, 1:TH + 1, :] = xm_ref[0]
    xwin_ref[:, TH + 1:TH + 2, :] = xb_ref[0, :, pl.ds(bot_row, 1), :]
    xw = xwin_ref[...]                              # (Cin, TH+2, W) f32

    # ---- up.widthwise_fc : 1x1 conv as unrolled VPU broadcast-MACs ----
    ys = []
    for oc in range(cin):
        acc = xw[0] * w1_ref[oc, 0]
        for c in range(1, cin):
            acc = acc + xw[c] * w1_ref[oc, c]
        ys.append(acc + b1_ref[oc])                 # (TH+2, W)

    # ---- up.depthwise (ConvTranspose k=2 s=2) + F.normalize(dim=C) + LeakyReLU,
    #      one 2x2 output phase (i, j) at a time (all before any interleave). ----
    def phase(i, j):
        zs = [ys[c] * wt_ref[c, 2 * i + j] + bt_ref[c] for c in range(cin)]
        ss = zs[0] * zs[0]
        for c in range(1, cin):
            ss = ss + zs[c] * zs[c]
        # 1 / max(||z||, eps)  ==  rsqrt(max(sum z^2, eps^2))   (EUP slot)
        inv = jax.lax.rsqrt(jnp.maximum(ss, EPS * EPS))
        acts = []
        for c in range(cin):
            a = zs[c] * inv
            acts.append(jnp.where(a >= 0, a, NEG_SLOPE * a))
        return acts                                  # Cin x (TH+2, W)

    e0 = e0_ref[...]
    e1 = e1_ref[...]
    g0 = g0_ref[...]
    g1 = g1_ref[...]

    # Column interleave + left/right reflection columns via the idle MXU:
    #   crow[i][c] : (TH+2, Wo+2) = padded-upsampled rows (sub-row phase i) per channel.
    crow = [[None] * cin for _ in range(2)]
    for i in range(2):
        for j in range(2):
            acts = phase(i, j)
            ej = e0 if j == 0 else e1
            for c in range(cin):
                p = jnp.dot(acts[c], ej, preferred_element_type=jnp.float32)
                crow[i][c] = p if crow[i][c] is None else crow[i][c] + p

    # ---- think : (already reflection-padded) depthwise 3x3 + 1x1 conv, fused ----
    outs = [None] * cout
    for c in range(cin):
        # Row interleave + top/bottom reflection rows (constant 0/1 matrices, MXU):
        full = (jnp.dot(g0, crow[0][c], preferred_element_type=jnp.float32) +
                jnp.dot(g1, crow[1][c], preferred_element_type=jnp.float32))  # (2TH+2, Wo+2)
        acc = None
        for i in range(3):
            for j in range(3):
                term = full[i:i + THo, j:j + Wo] * wd_ref[c, 3 * i + j]
                acc = term if acc is None else acc + term
        d_c = acc + bd_ref[c]                        # (2TH, Wo)
        for oc in range(cout):
            contrib = d_c * w2_ref[oc, c]
            outs[oc] = contrib if outs[oc] is None else outs[oc] + contrib

    for oc in range(cout):
        o_ref[0, oc] = (outs[oc] + b2_ref[oc]).astype(o_ref.dtype)


def _pick_row_tile(H, W, cin, cout, vmem_budget_bytes=4 << 20):
    """Pick the LARGEST legal row tile (divides H; multiple of 8 or == H) whose
    rough per-step VMEM footprint (double-buffered ins/outs + scratch + interleave
    intermediates) fits the budget.  Bigger tiles = fewer grid steps + fewer halo
    re-fetches + larger DMAs."""
    def est(th):
        inb = 3 * 2 * cin * th * W * 4                    # xm/xt/xb, double-buffered
        outb = 2 * cout * (2 * th) * (2 * W) * 4          # output tile, double-buffered
        scr = cin * (th + 2) * W * 4                      # xwin scratch
        interm = 10 * cin * (th + 2) * (2 * W + 2) * 4    # crow/full/acc headroom
        return inb + outb + scr + interm

    legal = [th for th in range(1, H + 1)
             if H % th == 0 and (th % 8 == 0 or th == H)]
    fits = [th for th in legal if est(th) <= vmem_budget_bytes]
    return max(fits) if fits else min(legal)


def dsup_forward(x_nchw, params):
    W1, b1, Wt, bt, Wd, bd, W2, b2 = params
    N, Cin, H, W = x_nchw.shape
    Cout = W2.shape[0]
    Ho, Wo = 2 * H, 2 * W
    TH = _pick_row_tile(H, W, Cin, Cout)
    NT = H // TH
    f32 = jnp.float32

    x = x_nchw.astype(f32)

    # ---- constant 0/1 interleave / reflection matrices (built on host, exact) ----
    # E{j}[w, q]: base column w of column-phase j -> padded-upsampled column 1+2w+j,
    # plus the ReflectionPad2d(1) left/right columns.
    E0 = np.zeros((W, Wo + 2), np.float32)
    E1 = np.zeros((W, Wo + 2), np.float32)
    for w in range(W):
        E0[w, 1 + 2 * w] = 1.0
        E1[w, 2 + 2 * w] = 1.0
    E0[W - 1, Wo + 1] = 1.0   # right pad col = upsampled col Wo-2 (phase 0, col W-1)
    E1[0, 0] = 1.0            # left  pad col = upsampled col 1    (phase 1, col 0)
    # G{i}[q, e]: window row e of sub-row phase i -> padded slab row q
    # (slab rows 0 and 2TH+1 are the reflected / halo rows).
    G0 = np.zeros((2 * TH + 2, TH + 2), np.float32)
    G1 = np.zeros((2 * TH + 2, TH + 2), np.float32)
    for k in range(TH):
        G0[1 + 2 * k, k + 1] = 1.0
        G1[2 + 2 * k, k + 1] = 1.0
    G0[2 * TH + 1, TH + 1] = 1.0   # bottom pad row = phase 0 of the bottom halo row
    G1[0, 0] = 1.0                 # top    pad row = phase 1 of the top halo row

    # ---- weights as SMEM scalar tables ----
    w1 = jnp.asarray(W1, f32)                           # (Cin, Cin)
    b1r = jnp.asarray(b1, f32)                          # (Cin,)
    wt4 = jnp.asarray(Wt[:, 0].reshape(Cin, 4), f32)    # wt4[c, 2i+j] = Wt[c,0,i,j]
    btr = jnp.asarray(bt, f32)
    wd9 = jnp.asarray(Wd[:, 0].reshape(Cin, 9), f32)    # wd9[c, 3i+j] = Wd[c,0,i,j]
    bdr = jnp.asarray(bd, f32)
    w2 = jnp.asarray(W2, f32)                           # (Cout, Cin)
    b2r = jnp.asarray(b2, f32)

    smem = pl.BlockSpec(memory_space=pltpu.MemorySpace.SMEM)

    def vfull(shape):
        # Constant block index -> Pallas DMAs these tiny 0/1 matrices only once.
        return pl.BlockSpec(shape, lambda n, t: (0, 0))

    flops = int(N * H * W * (2 * Cin * Cin + 32 * Cin)
                + N * Ho * Wo * Cin * (18 + 2 * Cout))
    transcendentals = int(N * 4 * H * W)
    bytes_accessed = int(4 * (N * Cin * H * W + N * Cout * Ho * Wo))

    out = pl.pallas_call(
        _dsup_kernel,
        out_shape=jax.ShapeDtypeStruct((N, Cout, Ho, Wo), f32),
        grid=(N, NT),
        in_specs=[
            # main row block + 1-row halo blocks above/below (clamped index maps)
            pl.BlockSpec((1, Cin, TH, W), lambda n, t: (n, 0, t, 0)),
            pl.BlockSpec((1, Cin, TH, W), lambda n, t: (n, 0, jnp.maximum(t - 1, 0), 0)),
            pl.BlockSpec((1, Cin, TH, W), lambda n, t: (n, 0, jnp.minimum(t + 1, NT - 1), 0)),
            vfull((W, Wo + 2)),              # E0
            vfull((W, Wo + 2)),              # E1
            vfull((2 * TH + 2, TH + 2)),     # G0
            vfull((2 * TH + 2, TH + 2)),     # G1
            smem, smem, smem, smem, smem, smem, smem, smem,   # weights / biases
        ],
        out_specs=pl.BlockSpec((1, Cout, 2 * TH, Wo), lambda n, t: (n, 0, t, 0)),
        scratch_shapes=[pltpu.VMEM((Cin, TH + 2, W), f32)],
        compiler_params=pltpu.CompilerParams(
            dimension_semantics=("parallel", "parallel")),
        cost_estimate=pl.CostEstimate(flops=flops,
                                      transcendentals=transcendentals,
                                      bytes_accessed=bytes_accessed),
    )(x, x, x,
      jnp.asarray(E0), jnp.asarray(E1), jnp.asarray(G0), jnp.asarray(G1),
      w1, b1r, wt4, btr, wd9, bdr, w2, b2r)
    return out


def dsup_reference(x, params):
    """Pure-JAX reference mirroring the PyTorch forward (NCHW)."""
    W1, b1, Wt, bt, Wd, bd, W2, b2 = params
    N, Cin, H, W = x.shape
    # up.widthwise_fc (1x1 conv)
    y = jnp.einsum("oc,nchw->nohw", W1, x) + b1[None, :, None, None]
    # up.depthwise (ConvTranspose2d k=2 s=2 groups=C)
    up = jnp.zeros((N, Cin, 2 * H, 2 * W), jnp.float32)
    for i in range(2):
        for j in range(2):
            up = up.at[:, :, i::2, j::2].set(y * Wt[None, :, 0, i, j, None, None])
    up = up + bt[None, :, None, None]
    # F.normalize(dim=1) + LeakyReLU
    nrm = jnp.sqrt(jnp.sum(up * up, axis=1, keepdims=True))
    a = up / jnp.maximum(nrm, EPS)
    a = jnp.where(a >= 0, a, NEG_SLOPE * a)
    # think: ReflectionPad2d(1) + depthwise 3x3 + 1x1 conv
    ap = jnp.pad(a, ((0, 0), (0, 0), (1, 1), (1, 1)), mode="reflect")
    d = jnp.zeros_like(a)
    for i in range(3):
        for j in range(3):
            d = d + ap[:, :, i:i + 2 * H, j:j + 2 * W] * Wd[None, :, 0, i, j, None, None]
    d = d + bd[None, :, None, None]
    return jnp.einsum("oc,nchw->nohw", W2, d) + b2[None, :, None, None]


if __name__ == "__main__":
    N, Cin, Cout, H, W = 2, 4, 8, 16, 16
    key = jax.random.PRNGKey(0)
    ks = jax.random.split(key, 9)
    x = jax.random.normal(ks[0], (N, Cin, H, W), jnp.float32)
    # deterministic synthetic parameters (shapes from the module __init__)
    W1 = 0.3 * jax.random.normal(ks[1], (Cin, Cin), jnp.float32)       # up.widthwise_fc (1x1)
    b1 = 0.1 * jax.random.normal(ks[2], (Cin,), jnp.float32)
    Wt = 0.3 * jax.random.normal(ks[3], (Cin, 1, 2, 2), jnp.float32)   # up.depthwise (ConvTranspose, groups=C)
    bt = 0.1 * jax.random.normal(ks[4], (Cin,), jnp.float32)
    Wd = 0.3 * jax.random.normal(ks[5], (Cin, 1, 3, 3), jnp.float32)   # think.depthwise (groups=C)
    bd = 0.1 * jax.random.normal(ks[6], (Cin,), jnp.float32)
    W2 = 0.3 * jax.random.normal(ks[7], (Cout, Cin), jnp.float32)      # think.widthwise_fc (1x1)
    b2 = 0.1 * jax.random.normal(ks[8], (Cout,), jnp.float32)
    params = (W1, b1, Wt, bt, Wd, bd, W2, b2)

    fwd = jax.jit(dsup_forward)
    out = jax.block_until_ready(fwd(x, params))
    ref = jax.block_until_ready(dsup_reference(x, params))
    assert out.shape == (N, Cout, 2 * H, 2 * W), out.shape
    np.testing.assert_allclose(np.asarray(out), np.asarray(ref), rtol=2e-2, atol=2e-2)
    print("KERNEL_OK")
</pallas_src>

<mosaic_0001>
module attributes {stable_mosaic.version = 11 : i64} {
  func.func @_dsup_kernel(%arg0: i32, %arg1: i32, %arg2: memref<1x4x16x16xf32, #tpu.memory_space<vmem>>, %arg3: memref<1x4x16x16xf32, #tpu.memory_space<vmem>>, %arg4: memref<1x4x16x16xf32, #tpu.memory_space<vmem>>, %arg5: memref<16x34xf32, #tpu.memory_space<vmem>>, %arg6: memref<16x34xf32, #tpu.memory_space<vmem>>, %arg7: memref<34x18xf32, #tpu.memory_space<vmem>>, %arg8: memref<34x18xf32, #tpu.memory_space<vmem>>, %arg9: memref<4x4xf32, #tpu.memory_space<smem>>, %arg10: memref<4xf32, #tpu.memory_space<smem>>, %arg11: memref<4x4xf32, #tpu.memory_space<smem>>, %arg12: memref<4xf32, #tpu.memory_space<smem>>, %arg13: memref<4x9xf32, #tpu.memory_space<smem>>, %arg14: memref<4xf32, #tpu.memory_space<smem>>, %arg15: memref<8x4xf32, #tpu.memory_space<smem>>, %arg16: memref<8xf32, #tpu.memory_space<smem>>, %arg17: memref<1x8x32x32xf32, #tpu.memory_space<vmem>>, %arg18: memref<4x18x16xf32, #tpu.memory_space<vmem>>) attributes {dimension_semantics = [#tpu.dimension_semantics<parallel>, #tpu.dimension_semantics<parallel>], iteration_bounds = array<i64: 2, 1>, scalar_prefetch = 0 : i64, scratch_operands = 1 : i64, tpu.core_type = #tpu.core_type<tc>, window_params = [{transform_indices = @transform_0, window_bounds = array<i64: 1, 4, 16, 16>}, {transform_indices = @transform_1, window_bounds = array<i64: 1, 4, 16, 16>}, {transform_indices = @transform_2, window_bounds = array<i64: 1, 4, 16, 16>}, {pipeline_mode = #tpu.pipeline_mode<synchronous>, transform_indices = @transform_3, window_bounds = array<i64: 16, 34>}, {pipeline_mode = #tpu.pipeline_mode<synchronous>, transform_indices = @transform_4, window_bounds = array<i64: 16, 34>}, {pipeline_mode = #tpu.pipeline_mode<synchronous>, transform_indices = @transform_5, window_bounds = array<i64: 34, 18>}, {pipeline_mode = #tpu.pipeline_mode<synchronous>, transform_indices = @transform_6, window_bounds = array<i64: 34, 18>}, {transform_indices = @transform_7, window_bounds = array<i64: 4, 4>}, {transform_indices = @transform_8, window_bounds = array<i64: 4>}, {transform_indices = @transform_9, window_bounds = array<i64: 4, 4>}, {transform_indices = @transform_10, window_bounds = array<i64: 4>}, {transform_indices = @transform_11, window_bounds = array<i64: 4, 9>}, {transform_indices = @transform_12, window_bounds = array<i64: 4>}, {transform_indices = @transform_13, window_bounds = array<i64: 8, 4>}, {transform_indices = @transform_14, window_bounds = array<i64: 8>}, {transform_indices = @transform_15, window_bounds = array<i64: 1, 8, 32, 32>}]} {
    %c0_i32 = arith.constant 0 : i32
    %0 = arith.cmpi sgt, %arg1, %c0_i32 : i32
    %c15_i32 = arith.constant 15 : i32
    %c0_i32_0 = arith.constant 0 : i32
    %1 = arith.select %0, %c15_i32, %c0_i32_0 : i32
    %c0_i32_1 = arith.constant 0 : i32
    %2 = arith.cmpi slt, %arg1, %c0_i32_1 : i32
    %c0_i32_2 = arith.constant 0 : i32
    %c15_i32_3 = arith.constant 15 : i32
    %3 = arith.select %2, %c0_i32_2, %c15_i32_3 : i32
    %c0 = arith.constant 0 : index
    %c0_4 = arith.constant 0 : index
    %4 = arith.index_cast %1 : i32 to index
    %c0_5 = arith.constant 0 : index
    %5 = vector.load %arg3[%c0, %c0_4, %4, %c0_5] : memref<1x4x16x16xf32, #tpu.memory_space<vmem>>, vector<1x4x1x16xf32>
    %6 = vector.shape_cast %5 : vector<1x4x1x16xf32> to vector<4x1x16xf32>
    %c0_6 = arith.constant 0 : index
    %c0_7 = arith.constant 0 : index
    %c0_8 = arith.constant 0 : index
    %7 = vector.load %arg18[%c0_6, %c0_7, %c0_8] : memref<4x18x16xf32, #tpu.memory_space<vmem>>, vector<4x1x16xf32>
    tpu.vector_store %arg18[%c0_6, %c0_7, %c0_8], %6 {strides = array<i32>} : memref<4x18x16xf32, #tpu.memory_space<vmem>>, vector<4x1x16xf32>,
    %c0_9 = arith.constant 0 : index
    %c0_10 = arith.constant 0 : index
    %c0_11 = arith.constant 0 : index
    %c0_12 = arith.constant 0 : index
    %8 = vector.load %arg2[%c0_9, %c0_10, %c0_11, %c0_12] : memref<1x4x16x16xf32, #tpu.memory_space<vmem>>, vector<1x4x16x16xf32>
    %9 = vector.shape_cast %8 : vector<1x4x16x16xf32> to vector<4x16x16xf32>
    %c0_13 = arith.constant 0 : index
    %c1 = arith.constant 1 : index
    %c0_14 = arith.constant 0 : index
    %10 = vector.load %arg18[%c0_13, %c1, %c0_14] : memref<4x18x16xf32, #tpu.memory_space<vmem>>, vector<4x16x16xf32>
    tpu.vector_store %arg18[%c0_13, %c1, %c0_14], %9 {strides = array<i32>} : memref<4x18x16xf32, #tpu.memory_space<vmem>>, vector<4x16x16xf32>,
    %c0_15 = arith.constant 0 : index
    %c0_16 = arith.constant 0 : index
    %11 = arith.index_cast %3 : i32 to index
    %c0_17 = arith.constant 0 : index
    %12 = vector.load %arg4[%c0_15, %c0_16, %11, %c0_17] : memref<1x4x16x16xf32, #tpu.memory_space<vmem>>, vector<1x4x1x16xf32>
    %13 = vector.shape_cast %12 : vector<1x4x1x16xf32> to vector<4x1x16xf32>
    %c0_18 = arith.constant 0 : index
    %c17 = arith.constant 17 : index
    %c0_19 = arith.constant 0 : index
    %14 = vector.load %arg18[%c0_18, %c17, %c0_19] : memref<4x18x16xf32, #tpu.memory_space<vmem>>, vector<4x1x16xf32>
    tpu.vector_store %arg18[%c0_18, %c17, %c0_19], %13 {strides = array<i32>} : memref<4x18x16xf32, #tpu.memory_space<vmem>>, vector<4x1x16xf32>,
    %c0_20 = arith.constant 0 : index
    %c0_21 = arith.constant 0 : index
    %c0_22 = arith.constant 0 : index
    %15 = vector.load %arg18[%c0_20, %c0_21, %c0_22] : memref<4x18x16xf32, #tpu.memory_space<vmem>>, vector<4x18x16xf32>
    %16 = vector.extract_strided_slice %15 {offsets = [0, 0, 0], sizes = [1, 18, 16], strides = [1, 1, 1]} : vector<4x18x16xf32> to vector<1x18x16xf32>
    %17 = vector.shape_cast %16 : vector<1x18x16xf32> to vector<18x16xf32>
    %c0_23 = arith.constant 0 : index
    %c0_24 = arith.constant 0 : index
    %18 = memref.load %arg9[%c0_23, %c0_24] : memref<4x4xf32, #tpu.memory_space<smem>>
    %19 = vector.broadcast %18 : f32 to vector<18x16xf32>
    %20 = arith.mulf %17, %19 : vector<18x16xf32>
    %21 = vector.extract_strided_slice %15 {offsets = [1, 0, 0], sizes = [1, 18, 16], strides = [1, 1, 1]} : vector<4x18x16xf32> to vector<1x18x16xf32>
    %22 = vector.shape_cast %21 : vector<1x18x16xf32> to vector<18x16xf32>
    %c0_25 = arith.constant 0 : index
    %c1_26 = arith.constant 1 : index
    %23 = memref.load %arg9[%c0_25, %c1_26] : memref<4x4xf32, #tpu.memory_space<smem>>
    %24 = vector.broadcast %23 : f32 to vector<18x16xf32>
    %25 = arith.mulf %22, %24 : vector<18x16xf32>
    %26 = arith.addf %20, %25 : vector<18x16xf32>
    %27 = vector.extract_strided_slice %15 {offsets = [2, 0, 0], sizes = [1, 18, 16], strides = [1, 1, 1]} : vector<4x18x16xf32> to vector<1x18x16xf32>
    %28 = vector.shape_cast %27 : vector<1x18x16xf32> to vector<18x16xf32>
    %c0_27 = arith.constant 0 : index
    %c2 = arith.constant 2 : index
    %29 = memref.load %arg9[%c0_27, %c2] : memref<4x4xf32, #tpu.memory_space<smem>>
    %30 = vector.broadcast %29 : f32 to vector<18x16xf32>
    %31 = arith.mulf %28, %30 : vector<18x16xf32>
    %32 = arith.addf %26, %31 : vector<18x16xf32>
    %33 = vector.extract_strided_slice %15 {offsets = [3, 0, 0], sizes = [1, 18, 16], strides = [1, 1, 1]} : vector<4x18x16xf32> to vector<1x18x16xf32>
    %34 = vector.shape_cast %33 : vector<1x18x16xf32> to vector<18x16xf32>
    %c0_28 = arith.constant 0 : index
    %c3 = arith.constant 3 : index
    %35 = memref.load %arg9[%c0_28, %c3] : memref<4x4xf32, #tpu.memory_space<smem>>
    %36 = vector.broadcast %35 : f32 to vector<18x16xf32>
    %37 = arith.mulf %34, %36 : vector<18x16xf32>
    %38 = arith.addf %32, %37 : vector<18x16xf32>
    %c0_29 = arith.constant 0 : index
    %39 = memref.load %arg10[%c0_29] : memref<4xf32, #tpu.memory_space<smem>>
    %40 = vector.broadcast %39 : f32 to vector<18x16xf32>
    %41 = arith.addf %38, %40 : vector<18x16xf32>
    %42 = vector.extract_strided_slice %15 {offsets = [0, 0, 0], sizes = [1, 18, 16], strides = [1, 1, 1]} : vector<4x18x16xf32> to vector<1x18x16xf32>
    %43 = vector.shape_cast %42 : vector<1x18x16xf32> to vector<18x16xf32>
    %c1_30 = arith.constant 1 : index
    %c0_31 = arith.constant 0 : index
    %44 = memref.load %arg9[%c1_30, %c0_31] : memref<4x4xf32, #tpu.memory_space<smem>>
    %45 = vector.broadcast %44 : f32 to vector<18x16xf32>
    %46 = arith.mulf %43, %45 : vector<18x16xf32>
    %47 = vector.extract_strided_slice %15 {offsets = [1, 0, 0], sizes = [1, 18, 16], strides = [1, 1, 1]} : vector<4x18x16xf32> to vector<1x18x16xf32>
    %48 = vector.shape_cast %47 : vector<1x18x16xf32> to vector<18x16xf32>
    %c1_32 = arith.constant 1 : index
    %c1_33 = arith.constant 1 : index
    %49 = memref.load %arg9[%c1_32, %c1_33] : memref<4x4xf32, #tpu.memory_space<smem>>
    %50 = vector.broadcast %49 : f32 to vector<18x16xf32>
    %51 = arith.mulf %48, %50 : vector<18x16xf32>
    %52 = arith.addf %46, %51 : vector<18x16xf32>
    %53 = vector.extract_strided_slice %15 {offsets = [2, 0, 0], sizes = [1, 18, 16], strides = [1, 1, 1]} : vector<4x18x16xf32> to vector<1x18x16xf32>
    %54 = vector.shape_cast %53 : vector<1x18x16xf32> to vector<18x16xf32>
    %c1_34 = arith.constant 1 : index
    %c2_35 = arith.constant 2 : index
    %55 = memref.load %arg9[%c1_34, %c2_35] : memref<4x4xf32, #tpu.memory_space<smem>>
    %56 = vector.broadcast %55 : f32 to vector<18x16xf32>
    %57 = arith.mulf %54, %56 : vector<18x16xf32>
    %58 = arith.addf %52, %57 : vector<18x16xf32>
    %59 = vector.extract_strided_slice %15 {offsets = [3, 0, 0], sizes = [1, 18, 16], strides = [1, 1, 1]} : vector<4x18x16xf32> to vector<1x18x16xf32>
    %60 = vector.shape_cast %59 : vector<1x18x16xf32> to vector<18x16xf32>
    %c1_36 = arith.constant 1 : index
    %c3_37 = arith.constant 3 : index
    %61 = memref.load %arg9[%c1_36, %c3_37] : memref<4x4xf32, #tpu.memory_space<smem>>
    %62 = vector.broadcast %61 : f32 to vector<18x16xf32>
    %63 = arith.mulf %60, %62 : vector<18x16xf32>
    %64 = arith.addf %58, %63 : vector<18x16xf32>
    %c1_38 = arith.constant 1 : index
    %65 = memref.load %arg10[%c1_38] : memref<4xf32, #tpu.memory_space<smem>>
    %66 = vector.broadcast %65 : f32 to vector<18x16xf32>
    %67 = arith.addf %64, %66 : vector<18x16xf32>
    %68 = vector.extract_strided_slice %15 {offsets = [0, 0, 0], sizes = [1, 18, 16], strides = [1, 1, 1]} : vector<4x18x16xf32> to vector<1x18x16xf32>
    %69 = vector.shape_cast %68 : vector<1x18x16xf32> to vector<18x16xf32>
    %c2_39 = arith.constant 2 : index
    %c0_40 = arith.constant 0 : index
    %70 = memref.load %arg9[%c2_39, %c0_40] : memref<4x4xf32, #tpu.memory_space<smem>>
    %71 = vector.broadcast %70 : f32 to vector<18x16xf32>
    %72 = arith.mulf %69, %71 : vector<18x16xf32>
    %73 = vector.extract_strided_slice %15 {offsets = [1, 0, 0], sizes = [1, 18, 16], strides = [1, 1, 1]} : vector<4x18x16xf32> to vector<1x18x16xf32>
    %74 = vector.shape_cast %73 : vector<1x18x16xf32> to vector<18x16xf32>
    %c2_41 = arith.constant 2 : index
    %c1_42 = arith.constant 1 : index
    %75 = memref.load %arg9[%c2_41, %c1_42] : memref<4x4xf32, #tpu.memory_space<smem>>
    %76 = vector.broadcast %75 : f32 to vector<18x16xf32>
    %77 = arith.mulf %74, %76 : vector<18x16xf32>
    %78 = arith.addf %72, %77 : vector<18x16xf32>
    %79 = vector.extract_strided_slice %15 {offsets = [2, 0, 0], sizes = [1, 18, 16], strides = [1, 1, 1]} : vector<4x18x16xf32> to vector<1x18x16xf32>
    %80 = vector.shape_cast %79 : vector<1x18x16xf32> to vector<18x16xf32>
    %c2_43 = arith.constant 2 : index
    %c2_44 = arith.constant 2 : index
    %81 = memref.load %arg9[%c2_43, %c2_44] : memref<4x4xf32, #tpu.memory_space<smem>>
    %82 = vector.broadcast %81 : f32 to vector<18x16xf32>
    %83 = arith.mulf %80, %82 : vector<18x16xf32>
    %84 = arith.addf %78, %83 : vector<18x16xf32>
    %85 = vector.extract_strided_slice %15 {offsets = [3, 0, 0], sizes = [1, 18, 16], strides = [1, 1, 1]} : vector<4x18x16xf32> to vector<1x18x16xf32>
    %86 = vector.shape_cast %85 : vector<1x18x16xf32> to vector<18x16xf32>
    %c2_45 = arith.constant 2 : index
    %c3_46 = arith.constant 3 : index
    %87 = memref.load %arg9[%c2_45, %c3_46] : memref<4x4xf32, #tpu.memory_space<smem>>
    %88 = vector.broadcast %87 : f32 to vector<18x16xf32>
    %89 = arith.mulf %86, %88 : vector<18x16xf32>
    %90 = arith.addf %84, %89 : vector<18x16xf32>
    %c2_47 = arith.constant 2 : index
    %91 = memref.load %arg10[%c2_47] : memref<4xf32, #tpu.memory_space<smem>>
    %92 = vector.broadcast %91 : f32 to vector<18x16xf32>
    %93 = arith.addf %90, %92 : vector<18x16xf32>
    %94 = vector.extract_strided_slice %15 {offsets = [0, 0, 0], sizes = [1, 18, 16], strides = [1, 1, 1]} : vector<4x18x16xf32> to vector<1x18x16xf32>
    %95 = vector.shape_cast %94 : vector<1x18x16xf32> to vector<18x16xf32>
    %c3_48 = arith.constant 3 : index
    %c0_49 = arith.constant 0 : index
    %96 = memref.load %arg9[%c3_48, %c0_49] : memref<4x4xf32, #tpu.memory_space<smem>>
    %97 = vector.broadcast %96 : f32 to vector<18x16xf32>
    %98 = arith.mulf %95, %97 : vector<18x16xf32>
    %99 = vector.extract_strided_slice %15 {offsets = [1, 0, 0], sizes = [1, 18, 16], strides = [1, 1, 1]} : vector<4x18x16xf32> to vector<1x18x16xf32>
    %100 = vector.shape_cast %99 : vector<1x18x16xf32> to vector<18x16xf32>
    %c3_50 = arith.constant 3 : index
    %c1_51 = arith.constant 1 : index
    %101 = memref.load %arg9[%c3_50, %c1_51] : memref<4x4xf32, #tpu.memory_space<smem>>
    %102 = vector.broadcast %101 : f32 to vector<18x16xf32>
    %103 = arith.mulf %100, %102 : vector<18x16xf32>
    %104 = arith.addf %98, %103 : vector<18x16xf32>
    %105 = vector.extract_strided_slice %15 {offsets = [2, 0, 0], sizes = [1, 18, 16], strides = [1, 1, 1]} : vector<4x18x16xf32> to vector<1x18x16xf32>
    %106 = vector.shape_cast %105 : vector<1x18x16xf32> to vector<18x16xf32>
    %c3_52 = arith.constant 3 : index
    %c2_53 = arith.constant 2 : index
    %107 = memref.load %arg9[%c3_52, %c2_53] : memref<4x4xf32, #tpu.memory_space<smem>>
    %108 = vector.broadcast %107 : f32 to vector<18x16xf32>
    %109 = arith.mulf %106, %108 : vector<18x16xf32>
    %110 = arith.addf %104, %109 : vector<18x16xf32>
    %111 = vector.extract_strided_slice %15 {offsets = [3, 0, 0], sizes = [1, 18, 16], strides = [1, 1, 1]} : vector<4x18x16xf32> to vector<1x18x16xf32>
    %112 = vector.shape_cast %111 : vector<1x18x16xf32> to vector<18x16xf32>
    %c3_54 = arith.constant 3 : index
    %c3_55 = arith.constant 3 : index
    %113 = memref.load %arg9[%c3_54, %c3_55] : memref<4x4xf32, #tpu.memory_space<smem>>
    %114 = vector.broadcast %113 : f32 to vector<18x16xf32>
    %115 = arith.mulf %112, %114 : vector<18x16xf32>
    %116 = arith.addf %110, %115 : vector<18x16xf32>
    %c3_56 = arith.constant 3 : index
    %117 = memref.load %arg10[%c3_56] : memref<4xf32, #tpu.memory_space<smem>>
    %118 = vector.broadcast %117 : f32 to vector<18x16xf32>
    %119 = arith.addf %116, %118 : vector<18x16xf32>
    %c0_57 = arith.constant 0 : index
    %c0_58 = arith.constant 0 : index
    %120 = vector.load %arg5[%c0_57, %c0_58] : memref<16x34xf32, #tpu.memory_space<vmem>>, vector<16x34xf32>
    %c0_59 = arith.constant 0 : index
    %c0_60 = arith.constant 0 : index
    %121 = vector.load %arg6[%c0_59, %c0_60] : memref<16x34xf32, #tpu.memory_space<vmem>>, vector<16x34xf32>
    %c0_61 = arith.constant 0 : index
    %c0_62 = arith.constant 0 : index
    %122 = vector.load %arg7[%c0_61, %c0_62] : memref<34x18xf32, #tpu.memory_space<vmem>>, vector<34x18xf32>
    %c0_63 = arith.constant 0 : index
    %c0_64 = arith.constant 0 : index
    %123 = vector.load %arg8[%c0_63, %c0_64] : memref<34x18xf32, #tpu.memory_space<vmem>>, vector<34x18xf32>
    %c0_65 = arith.constant 0 : index
    %c0_66 = arith.constant 0 : index
    %124 = memref.load %arg11[%c0_65, %c0_66] : memref<4x4xf32, #tpu.memory_space<smem>>
    %125 = vector.broadcast %124 : f32 to vector<18x16xf32>
    %126 = arith.mulf %41, %125 : vector<18x16xf32>
    %c0_67 = arith.constant 0 : index
    %127 = memref.load %arg12[%c0_67] : memref<4xf32, #tpu.memory_space<smem>>
    %128 = vector.broadcast %127 : f32 to vector<18x16xf32>
    %129 = arith.addf %126, %128 : vector<18x16xf32>
    %c1_68 = arith.constant 1 : index
    %c0_69 = arith.constant 0 : index
    %130 = memref.load %arg11[%c1_68, %c0_69] : memref<4x4xf32, #tpu.memory_space<smem>>
    %131 = vector.broadcast %130 : f32 to vector<18x16xf32>
    %132 = arith.mulf %67, %131 : vector<18x16xf32>
    %c1_70 = arith.constant 1 : index
    %133 = memref.load %arg12[%c1_70] : memref<4xf32, #tpu.memory_space<smem>>
    %134 = vector.broadcast %133 : f32 to vector<18x16xf32>
    %135 = arith.addf %132, %134 : vector<18x16xf32>
    %c2_71 = arith.constant 2 : index
    %c0_72 = arith.constant 0 : index
    %136 = memref.load %arg11[%c2_71, %c0_72] : memref<4x4xf32, #tpu.memory_space<smem>>
    %137 = vector.broadcast %136 : f32 to vector<18x16xf32>
    %138 = arith.mulf %93, %137 : vector<18x16xf32>
    %c2_73 = arith.constant 2 : index
    %139 = memref.load %arg12[%c2_73] : memref<4xf32, #tpu.memory_space<smem>>
    %140 = vector.broadcast %139 : f32 to vector<18x16xf32>
    %141 = arith.addf %138, %140 : vector<18x16xf32>
    %c3_74 = arith.constant 3 : index
    %c0_75 = arith.constant 0 : index
    %142 = memref.load %arg11[%c3_74, %c0_75] : memref<4x4xf32, #tpu.memory_space<smem>>
    %143 = vector.broadcast %142 : f32 to vector<18x16xf32>
    %144 = arith.mulf %119, %143 : vector<18x16xf32>
    %c3_76 = arith.constant 3 : index
    %145 = memref.load %arg12[%c3_76] : memref<4xf32, #tpu.memory_space<smem>>
    %146 = vector.broadcast %145 : f32 to vector<18x16xf32>
    %147 = arith.addf %144, %146 : vector<18x16xf32>
    %148 = arith.mulf %129, %129 : vector<18x16xf32>
    %149 = arith.mulf %135, %135 : vector<18x16xf32>
    %150 = arith.addf %148, %149 : vector<18x16xf32>
    %151 = arith.mulf %141, %141 : vector<18x16xf32>
    %152 = arith.addf %150, %151 : vector<18x16xf32>
    %153 = arith.mulf %147, %147 : vector<18x16xf32>
    %154 = arith.addf %152, %153 : vector<18x16xf32>
    %cst = arith.constant 1.000000e-24 : f32
    %155 = vector.broadcast %cst : f32 to vector<18x16xf32>
    %156 = arith.maximumf %154, %155 : vector<18x16xf32>
    %157 = math.rsqrt %156 : vector<18x16xf32>
    %158 = arith.mulf %129, %157 : vector<18x16xf32>
    %cst_77 = arith.constant 0.000000e+00 : f32
    %159 = vector.broadcast %cst_77 : f32 to vector<18x16xf32>
    %160 = arith.cmpf oge, %158, %159 : vector<18x16xf32>
    %cst_78 = arith.constant 0.00999999977 : f32
    %161 = vector.broadcast %cst_78 : f32 to vector<18x16xf32>
    %162 = arith.mulf %161, %158 : vector<18x16xf32>
    %163 = arith.select %160, %158, %162 : vector<18x16xi1>, vector<18x16xf32>
    %164 = arith.mulf %135, %157 : vector<18x16xf32>
    %cst_79 = arith.constant 0.000000e+00 : f32
    %165 = vector.broadcast %cst_79 : f32 to vector<18x16xf32>
    %166 = arith.cmpf oge, %164, %165 : vector<18x16xf32>
    %cst_80 = arith.constant 0.00999999977 : f32
    %167 = vector.broadcast %cst_80 : f32 to vector<18x16xf32>
    %168 = arith.mulf %167, %164 : vector<18x16xf32>
    %169 = arith.select %166, %164, %168 : vector<18x16xi1>, vector<18x16xf32>
    %170 = arith.mulf %141, %157 : vector<18x16xf32>
    %cst_81 = arith.constant 0.000000e+00 : f32
    %171 = vector.broadcast %cst_81 : f32 to vector<18x16xf32>
    %172 = arith.cmpf oge, %170, %171 : vector<18x16xf32>
    %cst_82 = arith.constant 0.00999999977 : f32
    %173 = vector.broadcast %cst_82 : f32 to vector<18x16xf32>
    %174 = arith.mulf %173, %170 : vector<18x16xf32>
    %175 = arith.select %172, %170, %174 : vector<18x16xi1>, vector<18x16xf32>
    %176 = arith.mulf %147, %157 : vector<18x16xf32>
    %cst_83 = arith.constant 0.000000e+00 : f32
    %177 = vector.broadcast %cst_83 : f32 to vector<18x16xf32>
    %178 = arith.cmpf oge, %176, %177 : vector<18x16xf32>
    %cst_84 = arith.constant 0.00999999977 : f32
    %179 = vector.broadcast %cst_84 : f32 to vector<18x16xf32>
    %180 = arith.mulf %179, %176 : vector<18x16xf32>
    %181 = arith.select %178, %176, %180 : vector<18x16xi1>, vector<18x16xf32>
    %cst_85 = arith.constant dense<0.000000e+00> : vector<18x34xf32>
    %182 = tpu.matmul %163, %120, %cst_85 {dimension_numbers = #tpu.dot_dimension_numbers<[1], [0], [0], [1], [0, 0, 1, 1], [], []>} : vector<18x16xf32>, vector<16x34xf32>, vector<18x34xf32> -> vector<18x34xf32>
    %cst_86 = arith.constant dense<0.000000e+00> : vector<18x34xf32>
    %183 = tpu.matmul %169, %120, %cst_86 {dimension_numbers = #tpu.dot_dimension_numbers<[1], [0], [0], [1], [0, 0, 1, 1], [], []>} : vector<18x16xf32>, vector<16x34xf32>, vector<18x34xf32> -> vector<18x34xf32>
    %cst_87 = arith.constant dense<0.000000e+00> : vector<18x34xf32>
    %184 = tpu.matmul %175, %120, %cst_87 {dimension_numbers = #tpu.dot_dimension_numbers<[1], [0], [0], [1], [0, 0, 1, 1], [], []>} : vector<18x16xf32>, vector<16x34xf32>, vector<18x34xf32> -> vector<18x34xf32>
    %cst_88 = arith.constant dense<0.000000e+00> : vector<18x34xf32>
    %185 = tpu.matmul %181, %120, %cst_88 {dimension_numbers = #tpu.dot_dimension_numbers<[1], [0], [0], [1], [0, 0, 1, 1], [], []>} : vector<18x16xf32>, vector<16x34xf32>, vector<18x34xf32> -> vector<18x34xf32>
    %c0_89 = arith.constant 0 : index
    %c1_90 = arith.constant 1 : index
    %186 = memref.load %arg11[%c0_89, %c1_90] : memref<4x4xf32, #tpu.memory_space<smem>>
    %187 = vector.broadcast %186 : f32 to vector<18x16xf32>
    %188 = arith.mulf %41, %187 : vector<18x16xf32>
    %c0_91 = arith.constant 0 : index
    %189 = memref.load %arg12[%c0_91] : memref<4xf32, #tpu.memory_space<smem>>
    %190 = vector.broadcast %189 : f32 to vector<18x16xf32>
    %191 = arith.addf %188, %190 : vector<18x16xf32>
    %c1_92 = arith.constant 1 : index
    %c1_93 = arith.constant 1 : index
    %192 = memref.load %arg11[%c1_92, %c1_93] : memref<4x4xf32, #tpu.memory_space<smem>>
    %193 = vector.broadcast %192 : f32 to vector<18x16xf32>
    %194 = arith.mulf %67, %193 : vector<18x16xf32>
    %c1_94 = arith.constant 1 : index
    %195 = memref.load %arg12[%c1_94] : memref<4xf32, #tpu.memory_space<smem>>
    %196 = vector.broadcast %195 : f32 to vector<18x16xf32>
    %197 = arith.addf %194, %196 : vector<18x16xf32>
    %c2_95 = arith.constant 2 : index
    %c1_96 = arith.constant 1 : index
    %198 = memref.load %arg11[%c2_95, %c1_96] : memref<4x4xf32, #tpu.memory_space<smem>>
    %199 = vector.broadcast %198 : f32 to vector<18x16xf32>
    %200 = arith.mulf %93, %199 : vector<18x16xf32>
    %c2_97 = arith.constant 2 : index
    %201 = memref.load %arg12[%c2_97] : memref<4xf32, #tpu.memory_space<smem>>
    %202 = vector.broadcast %201 : f32 to vector<18x16xf32>
    %203 = arith.addf %200, %202 : vector<18x16xf32>
    %c3_98 = arith.constant 3 : index
    %c1_99 = arith.constant 1 : index
    %204 = memref.load %arg11[%c3_98, %c1_99] : memref<4x4xf32, #tpu.memory_space<smem>>
    %205 = vector.broadcast %204 : f32 to vector<18x16xf32>
    %206 = arith.mulf %119, %205 : vector<18x16xf32>
    %c3_100 = arith.constant 3 : index
    %207 = memref.load %arg12[%c3_100] : memref<4xf32, #tpu.memory_space<smem>>
    %208 = vector.broadcast %207 : f32 to vector<18x16xf32>
    %209 = arith.addf %206, %208 : vector<18x16xf32>
    %210 = arith.mulf %191, %191 : vector<18x16xf32>
    %211 = arith.mulf %197, %197 : vector<18x16xf32>
    %212 = arith.addf %210, %211 : vector<18x16xf32>
    %213 = arith.mulf %203, %203 : vector<18x16xf32>
    %214 = arith.addf %212, %213 : vector<18x16xf32>
    %215 = arith.mulf %209, %209 : vector<18x16xf32>
    %216 = arith.addf %214, %215 : vector<18x16xf32>
    %cst_101 = arith.constant 1.000000e-24 : f32
    %217 = vector.broadcast %cst_101 : f32 to vector<18x16xf32>
    %218 = arith.maximumf %216, %217 : vector<18x16xf32>
    %219 = math.rsqrt %218 : vector<18x16xf32>
    %220 = arith.mulf %191, %219 : vector<18x16xf32>
    %cst_102 = arith.constant 0.000000e+00 : f32
    %221 = vector.broadcast %cst_102 : f32 to vector<18x16xf32>
    %222 = arith.cmpf oge, %220, %221 : vector<18x16xf32>
    %cst_103 = arith.constant 0.00999999977 : f32
    %223 = vector.broadcast %cst_103 : f32 to vector<18x16xf32>
    %224 = arith.mulf %223, %220 : vector<18x16xf32>
    %225 = arith.select %222, %220, %224 : vector<18x16xi1>, vector<18x16xf32>
    %226 = arith.mulf %197, %219 : vector<18x16xf32>
    %cst_104 = arith.constant 0.000000e+00 : f32
    %227 = vector.broadcast %cst_104 : f32 to vector<18x16xf32>
    %228 = arith.cmpf oge, %226, %227 : vector<18x16xf32>
    %cst_105 = arith.constant 0.00999999977 : f32
    %229 = vector.broadcast %cst_105 : f32 to vector<18x16xf32>
    %230 = arith.mulf %229, %226 : vector<18x16xf32>
    %231 = arith.select %228, %226, %230 : vector<18x16xi1>, vector<18x16xf32>
    %232 = arith.mulf %203, %219 : vector<18x16xf32>
    %cst_106 = arith.constant 0.000000e+00 : f32
    %233 = vector.broadcast %cst_106 : f32 to vector<18x16xf32>
    %234 = arith.cmpf oge, %232, %233 : vector<18x16xf32>
    %cst_107 = arith.constant 0.00999999977 : f32
    %235 = vector.broadcast %cst_107 : f32 to vector<18x16xf32>
    %236 = arith.mulf %235, %232 : vector<18x16xf32>
    %237 = arith.select %234, %232, %236 : vector<18x16xi1>, vector<18x16xf32>
    %238 = arith.mulf %209, %219 : vector<18x16xf32>
    %cst_108 = arith.constant 0.000000e+00 : f32
    %239 = vector.broadcast %cst_108 : f32 to vector<18x16xf32>
    %240 = arith.cmpf oge, %238, %239 : vector<18x16xf32>
    %cst_109 = arith.constant 0.00999999977 : f32
    %241 = vector.broadcast %cst_109 : f32 to vector<18x16xf32>
    %242 = arith.mulf %241, %238 : vector<18x16xf32>
    %243 = arith.select %240, %238, %242 : vector<18x16xi1>, vector<18x16xf32>
    %cst_110 = arith.constant dense<0.000000e+00> : vector<18x34xf32>
    %244 = tpu.matmul %225, %121, %cst_110 {dimension_numbers = #tpu.dot_dimension_numbers<[1], [0], [0], [1], [0, 0, 1, 1], [], []>} : vector<18x16xf32>, vector<16x34xf32>, vector<18x34xf32> -> vector<18x34xf32>
    %245 = arith.addf %182, %244 : vector<18x34xf32>
    %cst_111 = arith.constant dense<0.000000e+00> : vector<18x34xf32>
    %246 = tpu.matmul %231, %121, %cst_111 {dimension_numbers = #tpu.dot_dimension_numbers<[1], [0], [0], [1], [0, 0, 1, 1], [], []>} : vector<18x16xf32>, vector<16x34xf32>, vector<18x34xf32> -> vector<18x34xf32>
    %247 = arith.addf %183, %246 : vector<18x34xf32>
    %cst_112 = arith.constant dense<0.000000e+00> : vector<18x34xf32>
    %248 = tpu.matmul %237, %121, %cst_112 {dimension_numbers = #tpu.dot_dimension_numbers<[1], [0], [0], [1], [0, 0, 1, 1], [], []>} : vector<18x16xf32>, vector<16x34xf32>, vector<18x34xf32> -> vector<18x34xf32>
    %249 = arith.addf %184, %248 : vector<18x34xf32>
    %cst_113 = arith.constant dense<0.000000e+00> : vector<18x34xf32>
    %250 = tpu.matmul %243, %121, %cst_113 {dimension_numbers = #tpu.dot_dimension_numbers<[1], [0], [0], [1], [0, 0, 1, 1], [], []>} : vector<18x16xf32>, vector<16x34xf32>, vector<18x34xf32> -> vector<18x34xf32>
    %251 = arith.addf %185, %250 : vector<18x34xf32>
    %c0_114 = arith.constant 0 : index
    %c2_115 = arith.constant 2 : index
    %252 = memref.load %arg11[%c0_114, %c2_115] : memref<4x4xf32, #tpu.memory_space<smem>>
    %253 = vector.broadcast %252 : f32 to vector<18x16xf32>
    %254 = arith.mulf %41, %253 : vector<18x16xf32>
    %c0_116 = arith.constant 0 : index
    %255 = memref.load %arg12[%c0_116] : memref<4xf32, #tpu.memory_space<smem>>
    %256 = vector.broadcast %255 : f32 to vector<18x16xf32>
    %257 = arith.addf %254, %256 : vector<18x16xf32>
    %c1_117 = arith.constant 1 : index
    %c2_118 = arith.constant 2 : index
    %258 = memref.load %arg11[%c1_117, %c2_118] : memref<4x4xf32, #tpu.memory_space<smem>>
    %259 = vector.broadcast %258 : f32 to vector<18x16xf32>
    %260 = arith.mulf %67, %259 : vector<18x16xf32>
    %c1_119 = arith.constant 1 : index
    %261 = memref.load %arg12[%c1_119] : memref<4xf32, #tpu.memory_space<smem>>
    %262 = vector.broadcast %261 : f32 to vector<18x16xf32>
    %263 = arith.addf %260, %262 : vector<18x16xf32>
    %c2_120 = arith.constant 2 : index
    %c2_121 = arith.constant 2 : index
    %264 = memref.load %arg11[%c2_120, %c2_121] : memref<4x4xf32, #tpu.memory_space<smem>>
    %265 = vector.broadcast %264 : f32 to vector<18x16xf32>
    %266 = arith.mulf %93, %265 : vector<18x16xf32>
    %c2_122 = arith.constant 2 : index
    %267 = memref.load %arg12[%c2_122] : memref<4xf32, #tpu.memory_space<smem>>
    %268 = vector.broadcast %267 : f32 to vector<18x16xf32>
    %269 = arith.addf %266, %268 : vector<18x16xf32>
    %c3_123 = arith.constant 3 : index
    %c2_124 = arith.constant 2 : index
    %270 = memref.load %arg11[%c3_123, %c2_124] : memref<4x4xf32, #tpu.memory_space<smem>>
    %271 = vector.broadcast %270 : f32 to vector<18x16xf32>
    %272 = arith.mulf %119, %271 : vector<18x16xf32>
    %c3_125 = arith.constant 3 : index
    %273 = memref.load %arg12[%c3_125] : memref<4xf32, #tpu.memory_space<smem>>
    %274 = vector.broadcast %273 : f32 to vector<18x16xf32>
    %275 = arith.addf %272, %274 : vector<18x16xf32>
    %276 = arith.mulf %257, %257 : vector<18x16xf32>
    %277 = arith.mulf %263, %263 : vector<18x16xf32>
    %278 = arith.addf %276, %277 : vector<18x16xf32>
    %279 = arith.mulf %269, %269 : vector<18x16xf32>
    %280 = arith.addf %278, %279 : vector<18x16xf32>
    %281 = arith.mulf %275, %275 : vector<18x16xf32>
    %282 = arith.addf %280, %281 : vector<18x16xf32>
    %cst_126 = arith.constant 1.000000e-24 : f32
    %283 = vector.broadcast %cst_126 : f32 to vector<18x16xf32>
    %284 = arith.maximumf %282, %283 : vector<18x16xf32>
    %285 = math.rsqrt %284 : vector<18x16xf32>
    %286 = arith.mulf %257, %285 : vector<18x16xf32>
    %cst_127 = arith.constant 0.000000e+00 : f32
    %287 = vector.broadcast %cst_127 : f32 to vector<18x16xf32>
    %288 = arith.cmpf oge, %286, %287 : vector<18x16xf32>
    %cst_128 = arith.constant 0.00999999977 : f32
    %289 = vector.broadcast %cst_128 : f32 to vector<18x16xf32>
    %290 = arith.mulf %289, %286 : vector<18x16xf32>
    %291 = arith.select %288, %286, %290 : vector<18x16xi1>, vector<18x16xf32>
    %292 = arith.mulf %263, %285 : vector<18x16xf32>
    %cst_129 = arith.constant 0.000000e+00 : f32
    %293 = vector.broadcast %cst_129 : f32 to vector<18x16xf32>
    %294 = arith.cmpf oge, %292, %293 : vector<18x16xf32>
    %cst_130 = arith.constant 0.00999999977 : f32
    %295 = vector.broadcast %cst_130 : f32 to vector<18x16xf32>
    %296 = arith.mulf %295, %292 : vector<18x16xf32>
    %297 = arith.select %294, %292, %296 : vector<18x16xi1>, vector<18x16xf32>
    %298 = arith.mulf %269, %285 : vector<18x16xf32>
    %cst_131 = arith.constant 0.000000e+00 : f32
    %299 = vector.broadcast %cst_131 : f32 to vector<18x16xf32>
    %300 = arith.cmpf oge, %298, %299 : vector<18x16xf32>
    %cst_132 = arith.constant 0.00999999977 : f32
    %301 = vector.broadcast %cst_132 : f32 to vector<18x16xf32>
    %302 = arith.mulf %301, %298 : vector<18x16xf32>
    %303 = arith.select %300, %298, %302 : vector<18x16xi1>, vector<18x16xf32>
    %304 = arith.mulf %275, %285 : vector<18x16xf32>
    %cst_133 = arith.constant 0.000000e+00 : f32
    %305 = vector.broadcast %cst_133 : f32 to vector<18x16xf32>
    %306 = arith.cmpf oge, %304, %305 : vector<18x16xf32>
    %cst_134 = arith.constant 0.00999999977 : f32
    %307 = vector.broadcast %cst_134 : f32 to vector<18x16xf32>
    %308 = arith.mulf %307, %304 : vector<18x16xf32>
    %309 = arith.select %306, %304, %308 : vector<18x16xi1>, vector<18x16xf32>
    %cst_135 = arith.constant dense<0.000000e+00> : vector<18x34xf32>
    %310 = tpu.matmul %291, %120, %cst_135 {dimension_numbers = #tpu.dot_dimension_numbers<[1], [0], [0], [1], [0, 0, 1, 1], [], []>} : vector<18x16xf32>, vector<16x34xf32>, vector<18x34xf32> -> vector<18x34xf32>
    %cst_136 = arith.constant dense<0.000000e+00> : vector<18x34xf32>
    %311 = tpu.matmul %297, %120, %cst_136 {dimension_numbers = #tpu.dot_dimension_numbers<[1], [0], [0], [1], [0, 0, 1, 1], [], []>} : vector<18x16xf32>, vector<16x34xf32>, vector<18x34xf32> -> vector<18x34xf32>
    %cst_137 = arith.constant dense<0.000000e+00> : vector<18x34xf32>
    %312 = tpu.matmul %303, %120, %cst_137 {dimension_numbers = #tpu.dot_dimension_numbers<[1], [0], [0], [1], [0, 0, 1, 1], [], []>} : vector<18x16xf32>, vector<16x34xf32>, vector<18x34xf32> -> vector<18x34xf32>
    %cst_138 = arith.constant dense<0.000000e+00> : vector<18x34xf32>
    %313 = tpu.matmul %309, %120, %cst_138 {dimension_numbers = #tpu.dot_dimension_numbers<[1], [0], [0], [1], [0, 0, 1, 1], [], []>} : vector<18x16xf32>, vector<16x34xf32>, vector<18x34xf32> -> vector<18x34xf32>
    %c0_139 = arith.constant 0 : index
    %c3_140 = arith.constant 3 : index
    %314 = memref.load %arg11[%c0_139, %c3_140] : memref<4x4xf32, #tpu.memory_space<smem>>
    %315 = vector.broadcast %314 : f32 to vector<18x16xf32>
    %316 = arith.mulf %41, %315 : vector<18x16xf32>
    %c0_141 = arith.constant 0 : index
    %317 = memref.load %arg12[%c0_141] : memref<4xf32, #tpu.memory_space<smem>>
    %318 = vector.broadcast %317 : f32 to vector<18x16xf32>
    %319 = arith.addf %316, %318 : vector<18x16xf32>
    %c1_142 = arith.constant 1 : index
    %c3_143 = arith.constant 3 : index
    %320 = memref.load %arg11[%c1_142, %c3_143] : memref<4x4xf32, #tpu.memory_space<smem>>
    %321 = vector.broadcast %320 : f32 to vector<18x16xf32>
    %322 = arith.mulf %67, %321 : vector<18x16xf32>
    %c1_144 = arith.constant 1 : index
    %323 = memref.load %arg12[%c1_144] : memref<4xf32, #tpu.memory_space<smem>>
    %324 = vector.broadcast %323 : f32 to vector<18x16xf32>
    %325 = arith.addf %322, %324 : vector<18x16xf32>
    %c2_145 = arith.constant 2 : index
    %c3_146 = arith.constant 3 : index
    %326 = memref.load %arg11[%c2_145, %c3_146] : memref<4x4xf32, #tpu.memory_space<smem>>
    %327 = vector.broadcast %326 : f32 to vector<18x16xf32>
    %328 = arith.mulf %93, %327 : vector<18x16xf32>
    %c2_147 = arith.constant 2 : index
    %329 = memref.load %arg12[%c2_147] : memref<4xf32, #tpu.memory_space<smem>>
    %330 = vector.broadcast %329 : f32 to vector<18x16xf32>
    %331 = arith.addf %328, %330 : vector<18x16xf32>
    %c3_148 = arith.constant 3 : index
    %c3_149 = arith.constant 3 : index
    %332 = memref.load %arg11[%c3_148, %c3_149] : memref<4x4xf32, #tpu.memory_space<smem>>
    %333 = vector.broadcast %332 : f32 to vector<18x16xf32>
    %334 = arith.mulf %119, %333 : vector<18x16xf32>
    %c3_150 = arith.constant 3 : index
    %335 = memref.load %arg12[%c3_150] : memref<4xf32, #tpu.memory_space<smem>>
    %336 = vector.broadcast %335 : f32 to vector<18x16xf32>
    %337 = arith.addf %334, %336 : vector<18x16xf32>
    %338 = arith.mulf %319, %319 : vector<18x16xf32>
    %339 = arith.mulf %325, %325 : vector<18x16xf32>
    %340 = arith.addf %338, %339 : vector<18x16xf32>
    %341 = arith.mulf %331, %331 : vector<18x16xf32>
    %342 = arith.addf %340, %341 : vector<18x16xf32>
    %343 = arith.mulf %337, %337 : vector<18x16xf32>
    %344 = arith.addf %342, %343 : vector<18x16xf32>
    %cst_151 = arith.constant 1.000000e-24 : f32
    %345 = vector.broadcast %cst_151 : f32 to vector<18x16xf32>
    %346 = arith.maximumf %344, %345 : vector<18x16xf32>
    %347 = math.rsqrt %346 : vector<18x16xf32>
    %348 = arith.mulf %319, %347 : vector<18x16xf32>
    %cst_152 = arith.constant 0.000000e+00 : f32
    %349 = vector.broadcast %cst_152 : f32 to vector<18x16xf32>
    %350 = arith.cmpf oge, %348, %349 : vector<18x16xf32>
    %cst_153 = arith.constant 0.00999999977 : f32
    %351 = vector.broadcast %cst_153 : f32 to vector<18x16xf32>
    %352 = arith.mulf %351, %348 : vector<18x16xf32>
    %353 = arith.select %350, %348, %352 : vector<18x16xi1>, vector<18x16xf32>
    %354 = arith.mulf %325, %347 : vector<18x16xf32>
    %cst_154 = arith.constant 0.000000e+00 : f32
    %355 = vector.broadcast %cst_154 : f32 to vector<18x16xf32>
    %356 = arith.cmpf oge, %354, %355 : vector<18x16xf32>
    %cst_155 = arith.constant 0.00999999977 : f32
    %357 = vector.broadcast %cst_155 : f32 to vector<18x16xf32>
    %358 = arith.mulf %357, %354 : vector<18x16xf32>
    %359 = arith.select %356, %354, %358 : vector<18x16xi1>, vector<18x16xf32>
    %360 = arith.mulf %331, %347 : vector<18x16xf32>
    %cst_156 = arith.constant 0.000000e+00 : f32
    %361 = vector.broadcast %cst_156 : f32 to vector<18x16xf32>
    %362 = arith.cmpf oge, %360, %361 : vector<18x16xf32>
    %cst_157 = arith.constant 0.00999999977 : f32
    %363 = vector.broadcast %cst_157 : f32 to vector<18x16xf32>
    %364 = arith.mulf %363, %360 : vector<18x16xf32>
    %365 = arith.select %362, %360, %364 : vector<18x16xi1>, vector<18x16xf32>
    %366 = arith.mulf %337, %347 : vector<18x16xf32>
    %cst_158 = arith.constant 0.000000e+00 : f32
    %367 = vector.broadcast %cst_158 : f32 to vector<18x16xf32>
    %368 = arith.cmpf oge, %366, %367 : vector<18x16xf32>
    %cst_159 = arith.constant 0.00999999977 : f32
    %369 = vector.broadcast %cst_159 : f32 to vector<18x16xf32>
    %370 = arith.mulf %369, %366 : vector<18x16xf32>
    %371 = arith.select %368, %366, %370 : vector<18x16xi1>, vector<18x16xf32>
    %cst_160 = arith.constant dense<0.000000e+00> : vector<18x34xf32>
    %372 = tpu.matmul %353, %121, %cst_160 {dimension_numbers = #tpu.dot_dimension_numbers<[1], [0], [0], [1], [0, 0, 1, 1], [], []>} : vector<18x16xf32>, vector<16x34xf32>, vector<18x34xf32> -> vector<18x34xf32>
    %373 = arith.addf %310, %372 : vector<18x34xf32>
    %cst_161 = arith.constant dense<0.000000e+00> : vector<18x34xf32>
    %374 = tpu.matmul %359, %121, %cst_161 {dimension_numbers = #tpu.dot_dimension_numbers<[1], [0], [0], [1], [0, 0, 1, 1], [], []>} : vector<18x16xf32>, vector<16x34xf32>, vector<18x34xf32> -> vector<18x34xf32>
    %375 = arith.addf %311, %374 : vector<18x34xf32>
    %cst_162 = arith.constant dense<0.000000e+00> : vector<18x34xf32>
    %376 = tpu.matmul %365, %121, %cst_162 {dimension_numbers = #tpu.dot_dimension_numbers<[1], [0], [0], [1], [0, 0, 1, 1], [], []>} : vector<18x16xf32>, vector<16x34xf32>, vector<18x34xf32> -> vector<18x34xf32>
    %377 = arith.addf %312, %376 : vector<18x34xf32>
    %cst_163 = arith.constant dense<0.000000e+00> : vector<18x34xf32>
    %378 = tpu.matmul %371, %121, %cst_163 {dimension_numbers = #tpu.dot_dimension_numbers<[1], [0], [0], [1], [0, 0, 1, 1], [], []>} : vector<18x16xf32>, vector<16x34xf32>, vector<18x34xf32> -> vector<18x34xf32>
    %379 = arith.addf %313, %378 : vector<18x34xf32>
    %cst_164 = arith.constant dense<0.000000e+00> : vector<34x34xf32>
    %380 = tpu.matmul %122, %245, %cst_164 {dimension_numbers = #tpu.dot_dimension_numbers<[1], [0], [0], [1], [0, 0, 1, 1], [], []>} : vector<34x18xf32>, vector<18x34xf32>, vector<34x34xf32> -> vector<34x34xf32>
    %cst_165 = arith.constant dense<0.000000e+00> : vector<34x34xf32>
    %381 = tpu.matmul %123, %373, %cst_165 {dimension_numbers = #tpu.dot_dimension_numbers<[1], [0], [0], [1], [0, 0, 1, 1], [], []>} : vector<34x18xf32>, vector<18x34xf32>, vector<34x34xf32> -> vector<34x34xf32>
    %382 = arith.addf %380, %381 : vector<34x34xf32>
    %383 = vector.extract_strided_slice %382 {offsets = [0, 0], sizes = [32, 32], strides = [1, 1]} : vector<34x34xf32> to vector<32x32xf32>
    %c0_166 = arith.constant 0 : index
    %c0_167 = arith.constant 0 : index
    %384 = memref.load %arg13[%c0_166, %c0_167] : memref<4x9xf32, #tpu.memory_space<smem>>
    %385 = vector.broadcast %384 : f32 to vector<32x32xf32>
    %386 = arith.mulf %383, %385 : vector<32x32xf32>
    %387 = vector.extract_strided_slice %382 {offsets = [0, 1], sizes = [32, 32], strides = [1, 1]} : vector<34x34xf32> to vector<32x32xf32>
    %c0_168 = arith.constant 0 : index
    %c1_169 = arith.constant 1 : index
    %388 = memref.load %arg13[%c0_168, %c1_169] : memref<4x9xf32, #tpu.memory_space<smem>>
    %389 = vector.broadcast %388 : f32 to vector<32x32xf32>
    %390 = arith.mulf %387, %389 : vector<32x32xf32>
    %391 = arith.addf %386, %390 : vector<32x32xf32>
    %392 = vector.extract_strided_slice %382 {offsets = [0, 2], sizes = [32, 32], strides = [1, 1]} : vector<34x34xf32> to vector<32x32xf32>
    %c0_170 = arith.constant 0 : index
    %c2_171 = arith.constant 2 : index
    %393 = memref.load %arg13[%c0_170, %c2_171] : memref<4x9xf32, #tpu.memory_space<smem>>
    %394 = vector.broadcast %393 : f32 to vector<32x32xf32>
    %395 = arith.mulf %392, %394 : vector<32x32xf32>
    %396 = arith.addf %391, %395 : vector<32x32xf32>
    %397 = vector.extract_strided_slice %382 {offsets = [1, 0], sizes = [32, 32], strides = [1, 1]} : vector<34x34xf32> to vector<32x32xf32>
    %c0_172 = arith.constant 0 : index
    %c3_173 = arith.constant 3 : index
    %398 = memref.load %arg13[%c0_172, %c3_173] : memref<4x9xf32, #tpu.memory_space<smem>>
    %399 = vector.broadcast %398 : f32 to vector<32x32xf32>
    %400 = arith.mulf %397, %399 : vector<32x32xf32>
    %401 = arith.addf %396, %400 : vector<32x32xf32>
    %402 = vector.extract_strided_slice %382 {offsets = [1, 1], sizes = [32, 32], strides = [1, 1]} : vector<34x34xf32> to vector<32x32xf32>
    %c0_174 = arith.constant 0 : index
    %c4 = arith.constant 4 : index
    %403 = memref.load %arg13[%c0_174, %c4] : memref<4x9xf32, #tpu.memory_space<smem>>
    %404 = vector.broadcast %403 : f32 to vector<32x32xf32>
    %405 = arith.mulf %402, %404 : vector<32x32xf32>
    %406 = arith.addf %401, %405 : vector<32x32xf32>
    %407 = vector.extract_strided_slice %382 {offsets = [1, 2], sizes = [32, 32], strides = [1, 1]} : vector<34x34xf32> to vector<32x32xf32>
    %c0_175 = arith.constant 0 : index
    %c5 = arith.constant 5 : index
    %408 = memref.load %arg13[%c0_175, %c5] : memref<4x9xf32, #tpu.memory_space<smem>>
    %409 = vector.broadcast %408 : f32 to vector<32x32xf32>
    %410 = arith.mulf %407, %409 : vector<32x32xf32>
    %411 = arith.addf %406, %410 : vector<32x32xf32>
    %412 = vector.extract_strided_slice %382 {offsets = [2, 0], sizes = [32, 32], strides = [1, 1]} : vector<34x34xf32> to vector<32x32xf32>
    %c0_176 = arith.constant 0 : index
    %c6 = arith.constant 6 : index
    %413 = memref.load %arg13[%c0_176, %c6] : memref<4x9xf32, #tpu.memory_space<smem>>
    %414 = vector.broadcast %413 : f32 to vector<32x32xf32>
    %415 = arith.mulf %412, %414 : vector<32x32xf32>
    %416 = arith.addf %411, %415 : vector<32x32xf32>
    %417 = vector.extract_strided_slice %382 {offsets = [2, 1], sizes = [32, 32], strides = [1, 1]} : vector<34x34xf32> to vector<32x32xf32>
    %c0_177 = arith.constant 0 : index
    %c7 = arith.constant 7 : index
    %418 = memref.load %arg13[%c0_177, %c7] : memref<4x9xf32, #tpu.memory_space<smem>>
    %419 = vector.broadcast %418 : f32 to vector<32x32xf32>
    %420 = arith.mulf %417, %419 : vector<32x32xf32>
    %421 = arith.addf %416, %420 : vector<32x32xf32>
    %422 = vector.extract_strided_slice %382 {offsets = [2, 2], sizes = [32, 32], strides = [1, 1]} : vector<34x34xf32> to vector<32x32xf32>
    %c0_178 = arith.constant 0 : index
    %c8 = arith.constant 8 : index
    %423 = memref.load %arg13[%c0_178, %c8] : memref<4x9xf32, #tpu.memory_space<smem>>
    %424 = vector.broadcast %423 : f32 to vector<32x32xf32>
    %425 = arith.mulf %422, %424 : vector<32x32xf32>
    %426 = arith.addf %421, %425 : vector<32x32xf32>
    %c0_179 = arith.constant 0 : index
    %427 = memref.load %arg14[%c0_179] : memref<4xf32, #tpu.memory_space<smem>>
    %428 = vector.broadcast %427 : f32 to vector<32x32xf32>
    %429 = arith.addf %426, %428 : vector<32x32xf32>
    %c0_180 = arith.constant 0 : index
    %c0_181 = arith.constant 0 : index
    %430 = memref.load %arg15[%c0_180, %c0_181] : memref<8x4xf32, #tpu.memory_space<smem>>
    %431 = vector.broadcast %430 : f32 to vector<32x32xf32>
    %432 = arith.mulf %429, %431 : vector<32x32xf32>
    %c1_182 = arith.constant 1 : index
    %c0_183 = arith.constant 0 : index
    %433 = memref.load %arg15[%c1_182, %c0_183] : memref<8x4xf32, #tpu.memory_space<smem>>
    %434 = vector.broadcast %433 : f32 to vector<32x32xf32>
    %435 = arith.mulf %429, %434 : vector<32x32xf32>
    %c2_184 = arith.constant 2 : index
    %c0_185 = arith.constant 0 : index
    %436 = memref.load %arg15[%c2_184, %c0_185] : memref<8x4xf32, #tpu.memory_space<smem>>
    %437 = vector.broadcast %436 : f32 to vector<32x32xf32>
    %438 = arith.mulf %429, %437 : vector<32x32xf32>
    %c3_186 = arith.constant 3 : index
    %c0_187 = arith.constant 0 : index
    %439 = memref.load %arg15[%c3_186, %c0_187] : memref<8x4xf32, #tpu.memory_space<smem>>
    %440 = vector.broadcast %439 : f32 to vector<32x32xf32>
    %441 = arith.mulf %429, %440 : vector<32x32xf32>
    %c4_188 = arith.constant 4 : index
    %c0_189 = arith.constant 0 : index
    %442 = memref.load %arg15[%c4_188, %c0_189] : memref<8x4xf32, #tpu.memory_space<smem>>
    %443 = vector.broadcast %442 : f32 to vector<32x32xf32>
    %444 = arith.mulf %429, %443 : vector<32x32xf32>
    %c5_190 = arith.constant 5 : index
    %c0_191 = arith.constant 0 : index
    %445 = memref.load %arg15[%c5_190, %c0_191] : memref<8x4xf32, #tpu.memory_space<smem>>
    %446 = vector.broadcast %445 : f32 to vector<32x32xf32>
    %447 = arith.mulf %429, %446 : vector<32x32xf32>
    %c6_192 = arith.constant 6 : index
    %c0_193 = arith.constant 0 : index
    %448 = memref.load %arg15[%c6_192, %c0_193] : memref<8x4xf32, #tpu.memory_space<smem>>
    %449 = vector.broadcast %448 : f32 to vector<32x32xf32>
    %450 = arith.mulf %429, %449 : vector<32x32xf32>
    %c7_194 = arith.constant 7 : index
    %c0_195 = arith.constant 0 : index
    %451 = memref.load %arg15[%c7_194, %c0_195] : memref<8x4xf32, #tpu.memory_space<smem>>
    %452 = vector.broadcast %451 : f32 to vector<32x32xf32>
    %453 = arith.mulf %429, %452 : vector<32x32xf32>
    %cst_196 = arith.constant dense<0.000000e+00> : vector<34x34xf32>
    %454 = tpu.matmul %122, %247, %cst_196 {dimension_numbers = #tpu.dot_dimension_numbers<[1], [0], [0], [1], [0, 0, 1, 1], [], []>} : vector<34x18xf32>, vector<18x34xf32>, vector<34x34xf32> -> vector<34x34xf32>
    %cst_197 = arith.constant dense<0.000000e+00> : vector<34x34xf32>
    %455 = tpu.matmul %123, %375, %cst_197 {dimension_numbers = #tpu.dot_dimension_numbers<[1], [0], [0], [1], [0, 0, 1, 1], [], []>} : vector<34x18xf32>, vector<18x34xf32>, vector<34x34xf32> -> vector<34x34xf32>
    %456 = arith.addf %454, %455 : vector<34x34xf32>
    %457 = vector.extract_strided_slice %456 {offsets = [0, 0], sizes = [32, 32], strides = [1, 1]} : vector<34x34xf32> to vector<32x32xf32>
    %c1_198 = arith.constant 1 : index
    %c0_199 = arith.constant 0 : index
    %458 = memref.load %arg13[%c1_198, %c0_199] : memref<4x9xf32, #tpu.memory_space<smem>>
    %459 = vector.broadcast %458 : f32 to vector<32x32xf32>
    %460 = arith.mulf %457, %459 : vector<32x32xf32>
    %461 = vector.extract_strided_slice %456 {offsets = [0, 1], sizes = [32, 32], strides = [1, 1]} : vector<34x34xf32> to vector<32x32xf32>
    %c1_200 = arith.constant 1 : index
    %c1_201 = arith.constant 1 : index
    %462 = memref.load %arg13[%c1_200, %c1_201] : memref<4x9xf32, #tpu.memory_space<smem>>
    %463 = vector.broadcast %462 : f32 to vector<32x32xf32>
    %464 = arith.mulf %461, %463 : vector<32x32xf32>
    %465 = arith.addf %460, %464 : vector<32x32xf32>
    %466 = vector.extract_strided_slice %456 {offsets = [0, 2], sizes = [32, 32], strides = [1, 1]} : vector<34x34xf32> to vector<32x32xf32>
    %c1_202 = arith.constant 1 : index
    %c2_203 = arith.constant 2 : index
    %467 = memref.load %arg13[%c1_202, %c2_203] : memref<4x9xf32, #tpu.memory_space<smem>>
    %468 = vector.broadcast %467 : f32 to vector<32x32xf32>
    %469 = arith.mulf %466, %468 : vector<32x32xf32>
    %470 = arith.addf %465, %469 : vector<32x32xf32>
    %471 = vector.extract_strided_slice %456 {offsets = [1, 0], sizes = [32, 32], strides = [1, 1]} : vector<34x34xf32> to vector<32x32xf32>
    %c1_204 = arith.constant 1 : index
    %c3_205 = arith.constant 3 : index
    %472 = memref.load %arg13[%c1_204, %c3_205] : memref<4x9xf32, #tpu.memory_space<smem>>
    %473 = vector.broadcast %472 : f32 to vector<32x32xf32>
    %474 = arith.mulf %471, %473 : vector<32x32xf32>
    %475 = arith.addf %470, %474 : vector<32x32xf32>
    %476 = vector.extract_strided_slice %456 {offsets = [1, 1], sizes = [32, 32], strides = [1, 1]} : vector<34x34xf32> to vector<32x32xf32>
    %c1_206 = arith.constant 1 : index
    %c4_207 = arith.constant 4 : index
    %477 = memref.load %arg13[%c1_206, %c4_207] : memref<4x9xf32, #tpu.memory_space<smem>>
    %478 = vector.broadcast %477 : f32 to vector<32x32xf32>
    %479 = arith.mulf %476, %478 : vector<32x32xf32>
    %480 = arith.addf %475, %479 : vector<32x32xf32>
    %481 = vector.extract_strided_slice %456 {offsets = [1, 2], sizes = [32, 32], strides = [1, 1]} : vector<34x34xf32> to vector<32x32xf32>
    %c1_208 = arith.constant 1 : index
    %c5_209 = arith.constant 5 : index
    %482 = memref.load %arg13[%c1_208, %c5_209] : memref<4x9xf32, #tpu.memory_space<smem>>
    %483 = vector.broadcast %482 : f32 to vector<32x32xf32>
    %484 = arith.mulf %481, %483 : vector<32x32xf32>
    %485 = arith.addf %480, %484 : vector<32x32xf32>
    %486 = vector.extract_strided_slice %456 {offsets = [2, 0], sizes = [32, 32], strides = [1, 1]} : vector<34x34xf32> to vector<32x32xf32>
    %c1_210 = arith.constant 1 : index
    %c6_211 = arith.constant 6 : index
    %487 = memref.load %arg13[%c1_210, %c6_211] : memref<4x9xf32, #tpu.memory_space<smem>>
    %488 = vector.broadcast %487 : f32 to vector<32x32xf32>
    %489 = arith.mulf %486, %488 : vector<32x32xf32>
    %490 = arith.addf %485, %489 : vector<32x32xf32>
    %491 = vector.extract_strided_slice %456 {offsets = [2, 1], sizes = [32, 32], strides = [1, 1]} : vector<34x34xf32> to vector<32x32xf32>
    %c1_212 = arith.constant 1 : index
    %c7_213 = arith.constant 7 : index
    %492 = memref.load %arg13[%c1_212, %c7_213] : memref<4x9xf32, #tpu.memory_space<smem>>
    %493 = vector.broadcast %492 : f32 to vector<32x32xf32>
    %494 = arith.mulf %491, %493 : vector<32x32xf32>
    %495 = arith.addf %490, %494 : vector<32x32xf32>
    %496 = vector.extract_strided_slice %456 {offsets = [2, 2], sizes = [32, 32], strides = [1, 1]} : vector<34x34xf32> to vector<32x32xf32>
    %c1_214 = arith.constant 1 : index
    %c8_215 = arith.constant 8 : index
    %497 = memref.load %arg13[%c1_214, %c8_215] : memref<4x9xf32, #tpu.memory_space<smem>>
    %498 = vector.broadcast %497 : f32 to vector<32x32xf32>
    %499 = arith.mulf %496, %498 : vector<32x32xf32>
    %500 = arith.addf %495, %499 : vector<32x32xf32>
    %c1_216 = arith.constant 1 : index
    %501 = memref.load %arg14[%c1_216] : memref<4xf32, #tpu.memory_space<smem>>
    %502 = vector.broadcast %501 : f32 to vector<32x32xf32>
    %503 = arith.addf %500, %502 : vector<32x32xf32>
    %c0_217 = arith.constant 0 : index
    %c1_218 = arith.constant 1 : index
    %504 = memref.load %arg15[%c0_217, %c1_218] : memref<8x4xf32, #tpu.memory_space<smem>>
    %505 = vector.broadcast %504 : f32 to vector<32x32xf32>
    %506 = arith.mulf %503, %505 : vector<32x32xf32>
    %507 = arith.addf %432, %506 : vector<32x32xf32>
    %c1_219 = arith.constant 1 : index
    %c1_220 = arith.constant 1 : index
    %508 = memref.load %arg15[%c1_219, %c1_220] : memref<8x4xf32, #tpu.memory_space<smem>>
    %509 = vector.broadcast %508 : f32 to vector<32x32xf32>
    %510 = arith.mulf %503, %509 : vector<32x32xf32>
    %511 = arith.addf %435, %510 : vector<32x32xf32>
    %c2_221 = arith.constant 2 : index
    %c1_222 = arith.constant 1 : index
    %512 = memref.load %arg15[%c2_221, %c1_222] : memref<8x4xf32, #tpu.memory_space<smem>>
    %513 = vector.broadcast %512 : f32 to vector<32x32xf32>
    %514 = arith.mulf %503, %513 : vector<32x32xf32>
    %515 = arith.addf %438, %514 : vector<32x32xf32>
    %c3_223 = arith.constant 3 : index
    %c1_224 = arith.constant 1 : index
    %516 = memref.load %arg15[%c3_223, %c1_224] : memref<8x4xf32, #tpu.memory_space<smem>>
    %517 = vector.broadcast %516 : f32 to vector<32x32xf32>
    %518 = arith.mulf %503, %517 : vector<32x32xf32>
    %519 = arith.addf %441, %518 : vector<32x32xf32>
    %c4_225 = arith.constant 4 : index
    %c1_226 = arith.constant 1 : index
    %520 = memref.load %arg15[%c4_225, %c1_226] : memref<8x4xf32, #tpu.memory_space<smem>>
    %521 = vector.broadcast %520 : f32 to vector<32x32xf32>
    %522 = arith.mulf %503, %521 : vector<32x32xf32>
    %523 = arith.addf %444, %522 : vector<32x32xf32>
    %c5_227 = arith.constant 5 : index
    %c1_228 = arith.constant 1 : index
    %524 = memref.load %arg15[%c5_227, %c1_228] : memref<8x4xf32, #tpu.memory_space<smem>>
    %525 = vector.broadcast %524 : f32 to vector<32x32xf32>
    %526 = arith.mulf %503, %525 : vector<32x32xf32>
    %527 = arith.addf %447, %526 : vector<32x32xf32>
    %c6_229 = arith.constant 6 : index
    %c1_230 = arith.constant 1 : index
    %528 = memref.load %arg15[%c6_229, %c1_230] : memref<8x4xf32, #tpu.memory_space<smem>>
    %529 = vector.broadcast %528 : f32 to vector<32x32xf32>
    %530 = arith.mulf %503, %529 : vector<32x32xf32>
    %531 = arith.addf %450, %530 : vector<32x32xf32>
    %c7_231 = arith.constant 7 : index
    %c1_232 = arith.constant 1 : index
    %532 = memref.load %arg15[%c7_231, %c1_232] : memref<8x4xf32, #tpu.memory_space<smem>>
    %533 = vector.broadcast %532 : f32 to vector<32x32xf32>
    %534 = arith.mulf %503, %533 : vector<32x32xf32>
    %535 = arith.addf %453, %534 : vector<32x32xf32>
    %cst_233 = arith.constant dense<0.000000e+00> : vector<34x34xf32>
    %536 = tpu.matmul %122, %249, %cst_233 {dimension_numbers = #tpu.dot_dimension_numbers<[1], [0], [0], [1], [0, 0, 1, 1], [], []>} : vector<34x18xf32>, vector<18x34xf32>, vector<34x34xf32> -> vector<34x34xf32>
    %cst_234 = arith.constant dense<0.000000e+00> : vector<34x34xf32>
    %537 = tpu.matmul %123, %377, %cst_234 {dimension_numbers = #tpu.dot_dimension_numbers<[1], [0], [0], [1], [0, 0, 1, 1], [], []>} : vector<34x18xf32>, vector<18x34xf32>, vector<34x34xf32> -> vector<34x34xf32>
    %538 = arith.addf %536, %537 : vector<34x34xf32>
    %539 = vector.extract_strided_slice %538 {offsets = [0, 0], sizes = [32, 32], strides = [1, 1]} : vector<34x34xf32> to vector<32x32xf32>
    %c2_235 = arith.constant 2 : index
    %c0_236 = arith.constant 0 : index
    %540 = memref.load %arg13[%c2_235, %c0_236] : memref<4x9xf32, #tpu.memory_space<smem>>
    %541 = vector.broadcast %540 : f32 to vector<32x32xf32>
    %542 = arith.mulf %539, %541 : vector<32x32xf32>
    %543 = vector.extract_strided_slice %538 {offsets = [0, 1], sizes = [32, 32], strides = [1, 1]} : vector<34x34xf32> to vector<32x32xf32>
    %c2_237 = arith.constant 2 : index
    %c1_238 = arith.constant 1 : index
    %544 = memref.load %arg13[%c2_237, %c1_238] : memref<4x9xf32, #tpu.memory_space<smem>>
    %545 = vector.broadcast %544 : f32 to vector<32x32xf32>
    %546 = arith.mulf %543, %545 : vector<32x32xf32>
    %547 = arith.addf %542, %546 : vector<32x32xf32>
    %548 = vector.extract_strided_slice %538 {offsets = [0, 2], sizes = [32, 32], strides = [1, 1]} : vector<34x34xf32> to vector<32x32xf32>
    %c2_239 = arith.constant 2 : index
    %c2_240 = arith.constant 2 : index
    %549 = memref.load %arg13[%c2_239, %c2_240] : memref<4x9xf32, #tpu.memory_space<smem>>
    %550 = vector.broadcast %549 : f32 to vector<32x32xf32>
    %551 = arith.mulf %548, %550 : vector<32x32xf32>
    %552 = arith.addf %547, %551 : vector<32x32xf32>
    %553 = vector.extract_strided_slice %538 {offsets = [1, 0], sizes = [32, 32], strides = [1, 1]} : vector<34x34xf32> to vector<32x32xf32>
    %c2_241 = arith.constant 2 : index
    %c3_242 = arith.constant 3 : index
    %554 = memref.load %arg13[%c2_241, %c3_242] : memref<4x9xf32, #tpu.memory_space<smem>>
    %555 = vector.broadcast %554 : f32 to vector<32x32xf32>
    %556 = arith.mulf %553, %555 : vector<32x32xf32>
    %557 = arith.addf %552, %556 : vector<32x32xf32>
    %558 = vector.extract_strided_slice %538 {offsets = [1, 1], sizes = [32, 32], strides = [1, 1]} : vector<34x34xf32> to vector<32x32xf32>
    %c2_243 = arith.constant 2 : index
    %c4_244 = arith.constant 4 : index
    %559 = memref.load %arg13[%c2_243, %c4_244] : memref<4x9xf32, #tpu.memory_space<smem>>
    %560 = vector.broadcast %559 : f32 to vector<32x32xf32>
    %561 = arith.mulf %558, %560 : vector<32x32xf32>
    %562 = arith.addf %557, %561 : vector<32x32xf32>
    %563 = vector.extract_strided_slice %538 {offsets = [1, 2], sizes = [32, 32], strides = [1, 1]} : vector<34x34xf32> to vector<32x32xf32>
    %c2_245 = arith.constant 2 : index
    %c5_246 = arith.constant 5 : index
    %564 = memref.load %arg13[%c2_245, %c5_246] : memref<4x9xf32, #tpu.memory_space<smem>>
    %565 = vector.broadcast %564 : f32 to vector<32x32xf32>
    %566 = arith.mulf %563, %565 : vector<32x32xf32>
    %567 = arith.addf %562, %566 : vector<32x32xf32>
    %568 = vector.extract_strided_slice %538 {offsets = [2, 0], sizes = [32, 32], strides = [1, 1]} : vector<34x34xf32> to vector<32x32xf32>
    %c2_247 = arith.constant 2 : index
    %c6_248 = arith.constant 6 : index
    %569 = memref.load %arg13[%c2_247, %c6_248] : memref<4x9xf32, #tpu.memory_space<smem>>
    %570 = vector.broadcast %569 : f32 to vector<32x32xf32>
    %571 = arith.mulf %568, %570 : vector<32x32xf32>
    %572 = arith.addf %567, %571 : vector<32x32xf32>
    %573 = vector.extract_strided_slice %538 {offsets = [2, 1], sizes = [32, 32], strides = [1, 1]} : vector<34x34xf32> to vector<32x32xf32>
    %c2_249 = arith.constant 2 : index
    %c7_250 = arith.constant 7 : index
    %574 = memref.load %arg13[%c2_249, %c7_250] : memref<4x9xf32, #tpu.memory_space<smem>>
    %575 = vector.broadcast %574 : f32 to vector<32x32xf32>
    %576 = arith.mulf %573, %575 : vector<32x32xf32>
    %577 = arith.addf %572, %576 : vector<32x32xf32>
    %578 = vector.extract_strided_slice %538 {offsets = [2, 2], sizes = [32, 32], strides = [1, 1]} : vector<34x34xf32> to vector<32x32xf32>
    %c2_251 = arith.constant 2 : index
    %c8_252 = arith.constant 8 : index
    %579 = memref.load %arg13[%c2_251, %c8_252] : memref<4x9xf32, #tpu.memory_space<smem>>
    %580 = vector.broadcast %579 : f32 to vector<32x32xf32>
    %581 = arith.mulf %578, %580 : vector<32x32xf32>
    %582 = arith.addf %577, %581 : vector<32x32xf32>
    %c2_253 = arith.constant 2 : index
    %583 = memref.load %arg14[%c2_253] : memref<4xf32, #tpu.memory_space<smem>>
    %584 = vector.broadcast %583 : f32 to vector<32x32xf32>
    %585 = arith.addf %582, %584 : vector<32x32xf32>
    %c0_254 = arith.constant 0 : index
    %c2_255 = arith.constant 2 : index
    %586 = memref.load %arg15[%c0_254, %c2_255] : memref<8x4xf32, #tpu.memory_space<smem>>
    %587 = vector.broadcast %586 : f32 to vector<32x32xf32>
    %588 = arith.mulf %585, %587 : vector<32x32xf32>
    %589 = arith.addf %507, %588 : vector<32x32xf32>
    %c1_256 = arith.constant 1 : index
    %c2_257 = arith.constant 2 : index
    %590 = memref.load %arg15[%c1_256, %c2_257] : memref<8x4xf32, #tpu.memory_space<smem>>
    %591 = vector.broadcast %590 : f32 to vector<32x32xf32>
    %592 = arith.mulf %585, %591 : vector<32x32xf32>
    %593 = arith.addf %511, %592 : vector<32x32xf32>
    %c2_258 = arith.constant 2 : index
    %c2_259 = arith.constant 2 : index
    %594 = memref.load %arg15[%c2_258, %c2_259] : memref<8x4xf32, #tpu.memory_space<smem>>
    %595 = vector.broadcast %594 : f32 to vector<32x32xf32>
    %596 = arith.mulf %585, %595 : vector<32x32xf32>
    %597 = arith.addf %515, %596 : vector<32x32xf32>
    %c3_260 = arith.constant 3 : index
    %c2_261 = arith.constant 2 : index
    %598 = memref.load %arg15[%c3_260, %c2_261] : memref<8x4xf32, #tpu.memory_space<smem>>
    %599 = vector.broadcast %598 : f32 to vector<32x32xf32>
    %600 = arith.mulf %585, %599 : vector<32x32xf32>
    %601 = arith.addf %519, %600 : vector<32x32xf32>
    %c4_262 = arith.constant 4 : index
    %c2_263 = arith.constant 2 : index
    %602 = memref.load %arg15[%c4_262, %c2_263] : memref<8x4xf32, #tpu.memory_space<smem>>
    %603 = vector.broadcast %602 : f32 to vector<32x32xf32>
    %604 = arith.mulf %585, %603 : vector<32x32xf32>
    %605 = arith.addf %523, %604 : vector<32x32xf32>
    %c5_264 = arith.constant 5 : index
    %c2_265 = arith.constant 2 : index
    %606 = memref.load %arg15[%c5_264, %c2_265] : memref<8x4xf32, #tpu.memory_space<smem>>
    %607 = vector.broadcast %606 : f32 to vector<32x32xf32>
    %608 = arith.mulf %585, %607 : vector<32x32xf32>
    %609 = arith.addf %527, %608 : vector<32x32xf32>
    %c6_266 = arith.constant 6 : index
    %c2_267 = arith.constant 2 : index
    %610 = memref.load %arg15[%c6_266, %c2_267] : memref<8x4xf32, #tpu.memory_space<smem>>
    %611 = vector.broadcast %610 : f32 to vector<32x32xf32>
    %612 = arith.mulf %585, %611 : vector<32x32xf32>
    %613 = arith.addf %531, %612 : vector<32x32xf32>
    %c7_268 = arith.constant 7 : index
    %c2_269 = arith.constant 2 : index
    %614 = memref.load %arg15[%c7_268, %c2_269] : memref<8x4xf32, #tpu.memory_space<smem>>
    %615 = vector.broadcast %614 : f32 to vector<32x32xf32>
    %616 = arith.mulf %585, %615 : vector<32x32xf32>
    %617 = arith.addf %535, %616 : vector<32x32xf32>
    %cst_270 = arith.constant dense<0.000000e+00> : vector<34x34xf32>
    %618 = tpu.matmul %122, %251, %cst_270 {dimension_numbers = #tpu.dot_dimension_numbers<[1], [0], [0], [1], [0, 0, 1, 1], [], []>} : vector<34x18xf32>, vector<18x34xf32>, vector<34x34xf32> -> vector<34x34xf32>
    %cst_271 = arith.constant dense<0.000000e+00> : vector<34x34xf32>
    %619 = tpu.matmul %123, %379, %cst_271 {dimension_numbers = #tpu.dot_dimension_numbers<[1], [0], [0], [1], [0, 0, 1, 1], [], []>} : vector<34x18xf32>, vector<18x34xf32>, vector<34x34xf32> -> vector<34x34xf32>
    %620 = arith.addf %618, %619 : vector<34x34xf32>
    %621 = vector.extract_strided_slice %620 {offsets = [0, 0], sizes = [32, 32], strides = [1, 1]} : vector<34x34xf32> to vector<32x32xf32>
    %c3_272 = arith.constant 3 : index
    %c0_273 = arith.constant 0 : index
    %622 = memref.load %arg13[%c3_272, %c0_273] : memref<4x9xf32, #tpu.memory_space<smem>>
    %623 = vector.broadcast %622 : f32 to vector<32x32xf32>
    %624 = arith.mulf %621, %623 : vector<32x32xf32>
    %625 = vector.extract_strided_slice %620 {offsets = [0, 1], sizes = [32, 32], strides = [1, 1]} : vector<34x34xf32> to vector<32x32xf32>
    %c3_274 = arith.constant 3 : index
    %c1_275 = arith.constant 1 : index
    %626 = memref.load %arg13[%c3_274, %c1_275] : memref<4x9xf32, #tpu.memory_space<smem>>
    %627 = vector.broadcast %626 : f32 to vector<32x32xf32>
    %628 = arith.mulf %625, %627 : vector<32x32xf32>
    %629 = arith.addf %624, %628 : vector<32x32xf32>
    %630 = vector.extract_strided_slice %620 {offsets = [0, 2], sizes = [32, 32], strides = [1, 1]} : vector<34x34xf32> to vector<32x32xf32>
    %c3_276 = arith.constant 3 : index
    %c2_277 = arith.constant 2 : index
    %631 = memref.load %arg13[%c3_276, %c2_277] : memref<4x9xf32, #tpu.memory_space<smem>>
    %632 = vector.broadcast %631 : f32 to vector<32x32xf32>
    %633 = arith.mulf %630, %632 : vector<32x32xf32>
    %634 = arith.addf %629, %633 : vector<32x32xf32>
    %635 = vector.extract_strided_slice %620 {offsets = [1, 0], sizes = [32, 32], strides = [1, 1]} : vector<34x34xf32> to vector<32x32xf32>
    %c3_278 = arith.constant 3 : index
    %c3_279 = arith.constant 3 : index
    %636 = memref.load %arg13[%c3_278, %c3_279] : memref<4x9xf32, #tpu.memory_space<smem>>
    %637 = vector.broadcast %636 : f32 to vector<32x32xf32>
    %638 = arith.mulf %635, %637 : vector<32x32xf32>
    %639 = arith.addf %634, %638 : vector<32x32xf32>
    %640 = vector.extract_strided_slice %620 {offsets = [1, 1], sizes = [32, 32], strides = [1, 1]} : vector<34x34xf32> to vector<32x32xf32>
    %c3_280 = arith.constant 3 : index
    %c4_281 = arith.constant 4 : index
    %641 = memref.load %arg13[%c3_280, %c4_281] : memref<4x9xf32, #tpu.memory_space<smem>>
    %642 = vector.broadcast %641 : f32 to vector<32x32xf32>
    %643 = arith.mulf %640, %642 : vector<32x32xf32>
    %644 = arith.addf %639, %643 : vector<32x32xf32>
    %645 = vector.extract_strided_slice %620 {offsets = [1, 2], sizes = [32, 32], strides = [1, 1]} : vector<34x34xf32> to vector<32x32xf32>
    %c3_282 = arith.constant 3 : index
    %c5_283 = arith.constant 5 : index
    %646 = memref.load %arg13[%c3_282, %c5_283] : memref<4x9xf32, #tpu.memory_space<smem>>
    %647 = vector.broadcast %646 : f32 to vector<32x32xf32>
    %648 = arith.mulf %645, %647 : vector<32x32xf32>
    %649 = arith.addf %644, %648 : vector<32x32xf32>
    %650 = vector.extract_strided_slice %620 {offsets = [2, 0], sizes = [32, 32], strides = [1, 1]} : vector<34x34xf32> to vector<32x32xf32>
    %c3_284 = arith.constant 3 : index
    %c6_285 = arith.constant 6 : index
    %651 = memref.load %arg13[%c3_284, %c6_285] : memref<4x9xf32, #tpu.memory_space<smem>>
    %652 = vector.broadcast %651 : f32 to vector<32x32xf32>
    %653 = arith.mulf %650, %652 : vector<32x32xf32>
    %654 = arith.addf %649, %653 : vector<32x32xf32>
    %655 = vector.extract_strided_slice %620 {offsets = [2, 1], sizes = [32, 32], strides = [1, 1]} : vector<34x34xf32> to vector<32x32xf32>
    %c3_286 = arith.constant 3 : index
    %c7_287 = arith.constant 7 : index
    %656 = memref.load %arg13[%c3_286, %c7_287] : memref<4x9xf32, #tpu.memory_space<smem>>
    %657 = vector.broadcast %656 : f32 to vector<32x32xf32>
    %658 = arith.mulf %655, %657 : vector<32x32xf32>
    %659 = arith.addf %654, %658 : vector<32x32xf32>
    %660 = vector.extract_strided_slice %620 {offsets = [2, 2], sizes = [32, 32], strides = [1, 1]} : vector<34x34xf32> to vector<32x32xf32>
    %c3_288 = arith.constant 3 : index
    %c8_289 = arith.constant 8 : index
    %661 = memref.load %arg13[%c3_288, %c8_289] : memref<4x9xf32, #tpu.memory_space<smem>>
    %662 = vector.broadcast %661 : f32 to vector<32x32xf32>
    %663 = arith.mulf %660, %662 : vector<32x32xf32>
    %664 = arith.addf %659, %663 : vector<32x32xf32>
    %c3_290 = arith.constant 3 : index
    %665 = memref.load %arg14[%c3_290] : memref<4xf32, #tpu.memory_space<smem>>
    %666 = vector.broadcast %665 : f32 to vector<32x32xf32>
    %667 = arith.addf %664, %666 : vector<32x32xf32>
    %c0_291 = arith.constant 0 : index
    %c3_292 = arith.constant 3 : index
    %668 = memref.load %arg15[%c0_291, %c3_292] : memref<8x4xf32, #tpu.memory_space<smem>>
    %669 = vector.broadcast %668 : f32 to vector<32x32xf32>
    %670 = arith.mulf %667, %669 : vector<32x32xf32>
    %671 = arith.addf %589, %670 : vector<32x32xf32>
    %c1_293 = arith.constant 1 : index
    %c3_294 = arith.constant 3 : index
    %672 = memref.load %arg15[%c1_293, %c3_294] : memref<8x4xf32, #tpu.memory_space<smem>>
    %673 = vector.broadcast %672 : f32 to vector<32x32xf32>
    %674 = arith.mulf %667, %673 : vector<32x32xf32>
    %675 = arith.addf %593, %674 : vector<32x32xf32>
    %c2_295 = arith.constant 2 : index
    %c3_296 = arith.constant 3 : index
    %676 = memref.load %arg15[%c2_295, %c3_296] : memref<8x4xf32, #tpu.memory_space<smem>>
    %677 = vector.broadcast %676 : f32 to vector<32x32xf32>
    %678 = arith.mulf %667, %677 : vector<32x32xf32>
    %679 = arith.addf %597, %678 : vector<32x32xf32>
    %c3_297 = arith.constant 3 : index
    %c3_298 = arith.constant 3 : index
    %680 = memref.load %arg15[%c3_297, %c3_298] : memref<8x4xf32, #tpu.memory_space<smem>>
    %681 = vector.broadcast %680 : f32 to vector<32x32xf32>
    %682 = arith.mulf %667, %681 : vector<32x32xf32>
    %683 = arith.addf %601, %682 : vector<32x32xf32>
    %c4_299 = arith.constant 4 : index
    %c3_300 = arith.constant 3 : index
    %684 = memref.load %arg15[%c4_299, %c3_300] : memref<8x4xf32, #tpu.memory_space<smem>>
    %685 = vector.broadcast %684 : f32 to vector<32x32xf32>
    %686 = arith.mulf %667, %685 : vector<32x32xf32>
    %687 = arith.addf %605, %686 : vector<32x32xf32>
    %c5_301 = arith.constant 5 : index
    %c3_302 = arith.constant 3 : index
    %688 = memref.load %arg15[%c5_301, %c3_302] : memref<8x4xf32, #tpu.memory_space<smem>>
    %689 = vector.broadcast %688 : f32 to vector<32x32xf32>
    %690 = arith.mulf %667, %689 : vector<32x32xf32>
    %691 = arith.addf %609, %690 : vector<32x32xf32>
    %c6_303 = arith.constant 6 : index
    %c3_304 = arith.constant 3 : index
    %692 = memref.load %arg15[%c6_303, %c3_304] : memref<8x4xf32, #tpu.memory_space<smem>>
    %693 = vector.broadcast %692 : f32 to vector<32x32xf32>
    %694 = arith.mulf %667, %693 : vector<32x32xf32>
    %695 = arith.addf %613, %694 : vector<32x32xf32>
    %c7_305 = arith.constant 7 : index
    %c3_306 = arith.constant 3 : index
    %696 = memref.load %arg15[%c7_305, %c3_306] : memref<8x4xf32, #tpu.memory_space<smem>>
    %697 = vector.broadcast %696 : f32 to vector<32x32xf32>
    %698 = arith.mulf %667, %697 : vector<32x32xf32>
    %699 = arith.addf %617, %698 : vector<32x32xf32>
    %c0_307 = arith.constant 0 : index
    %700 = memref.load %arg16[%c0_307] : memref<8xf32, #tpu.memory_space<smem>>
    %701 = vector.broadcast %700 : f32 to vector<32x32xf32>
    %702 = arith.addf %671, %701 : vector<32x32xf32>
    %c0_308 = arith.constant 0 : index
    %c0_309 = arith.constant 0 : index
    %c0_310 = arith.constant 0 : index
    %c0_311 = arith.constant 0 : index
    %703 = vector.load %arg17[%c0_308, %c0_309, %c0_310, %c0_311] : memref<1x8x32x32xf32, #tpu.memory_space<vmem>>, vector<1x1x32x32xf32>
    %704 = vector.shape_cast %703 : vector<1x1x32x32xf32> to vector<32x32xf32>
    %705 = vector.shape_cast %702 : vector<32x32xf32> to vector<1x1x32x32xf32>
    tpu.vector_store %arg17[%c0_308, %c0_309, %c0_310, %c0_311], %705 {strides = array<i32>} : memref<1x8x32x32xf32, #tpu.memory_space<vmem>>, vector<1x1x32x32xf32>,
    %c1_312 = arith.constant 1 : index
    %706 = memref.load %arg16[%c1_312] : memref<8xf32, #tpu.memory_space<smem>>
    %707 = vector.broadcast %706 : f32 to vector<32x32xf32>
    %708 = arith.addf %675, %707 : vector<32x32xf32>
    %c0_313 = arith.constant 0 : index
    %c1_314 = arith.constant 1 : index
    %c0_315 = arith.constant 0 : index
    %c0_316 = arith.constant 0 : index
    %709 = vector.load %arg17[%c0_313, %c1_314, %c0_315, %c0_316] : memref<1x8x32x32xf32, #tpu.memory_space<vmem>>, vector<1x1x32x32xf32>
    %710 = vector.shape_cast %709 : vector<1x1x32x32xf32> to vector<32x32xf32>
    %711 = vector.shape_cast %708 : vector<32x32xf32> to vector<1x1x32x32xf32>
    tpu.vector_store %arg17[%c0_313, %c1_314, %c0_315, %c0_316], %711 {strides = array<i32>} : memref<1x8x32x32xf32, #tpu.memory_space<vmem>>, vector<1x1x32x32xf32>,
    %c2_317 = arith.constant 2 : index
    %712 = memref.load %arg16[%c2_317] : memref<8xf32, #tpu.memory_space<smem>>
    %713 = vector.broadcast %712 : f32 to vector<32x32xf32>
    %714 = arith.addf %679, %713 : vector<32x32xf32>
    %c0_318 = arith.constant 0 : index
    %c2_319 = arith.constant 2 : index
    %c0_320 = arith.constant 0 : index
    %c0_321 = arith.constant 0 : index
    %715 = vector.load %arg17[%c0_318, %c2_319, %c0_320, %c0_321] : memref<1x8x32x32xf32, #tpu.memory_space<vmem>>, vector<1x1x32x32xf32>
    %716 = vector.shape_cast %715 : vector<1x1x32x32xf32> to vector<32x32xf32>
    %717 = vector.shape_cast %714 : vector<32x32xf32> to vector<1x1x32x32xf32>
    tpu.vector_store %arg17[%c0_318, %c2_319, %c0_320, %c0_321], %717 {strides = array<i32>} : memref<1x8x32x32xf32, #tpu.memory_space<vmem>>, vector<1x1x32x32xf32>,
    %c3_322 = arith.constant 3 : index
    %718 = memref.load %arg16[%c3_322] : memref<8xf32, #tpu.memory_space<smem>>
    %719 = vector.broadcast %718 : f32 to vector<32x32xf32>
    %720 = arith.addf %683, %719 : vector<32x32xf32>
    %c0_323 = arith.constant 0 : index
    %c3_324 = arith.constant 3 : index
    %c0_325 = arith.constant 0 : index
    %c0_326 = arith.constant 0 : index
    %721 = vector.load %arg17[%c0_323, %c3_324, %c0_325, %c0_326] : memref<1x8x32x32xf32, #tpu.memory_space<vmem>>, vector<1x1x32x32xf32>
    %722 = vector.shape_cast %721 : vector<1x1x32x32xf32> to vector<32x32xf32>
    %723 = vector.shape_cast %720 : vector<32x32xf32> to vector<1x1x32x32xf32>
    tpu.vector_store %arg17[%c0_323, %c3_324, %c0_325, %c0_326], %723 {strides = array<i32>} : memref<1x8x32x32xf32, #tpu.memory_space<vmem>>, vector<1x1x32x32xf32>,
    %c4_327 = arith.constant 4 : index
    %724 = memref.load %arg16[%c4_327] : memref<8xf32, #tpu.memory_space<smem>>
    %725 = vector.broadcast %724 : f32 to vector<32x32xf32>
    %726 = arith.addf %687, %725 : vector<32x32xf32>
    %c0_328 = arith.constant 0 : index
    %c4_329 = arith.constant 4 : index
    %c0_330 = arith.constant 0 : index
    %c0_331 = arith.constant 0 : index
    %727 = vector.load %arg17[%c0_328, %c4_329, %c0_330, %c0_331] : memref<1x8x32x32xf32, #tpu.memory_space<vmem>>, vector<1x1x32x32xf32>
    %728 = vector.shape_cast %727 : vector<1x1x32x32xf32> to vector<32x32xf32>
    %729 = vector.shape_cast %726 : vector<32x32xf32> to vector<1x1x32x32xf32>
    tpu.vector_store %arg17[%c0_328, %c4_329, %c0_330, %c0_331], %729 {strides = array<i32>} : memref<1x8x32x32xf32, #tpu.memory_space<vmem>>, vector<1x1x32x32xf32>,
    %c5_332 = arith.constant 5 : index
    %730 = memref.load %arg16[%c5_332] : memref<8xf32, #tpu.memory_space<smem>>
    %731 = vector.broadcast %730 : f32 to vector<32x32xf32>
    %732 = arith.addf %691, %731 : vector<32x32xf32>
    %c0_333 = arith.constant 0 : index
    %c5_334 = arith.constant 5 : index
    %c0_335 = arith.constant 0 : index
    %c0_336 = arith.constant 0 : index
    %733 = vector.load %arg17[%c0_333, %c5_334, %c0_335, %c0_336] : memref<1x8x32x32xf32, #tpu.memory_space<vmem>>, vector<1x1x32x32xf32>
    %734 = vector.shape_cast %733 : vector<1x1x32x32xf32> to vector<32x32xf32>
    %735 = vector.shape_cast %732 : vector<32x32xf32> to vector<1x1x32x32xf32>
    tpu.vector_store %arg17[%c0_333, %c5_334, %c0_335, %c0_336], %735 {strides = array<i32>} : memref<1x8x32x32xf32, #tpu.memory_space<vmem>>, vector<1x1x32x32xf32>,
    %c6_337 = arith.constant 6 : index
    %736 = memref.load %arg16[%c6_337] : memref<8xf32, #tpu.memory_space<smem>>
    %737 = vector.broadcast %736 : f32 to vector<32x32xf32>
    %738 = arith.addf %695, %737 : vector<32x32xf32>
    %c0_338 = arith.constant 0 : index
    %c6_339 = arith.constant 6 : index
    %c0_340 = arith.constant 0 : index
    %c0_341 = arith.constant 0 : index
    %739 = vector.load %arg17[%c0_338, %c6_339, %c0_340, %c0_341] : memref<1x8x32x32xf32, #tpu.memory_space<vmem>>, vector<1x1x32x32xf32>
    %740 = vector.shape_cast %739 : vector<1x1x32x32xf32> to vector<32x32xf32>
    %741 = vector.shape_cast %738 : vector<32x32xf32> to vector<1x1x32x32xf32>
    tpu.vector_store %arg17[%c0_338, %c6_339, %c0_340, %c0_341], %741 {strides = array<i32>} : memref<1x8x32x32xf32, #tpu.memory_space<vmem>>, vector<1x1x32x32xf32>,
    %c7_342 = arith.constant 7 : index
    %742 = memref.load %arg16[%c7_342] : memref<8xf32, #tpu.memory_space<smem>>
    %743 = vector.broadcast %742 : f32 to vector<32x32xf32>
    %744 = arith.addf %699, %743 : vector<32x32xf32>
    %c0_343 = arith.constant 0 : index
    %c7_344 = arith.constant 7 : index
    %c0_345 = arith.constant 0 : index
    %c0_346 = arith.constant 0 : index
    %745 = vector.load %arg17[%c0_343, %c7_344, %c0_345, %c0_346] : memref<1x8x32x32xf32, #tpu.memory_space<vmem>>, vector<1x1x32x32xf32>
    %746 = vector.shape_cast %745 : vector<1x1x32x32xf32> to vector<32x32xf32>
    %747 = vector.shape_cast %744 : vector<32x32xf32> to vector<1x1x32x32xf32>
    tpu.vector_store %arg17[%c0_343, %c7_344, %c0_345, %c0_346], %747 {strides = array<i32>} : memref<1x8x32x32xf32, #tpu.memory_space<vmem>>, vector<1x1x32x32xf32>,
    return
  }
  func.func @transform_0(%arg0: i32, %arg1: i32) -> (i32, i32, i32, i32) {
    %c0_i32 = arith.constant 0 : i32
    %c0_i32_0 = arith.constant 0 : i32
    %c0_i32_1 = arith.constant 0 : i32
    return %arg0, %c0_i32, %arg1, %c0_i32_0 : i32, i32, i32, i32
  }
  func.func @transform_1(%arg0: i32, %arg1: i32) -> (i32, i32, i32, i32) {
    %c1_i32 = arith.constant 1 : i32
    %0 = arith.subi %arg1, %c1_i32 : i32
    %c0_i32 = arith.constant 0 : i32
    %1 = arith.maxsi %0, %c0_i32 : i32
    %c0_i32_0 = arith.constant 0 : i32
    %c0_i32_1 = arith.constant 0 : i32
    %c0_i32_2 = arith.constant 0 : i32
    return %arg0, %c0_i32_0, %1, %c0_i32_1 : i32, i32, i32, i32
  }
  func.func @transform_2(%arg0: i32, %arg1: i32) -> (i32, i32, i32, i32) {
    %c1_i32 = arith.constant 1 : i32
    %0 = arith.addi %arg1, %c1_i32 : i32
    %c0_i32 = arith.constant 0 : i32
    %1 = arith.minsi %0, %c0_i32 : i32
    %c0_i32_0 = arith.constant 0 : i32
    %c0_i32_1 = arith.constant 0 : i32
    %c0_i32_2 = arith.constant 0 : i32
    return %arg0, %c0_i32_0, %1, %c0_i32_1 : i32, i32, i32, i32
  }
  func.func @transform_3(%arg0: i32, %arg1: i32) -> (i32, i32) {
    %c0_i32 = arith.constant 0 : i32
    %c0_i32_0 = arith.constant 0 : i32
    %c0_i32_1 = arith.constant 0 : i32
    return %c0_i32, %c0_i32_0 : i32, i32
  }
  func.func @transform_4(%arg0: i32, %arg1: i32) -> (i32, i32) {
    %c0_i32 = arith.constant 0 : i32
    %c0_i32_0 = arith.constant 0 : i32
    %c0_i32_1 = arith.constant 0 : i32
    return %c0_i32, %c0_i32_0 : i32, i32
  }
  func.func @transform_5(%arg0: i32, %arg1: i32) -> (i32, i32) {
    %c0_i32 = arith.constant 0 : i32
    %c0_i32_0 = arith.constant 0 : i32
    %c0_i32_1 = arith.constant 0 : i32
    return %c0_i32, %c0_i32_0 : i32, i32
  }
  func.func @transform_6(%arg0: i32, %arg1: i32) -> (i32, i32) {
    %c0_i32 = arith.constant 0 : i32
    %c0_i32_0 = arith.constant 0 : i32
    %c0_i32_1 = arith.constant 0 : i32
    return %c0_i32, %c0_i32_0 : i32, i32
  }
  func.func @transform_7(%arg0: i32, %arg1: i32) -> (i32, i32) {
    %c0_i32 = arith.constant 0 : i32
    %c0_i32_0 = arith.constant 0 : i32
    %c0_i32_1 = arith.constant 0 : i32
    return %c0_i32, %c0_i32_0 : i32, i32
  }
  func.func @transform_8(%arg0: i32, %arg1: i32) -> i32 {
    %c0_i32 = arith.constant 0 : i32
    %c0_i32_0 = arith.constant 0 : i32
    return %c0_i32 : i32
  }
  func.func @transform_9(%arg0: i32, %arg1: i32) -> (i32, i32) {
    %c0_i32 = arith.constant 0 : i32
    %c0_i32_0 = arith.constant 0 : i32
    %c0_i32_1 = arith.constant 0 : i32
    return %c0_i32, %c0_i32_0 : i32, i32
  }
  func.func @transform_10(%arg0: i32, %arg1: i32) -> i32 {
    %c0_i32 = arith.constant 0 : i32
    %c0_i32_0 = arith.constant 0 : i32
    return %c0_i32 : i32
  }
  func.func @transform_11(%arg0: i32, %arg1: i32) -> (i32, i32) {
    %c0_i32 = arith.constant 0 : i32
    %c0_i32_0 = arith.constant 0 : i32
    %c0_i32_1 = arith.constant 0 : i32
    return %c0_i32, %c0_i32_0 : i32, i32
  }
  func.func @transform_12(%arg0: i32, %arg1: i32) -> i32 {
    %c0_i32 = arith.constant 0 : i32
    %c0_i32_0 = arith.constant 0 : i32
    return %c0_i32 : i32
  }
  func.func @transform_13(%arg0: i32, %arg1: i32) -> (i32, i32) {
    %c0_i32 = arith.constant 0 : i32
    %c0_i32_0 = arith.constant 0 : i32
    %c0_i32_1 = arith.constant 0 : i32
    return %c0_i32, %c0_i32_0 : i32, i32
  }
  func.func @transform_14(%arg0: i32, %arg1: i32) -> i32 {
    %c0_i32 = arith.constant 0 : i32
    %c0_i32_0 = arith.constant 0 : i32
    return %c0_i32 : i32
  }
  func.func @transform_15(%arg0: i32, %arg1: i32) -> (i32, i32, i32, i32) {
    %c0_i32 = arith.constant 0 : i32
    %c0_i32_0 = arith.constant 0 : i32
    %c0_i32_1 = arith.constant 0 : i32
    return %arg0, %c0_i32, %arg1, %c0_i32_0 : i32, i32, i32, i32
  }
}

</mosaic_0001>

<bundles_post_ra>
// kernel: dsup_forward.1
= control target key start
LH: loop header
LB: loop body
LE: loop exit
PB: predicated region body
PF: predicated region fallthrough
CT: control target
= control target key end

     0   :  { %s10208_s0 = inlined_call_operand.hbm [shape: f32[2,4,16,16], index: 0, kind: input, shape index: {}, may-alias: {0,1,2}]   ;;  %s10209_s1 = inlined_call_operand.hbm [shape: f32[2,4,16,16], index: 1, kind: input, shape index: {}, may-alias: {0,1,2}]   ;;  %s10210_s2 = inlined_call_operand.hbm [shape: f32[2,4,16,16], index: 2, kind: input, shape index: {}, may-alias: {0,1,2}]   ;;  %s10211_s3 = inlined_call_operand.vmem [shape: f32[16,34], index: 3, kind: input, shape index: {}]   ;;  %s10212_s4 = inlined_call_operand.vmem [shape: f32[16,34], index: 4, kind: input, shape index: {}]   ;;  %s10213_s5 = inlined_call_operand.vmem [shape: f32[34,18], index: 5, kind: input, shape index: {}]   ;;  %s10214_s6 = inlined_call_operand.vmem [shape: f32[34,18], index: 6, kind: input, shape index: {}]   ;;  %s10215_s7 = inlined_call_operand.hbm [shape: f32[4,4], index: 7, kind: input, shape index: {}]   ;;  %s10216_s8 = inlined_call_operand.hbm [shape: f32[4], index: 8, kind: input, shape index: {}]   ;;  %s10217_s9 = inlined_call_operand.vmem [shape: f32[4,4], index: 9, kind: input, shape index: {}]   ;;  %s10218_s10 = inlined_call_operand.hbm [shape: f32[4], index: 10, kind: input, shape index: {}]   ;;  %s10219_s11 = inlined_call_operand.vmem [shape: f32[4,9], index: 11, kind: input, shape index: {}]   ;;  %s10220_s12 = inlined_call_operand.hbm [shape: f32[4], index: 12, kind: input, shape index: {}]   ;;  %s10221_s13 = inlined_call_operand.vmem [shape: f32[8,4], index: 13, kind: input, shape index: {}]   ;;  %s10222_s14 = inlined_call_operand.vmem [shape: f32[8], index: 14, kind: input, shape index: {}]   ;;  %s10223_s15 = inlined_call_operand.hbm [shape: f32[2,8,32,32], index: 15, kind: output, shape index: {}]  }
   0x1   :  { %10305 = sst [smem:[#allocation96_spill]] %s10208_s0 }
   0x2   :  { %10306 = sst [smem:[#allocation97_spill]] %s10209_s1 }
   0x3   :  { %10307 = sst [smem:[#allocation98_spill]] %s10210_s2 }
   0x4   :  { %10308 = sst [smem:[#allocation99_spill]] %s10211_s3 }
   0x5   :  { %10309 = sst [smem:[#allocation100_spill]] %s10212_s4 }
   0x6   :  { %10310 = sst [smem:[#allocation101_spill]] %s10213_s5 }
   0x7   :  { %10311 = sst [smem:[#allocation102_spill]] %s10214_s6 }
   0x8   :  { %10312 = sst [smem:[#allocation103_spill]] %s10215_s7 }
   0x9   :  { %10313 = sst [smem:[#allocation104_spill]] %s10216_s8 }
   0xa   :  { %10314 = sst [smem:[#allocation105_spill]] %s10219_s11 }
   0xb   :  { %10315 = sst [smem:[#allocation106_spill]] %s10223_s15 }
   0xc   :  { %20 = vsyncpa [#allocation4], 0 }
   0xd   :  { %22 = vsyncpa [#allocation4 + $0x1], 0 }
   0xe   :  { %23 = vsyncpa [#allocation9], 0 }
   0xf   :  { %25 = vsyncpa [#allocation9 + $0x1], 0 }
  0x10   :  { %26 = vsyncpa [#allocation6], 0 }
  0x11   :  { %27 = vsyncpa [#allocation13], 0 }
  0x12   :  { %28 = vsyncpa [#allocation7], 0 }
  0x13   :  { %29 = vsyncpa [#allocation17], 0 }
  0x14   :  { %30 = vsyncpa [#allocation19], 0 }
  0x15   :  { %31 = vsyncpa [#allocation22], 0 }
  0x16   :  { %32 = vsyncpa [#allocation5], 0 }
  0x17   :  { %34 = vsyncpa [#allocation5 + $0x1], 0  ;;  %s6843_s18 = smov 0   ;;  %s6845_s19 = smov 0  }
  0x18   :  { %s6847_s20 = smov 0   ;;  %s6849_s21 = smov 0  }
  0x19   :  { %s6851_s22 = smov 0   ;;  %s6853_s23 = smov 0  }
  0x1a LB: > { %10316 = sst [smem:[#allocation35_spill]] %s6720_s18  ;;  %s10320_s11 = sld [smem:[#allocation105_spill]]  ;;  %s6740_s23 = sphi %s6853_s23, %s40_s23   ;;  %s6736_s22 = sphi %s6851_s22, %s10586_s22   ;;  %s6732_s21 = sphi %s6849_s21, %s10585_s21   ;;  %s6728_s20 = sphi %s6847_s20, %s10589_s20   ;;  %s6724_s19 = sphi %s6845_s19, %s10588_s19   ;;  %s6720_s18 = sphi %s6843_s18, %s10587_s18  }
  0x1b   : > { %10317 = sst [smem:[#allocation36_spill]] %s6732_s21  ;;  %s6877_s27 = sadd.s32 4294967295, %s6740_s23  }
  0x1c   : > { %10318 = sst [smem:[#allocation37_spill]] %s6736_s22  ;;  %p5273_p0 = scmp.ge.s32.totalorder %s6740_s23, 1 }
  0x1d   : > { %10319 = sst [smem:[#allocation38_spill]] %s6740_s23  ;;  %p10237_p1 = scmp.eq.s32.totalorder %s6877_s27, 0 }
  0x1e   : > { %10321 = sst [smem:[#allocation39_spill]] %s6877_s27  ;;  %p433_p2 = scmp.lt.s32.totalorder %s6740_s23, 3 }
  0x1f   : > { %s10324_s8 = sld [smem:[#allocation104_spill]] }
  0x20   : > { %s496_s26 = sshll.u32 %s10320_s11, 4  ;;  %p6883_p4 = pnand %p5273_p0, %p433_p2  ;;  %s497_s26 = int_to_ptr.vmem [resolvable:$true] %s496_s26 }
  0x22   : > { %s10322_s28 = scalar_select %p6883_p4, 1, 0 }
  0x23   : > { %p6274_p5 = pneg %p6883_p4 }
  0x25   : > { %p6891_p6 = pnand %p6274_p5, %p10237_p1  ;;  %s6420_s17 = scalar_lea.hbm %s10324_s8, 16 }
  0x26   : > { %p6421_p7 = scmp.ne.s32.totalorder %s10324_s8, %s6420_s17  ;;  %p6427_p11 = scmp.lt.u32.totalorder %s6420_s17, %s10324_s8 }
  0x27   : > { %s10323_s29 = scalar_select %p6891_p6, 1, 0 }
  0x28   : > { %p6903_p8 = pneg %p6891_p6 }
  0x2a   : > { %s10325_s11 = scalar_select %p6903_p8, 1, 0 }
  0x2b   : > { %p6423_p9 = pnand %p6903_p8, %p6421_p7 }
  0x2d   : > { %p6424_p10 = pneg %p6423_p9 }
  0x2f   : > { %p6429_p12 = pnand %p6427_p11, %p6424_p10 }
  0x31   : > { %6432 = shalt.err (!%p6429_p12)
}
  0x32   : > { %s6742_s30 = smov [#allocation12]   ;;  %s6433_s25 = scalar_lea.vmem %s497_s26, 64 }
  0x33   : > { %6280 = dma.hbm_to_smem (!%p6891_p6), %s10324_s8, 16, %s6742_s30, [#allocation13]  }
  0x34   : > { %p6434_p13 = scmp.ne.s32.totalorder %s497_s26, %s6433_s25  ;;  %p6441_p5 = scmp.lt.s32.totalorder %s497_s26, %s497_s26 }
  0x35   : > { %p6442_p7 = scmp.lt.s32.totalorder %s6433_s25, %s6433_s25 }
  0x36   : > { %p6436_p0 = pnand %p6434_p13, %p6903_p8 }
  0x37   : > { %p6443_p9 = por %p6442_p7, %p6441_p5 }
  0x38   : > { %p6437_p2 = pneg %p6436_p0 }
  0x3a   : > { %p6444_p3 = pnand %p6443_p9, %p6437_p2 }
  0x3c   : > { %6447 = shalt.err (!%p6444_p3)
}
  0x3d   : > { %s6743_s15 = smov [#allocation16]   ;;  %s5272_s21 = sadd.s32 4294967294, %s6740_s23  }
  0x3e   : > { %6289 = dma.vmem_to_smem (!%p6891_p6), %s497_s26, 64, %s6743_s15, [#allocation17]  }
  0x3f   : > { %s52_s17 = sadd.s32 1, %s6736_s22  ;;  %s61_s30 = sadd.s32 1, %s6728_s20 }
  0x40   : > { %p54_p3 = scmp.ge.s32.totalorder %s52_s17, 2  ;;  %p68_p10 = scmp.ne.s32.totalorder %s6728_s20, %s6724_s19 }
  0x41   : > { %p69_p11 = scmp.eq.s32.totalorder %s6740_s23, 0  ;;  %p74_p13 = scmp.ne.s32.totalorder %s6724_s19, %s6720_s18 }
  0x42   : > { %s10591_s17 = smov (%p54_p3, %s52_s17), 0  ;;  %p420_p0 = scmp.eq.s32.totalorder %s6877_s27, 1 }
  0x43   : > { %10326 = sst [smem:[#allocation40_spill]] %s10591_s17  ;;  %p6929_p12 = por %p69_p11, %p68_p10 }
  0x44   : > { %s56_s26 = ssub.s32 %s6736_s22, %s10591_s17  ;;  %p6940_p5 = por %p10237_p1, %p74_p13 }
  0x45   : > { %p59_p2 = scmp.eq.s32.totalorder %s56_s26, 0  ;;  %p6944_p7 = por %p420_p0, %p68_p10 }
  0x46   : > { %s10328_s24 = scalar_select %p6940_p5, 1, 0 }
  0x47   : > { %s10329_s25 = scalar_select %p6944_p7, 1, 0 }
  0x48   : > { %p426_p9 = scmp.eq.s32.totalorder %s5272_s21, 1  ;;  %p6321_p11 = scmp.lt.s32.totalorder %s6740_s23, 2 }
  0x49   : > { %10330 = sst [smem:[#allocation41_spill]] %s10329_s25  ;;  %s10230_s17 = sand.u32 1, %s6728_s20  }
  0x4a   : > { %s6949_s15 = scalar_select %p59_p2, %s6728_s20, %s61_s30  }
  0x4b   : > { %p6951_p3 = por %p426_p9, %p74_p13  ;;  %s6958_s18 = sshll.u32 %s6736_s22, 10 }
  0x4c   : > { %10331 = sst [smem:[#allocation42_spill]] %s6949_s15  ;;  %s6962_s26 = sshll.u32 %s10230_s17, 6 }
  0x4d   : > { %s10332_s8 = scalar_select %p6951_p3, 1, 0 }
  0x4e   : > { %p6966_p10 = pnand %p6321_p11, %p6929_p12  ;;  %s561_s21 = sand.u32 1, %s6740_s23  }
  0x4f   : > { %10333 = sst [smem:[#allocation43_spill]] %s10332_s8  ;;  %s10335_s1 = sld [smem:[#allocation97_spill]] }
  0x50   : > { %s565_s22 = scalar_lea.vmem [#allocation8], %s6962_s26  ;;  %s6980_s16 = scalar_lea.sflag [#allocation9], %s561_s21 }
  0x51   : > { %s577_s17 = sshll.u32 %s565_s22, 4  ;;  %p6986_p13 = pneg %p6966_p10  ;;  %s6978_s17 = int_to_ptr.vmem [resolvable:$true] %s577_s17 }
  0x55   : > { %s6975_s8 = scalar_lea.hbm %s10335_s1, %s6958_s18  ;;  %s6453_s6 = scalar_lea.hbm %s10335_s1, 2048 }
  0x56   : > { %s6448_s25 = scalar_lea.hbm %s6975_s8, 1024  ;;  %p6454_p9 = scmp.lt.u32.totalorder %s6975_s8, %s10335_s1 }
  0x57   : > { %p6449_p12 = scmp.ne.s32.totalorder %s6975_s8, %s6448_s25  ;;  %p6455_p11 = scmp.lt.u32.totalorder %s6453_s6, %s6448_s25 }
  0x58   : > { %p6457_p3 = scmp.lt.u32.totalorder %s6448_s25, %s6975_s8 }
  0x59   : > { %p6451_p0 = pnand %p6986_p13, %p6449_p12  ;;  %p6456_p1 = por %p6455_p11, %p6454_p9 }
  0x5b   : > { %p6452_p2 = pneg %p6451_p0  ;;  %p6458_p7 = por %p6457_p3, %p6456_p1 }
  0x5d   : > { %p6459_p5 = pnand %p6458_p7, %p6452_p2 }
  0x5f   : > { %6462 = shalt.err (!%p6459_p5)
}
  0x60   : > { %s6463_s21 = scalar_lea.vmem %s6978_s17, 1024  ;;  %s6744_s15 = smov [#allocation8]  }
  0x61   : > { %p6464_p12 = scmp.ne.s32.totalorder %s6978_s17, %s6463_s21  ;;  %s6468_s30 = sshll.u32 %s6744_s15, 4  ;;  %s6469_s30 = int_to_ptr.vmem [resolvable:$false] %s6468_s30 }
  0x62   : > { %s6470_s3 = scalar_lea.vmem %s6469_s30, 2048  ;;  %p6471_p6 = scmp.lt.s32.totalorder %s6978_s17, %s6469_s30 }
  0x63   : > { %p6466_p0 = pnand %p6464_p12, %p6986_p13  ;;  %p6472_p8 = scmp.lt.s32.totalorder %s6470_s3, %s6463_s21 }
  0x65   : > { %p6467_p4 = pneg %p6466_p0  ;;  %p6473_p9 = por %p6472_p8, %p6471_p6 }
  0x67   : > { %p6474_p11 = pnand %p6473_p9, %p6467_p4 }
  0x69   : > { %6477 = shalt.err (!%p6474_p11)
}
  0x6a   : > { %s10248_s6 = smov 128   ;;  %s10250_s25 = smov 8  }
  0x6b   : > { %6305 = dma.hbm_to_vmem [thread:$0]  (!%p6966_p10), %s6975_s8, 1024, %s6978_s17, %s6980_s16, %s10248_s6, %s10248_s6, %s10250_s25  }
  0x6c   : > { %s10337_s7 = sld [smem:[#allocation103_spill]]  ;;  %p10338_p4 = scmp.ne.s32.totalorder %s10325_s11, 0 }
  0x72   : > { %s6478_s30 = scalar_lea.hbm %s10337_s7, 64 }
  0x73   : > { %p6479_p1 = scmp.ne.s32.totalorder %s10337_s7, %s6478_s30  ;;  %p6485_p5 = scmp.lt.u32.totalorder %s6478_s30, %s10337_s7 }
  0x75   : > { %p6481_p6 = pnand %p6479_p1, %p10338_p4 }
  0x77   : > { %p6482_p8 = pneg %p6481_p6 }
  0x79   : > { %p6487_p7 = pnand %p6485_p5, %p6482_p8 }
  0x7b   : > { %6490 = shalt.err (!%p6487_p7)
}
  0x7c   : > { %s6747_s27 = smov [#allocation11]   ;;  %p10339_p3 = scmp.ne.s32.totalorder %s10323_s29, 0 }
  0x7d   : > { %s476_s21 = sshll.u32 %s10217_s9, 4  ;;  %s477_s21 = int_to_ptr.vmem [resolvable:$true] %s476_s21 }
  0x7e   : > { %6277 = dma.hbm_to_smem (!%p10339_p3), %s10337_s7, 64, %s6747_s27, [#allocation6]  }
  0x7f   : > { %s6491_s3 = scalar_lea.vmem %s477_s21, 64  ;;  %p6499_p9 = scmp.lt.s32.totalorder %s477_s21, %s477_s21 }
  0x80   : > { %p6492_p2 = scmp.ne.s32.totalorder %s477_s21, %s6491_s3  ;;  %p6500_p11 = scmp.lt.s32.totalorder %s6491_s3, %s6491_s3 }
  0x82   : > { %p6494_p12 = pnand %p6492_p2, %p10338_p4  ;;  %p6501_p1 = por %p6500_p11, %p6499_p9 }
  0x84   : > { %p6495_p0 = pneg %p6494_p12 }
  0x86   : > { %p6502_p6 = pnand %p6501_p1, %p6495_p0 }
  0x88   : > { %6505 = shalt.err (!%p6502_p6)
}
  0x89   : > { %s6748_s1 = smov [#allocation14]   ;;  %s6506_s30 = scalar_lea.hbm %s10218_s10, 16 }
  0x8a   : > { %6283 = dma.vmem_to_smem (!%p10339_p3), %s477_s21, 64, %s6748_s1, [#allocation7]  }
  0x8b   : > { %p6507_p8 = scmp.ne.s32.totalorder %s10218_s10, %s6506_s30  ;;  %p6513_p2 = scmp.lt.u32.totalorder %s6506_s30, %s10218_s10 }
  0x8d   : > { %p6509_p5 = pnand %p6507_p8, %p10338_p4 }
  0x8f   : > { %p6510_p7 = pneg %p6509_p5 }
  0x91   : > { %p6515_p12 = pnand %p6513_p2, %p6510_p7 }
  0x93   : > { %6518 = shalt.err (!%p6515_p12)
}
  0x94   : > { %s6749_s3 = smov [#allocation15]   ;;  %s516_s8 = sshll.u32 %s10221_s13, 4  ;;  %s517_s8 = int_to_ptr.vmem [resolvable:$true] %s516_s8 }
  0x95   : > { %6286 = dma.hbm_to_smem (!%p10339_p3), %s10218_s10, 16, %s6749_s3, [#allocation13]  }
  0x96   : > { %s6519_s25 = scalar_lea.hbm %s10220_s12, 16 }
  0x97   : > { %p6520_p0 = scmp.ne.s32.totalorder %s10220_s12, %s6519_s25  ;;  %p6526_p1 = scmp.lt.u32.totalorder %s6519_s25, %s10220_s12 }
  0x99   : > { %p6522_p9 = pnand %p6520_p0, %p10338_p4 }
  0x9b   : > { %p6523_p11 = pneg %p6522_p9 }
  0x9d   : > { %p6528_p6 = pnand %p6526_p1, %p6523_p11 }
  0x9f   : > { %6531 = shalt.err (!%p6528_p6)
}
  0xa0   : > { %s6750_s3 = smov [#allocation18]   ;;  %s6532_s6 = scalar_lea.vmem %s517_s8, 128 }
  0xa1   : > { %6292 = dma.hbm_to_smem (!%p10339_p3), %s10220_s12, 16, %s6750_s3, [#allocation19]  }
  0xa2   : > { %p6533_p8 = scmp.ne.s32.totalorder %s517_s8, %s6532_s6  ;;  %p6540_p2 = scmp.lt.s32.totalorder %s517_s8, %s517_s8 }
  0xa3   : > { %p6541_p12 = scmp.lt.s32.totalorder %s6532_s6, %s6532_s6 }
  0xa4   : > { %p6535_p5 = pnand %p6533_p8, %p10338_p4 }
  0xa5   : > { %p6542_p0 = por %p6541_p12, %p6540_p2 }
  0xa6   : > { %p6536_p7 = pneg %p6535_p5 }
  0xa8   : > { %p6543_p9 = pnand %p6542_p0, %p6536_p7 }
  0xaa   : > { %6546 = shalt.err (!%p6543_p9)
}
  0xab   : > { %s6751_s7 = smov [#allocation20]   ;;  %s527_s27 = sshll.u32 %s10222_s14, 4  ;;  %s528_s27 = int_to_ptr.vmem [resolvable:$true] %s527_s27 }
  0xac   : > { %6295 = dma.vmem_to_smem (!%p10339_p3), %s517_s8, 128, %s6751_s7, [#allocation17]  }
  0xad   : > { %s6547_s17 = scalar_lea.vmem %s528_s27, 16  ;;  %p6555_p8 = scmp.lt.s32.totalorder %s528_s27, %s528_s27 }
  0xae   : > { %p6548_p11 = scmp.ne.s32.totalorder %s528_s27, %s6547_s17  ;;  %p6556_p5 = scmp.lt.s32.totalorder %s6547_s17, %s6547_s17 }
  0xb0   : > { %p6550_p1 = pnand %p6548_p11, %p10338_p4  ;;  %p6557_p2 = por %p6556_p5, %p6555_p8 }
  0xb2   : > { %p6551_p6 = pneg %p6550_p1 }
  0xb4   : > { %p6558_p7 = pnand %p6557_p2, %p6551_p6 }
  0xb6   : > { %6561 = shalt.err (!%p6558_p7)
}
  0xb7   : > { %s6752_s22 = smov [#allocation21]   ;;  %s10340_s0 = sld [smem:[#allocation96_spill]] }
  0xb8   : > { %6298 = dma.vmem_to_smem (!%p10339_p3), %s528_s27, 16, %s6752_s22, [#allocation22]  }
  0xb9   : > { %s542_s15 = scalar_lea.vmem [#allocation3], %s6962_s26  ;;  %s10341_s2 = sld [smem:[#allocation98_spill]] }
  0xba   : > { %s551_s3 = sshll.u32 %s542_s15, 4  ;;  %s10342_s6 = sand.u32 1, %s6728_s20   ;;  %s7089_s3 = int_to_ptr.vmem [resolvable:$true] %s551_s3 }
  0xbb   : > { %s7099_s7 = scalar_lea.sflag [#allocation4], %s10342_s6 }
  0xbd   : > { %s7086_s11 = scalar_lea.hbm %s10340_s0, %s6958_s18  ;;  %s6567_s17 = scalar_lea.hbm %s10340_s0, 2048 }
  0xbe   : > { %s6562_s25 = scalar_lea.hbm %s7086_s11, 1024  ;;  %p6568_p0 = scmp.lt.u32.totalorder %s7086_s11, %s10340_s0 }
  0xbf   : > { %s7095_s1 = scalar_lea.hbm %s10341_s2, %s6958_s18  ;;  %p6563_p4 = scmp.ne.s32.totalorder %s7086_s11, %s6562_s25 }
  0xc0   : > { %p6569_p9 = scmp.lt.u32.totalorder %s6567_s17, %s6562_s25  ;;  %p6571_p1 = scmp.lt.u32.totalorder %s6562_s25, %s7086_s11 }
  0xc1   : > { %p6565_p3 = pnand %p6563_p4, %p6986_p13 }
  0xc2   : > { %p6570_p11 = por %p6569_p9, %p6568_p0 }
  0xc3   : > { %p6566_p12 = pneg %p6565_p3 }
  0xc4   : > { %p6572_p6 = por %p6571_p1, %p6570_p11 }
  0xc6   : > { %p6573_p8 = pnand %p6572_p6, %p6566_p12 }
  0xc8   : > { %6576 = shalt.err (!%p6573_p8)
}
  0xc9   : > { %s6577_s18 = scalar_lea.vmem %s7089_s3, 1024  ;;  %s6753_s30 = smov [#allocation3]  }
  0xca   : > { %p6578_p5 = scmp.ne.s32.totalorder %s7089_s3, %s6577_s18  ;;  %s6582_s15 = sshll.u32 %s6753_s30, 4  ;;  %s6583_s15 = int_to_ptr.vmem [resolvable:$false] %s6582_s15 }
  0xcb   : > { %s6584_s29 = scalar_lea.vmem %s6583_s15, 2048  ;;  %p6585_p4 = scmp.lt.s32.totalorder %s7089_s3, %s6583_s15 }
  0xcc   : > { %p6580_p2 = pnand %p6578_p5, %p6986_p13  ;;  %p6586_p3 = scmp.lt.s32.totalorder %s6584_s29, %s6577_s18 }
  0xce   : > { %p6581_p7 = pneg %p6580_p2  ;;  %p6587_p0 = por %p6586_p3, %p6585_p4 }
  0xd0   : > { %p6588_p9 = pnand %p6587_p0, %p6581_p7 }
  0xd2   : > { %6591 = shalt.err (!%p6588_p9)
}
  0xd3   : > { %s10343_s21 = smov 8   ;;  %s10344_s6 = smov 128  }
  0xd4   : > { %6302 = dma.hbm_to_vmem [thread:$0]  (!%p6966_p10), %s7086_s11, 1024, %s7089_s3, %s7099_s7, %s10344_s6, %s10344_s6, %s10343_s21  }
  0xd5   : > { %s591_s25 = scalar_lea.vmem [#allocation10], %s6962_s26  ;;  %s6592_s27 = scalar_lea.hbm %s7095_s1, 1024 }
  0xd6   : > { %s603_s4 = sshll.u32 %s591_s25, 4  ;;  %p6593_p12 = scmp.ne.s32.totalorder %s7095_s1, %s6592_s27  ;;  %s7127_s4 = int_to_ptr.vmem [resolvable:$true] %s603_s4 }
  0xd7   : > { %s6597_s8 = scalar_lea.hbm %s10341_s2, 2048  ;;  %p6598_p6 = scmp.lt.u32.totalorder %s7095_s1, %s10341_s2 }
  0xd8   : > { %p6595_p11 = pnand %p6593_p12, %p6986_p13  ;;  %p6599_p8 = scmp.lt.u32.totalorder %s6597_s8, %s6592_s27 }
  0xd9   : > { %p6601_p2 = scmp.lt.u32.totalorder %s6592_s27, %s7095_s1 }
  0xda   : > { %p6596_p1 = pneg %p6595_p11  ;;  %p6600_p5 = por %p6599_p8, %p6598_p6 }
  0xdc   : > { %p6602_p7 = por %p6601_p2, %p6600_p5 }
  0xde   : > { %p6603_p4 = pnand %p6602_p7, %p6596_p1 }
  0xe0   : > { %6606 = shalt.err (!%p6603_p4)
}
  0xe1   : > { %s6607_s26 = scalar_lea.vmem %s7127_s4, 1024  ;;  %s6754_s11 = smov [#allocation10]  }
  0xe2   : > { %p6608_p3 = scmp.ne.s32.totalorder %s7127_s4, %s6607_s26  ;;  %s6612_s3 = sshll.u32 %s6754_s11, 4  ;;  %s6613_s3 = int_to_ptr.vmem [resolvable:$false] %s6612_s3 }
  0xe3   : > { %s6614_s7 = scalar_lea.vmem %s6613_s3, 2048  ;;  %p6615_p12 = scmp.lt.s32.totalorder %s7127_s4, %s6613_s3 }
  0xe4   : > { %p6610_p0 = pnand %p6608_p3, %p6986_p13  ;;  %p6616_p11 = scmp.lt.s32.totalorder %s6614_s7, %s6607_s26 }
  0xe6   : > { %p6611_p9 = pneg %p6610_p0  ;;  %p6617_p6 = por %p6616_p11, %p6615_p12 }
  0xe8   : > { %p6618_p8 = pnand %p6617_p6, %p6611_p9 }
  0xea   : > { %6621 = shalt.err (!%p6618_p8)
}
  0xeb   : > { %6308 = dma.hbm_to_vmem [thread:$0]  (!%p6966_p10), %s7095_s1, 1024, %s7127_s4, %s6980_s16, %s10344_s6, %s10344_s6, %s10343_s21  }
  0xec   : > { %p10345_p13 = scmp.ne.s32.totalorder %s10322_s28, 0 }
  0xee   : > { %615 = sbr.rel (%p10345_p13) target bundleno = 1227 (0x4cb), region = 80 }
  0xf5   : > { %s7157_s23 = sand.u32 1, %s6724_s19   ;;  %p10346_p1 = scmp.ne.s32.totalorder %s10328_s24, 0 }
  0xf6   : > { %s5293_s15 = sshll.u32 %s7157_s23, 6  ;;  %s618_s29 = scalar_lea.sflag [#allocation4], %s7157_s23 }
  0xf7   : > { %s7161_s25 = scalar_lea.vmem [#allocation3], %s5293_s15 }
  0xf8   : > { %6675 = dma.done.wait (%p10346_p1), %s618_s29, 1024  }
  0xf9   : > { %6677 = vsyncadd (%p10346_p1), %s618_s29, 4294966272  ;;  %s10347_s5 = sld [smem:[#allocation39_spill]]  ;;  %s7168_s1 = scalar_lea.vmem [#allocation8], %s5293_s15 }
  0xff   : > { %s626_s16 = sand.u32 1, %s10347_s5  }
 0x100   : > { %s627_s28 = scalar_lea.sflag [#allocation9], %s626_s16 }
 0x101   : > { %6679 = dma.done.wait (%p10346_p1), %s627_s28, 2048  }
 0x102   : > { %6681 = vsyncadd (%p10346_p1), %s627_s28, 4294965248  ;;  %s7174_s21 = scalar_lea.vmem [#allocation10], %s5293_s15  ;;  %p10348_p10 = scmp.eq.s32.totalorder %s10347_s5, 0 }
 0x104   : > { %6683 = dma.done.wait (%p10348_p10), [#allocation6], 64   ;;  %p10349_p5 = pmov %p10348_p10 }
 0x106   : > { %6685 = vsyncadd (%p10349_p5), [#allocation6], 4294967232  ;;  %p10350_p2 = pmov %p10349_p5 }
 0x108   : > { %6687 = dma.done.wait (%p10350_p2), [#allocation13], 16   ;;  %p10351_p7 = pmov %p10350_p2 }
 0x109   : > { %p10352_p4 = pmov %p10350_p2 }
 0x10a   : > { %6689 = vsyncadd (%p10351_p7), [#allocation13], 4294967280 }
 0x10b   : > { %6691 = dma.done.wait (%p10352_p4), [#allocation7], 64   ;;  %p10353_p3 = pmov %p10350_p2 }
 0x10c   : > { %p10354_p0 = pmov %p10350_p2 }
 0x10d   : > { %6693 = vsyncadd (%p10353_p3), [#allocation7], 4294967232 }
 0x10e   : > { %6695 = dma.done.wait (%p10354_p0), [#allocation13], 16   ;;  %p10355_p9 = pmov %p10354_p0 }
 0x10f   : > { %p10356_p12 = pmov %p10354_p0 }
 0x110   : > { %6697 = vsyncadd (%p10355_p9), [#allocation13], 4294967280 }
 0x111   : > { %6699 = dma.done.wait (%p10356_p12), [#allocation17], 64   ;;  %p10357_p11 = pmov %p10354_p0 }
 0x112   : > { %p10358_p6 = pmov %p10354_p0 }
 0x113   : > { %6701 = vsyncadd (%p10357_p11), [#allocation17], 4294967232 }
 0x114   : > { %6703 = dma.done.wait (%p10358_p6), [#allocation19], 16   ;;  %p10359_p8 = pmov %p10354_p0 }
 0x115   : > { %p10360_p13 = pmov %p10354_p0 }
 0x116   : > { %6705 = vsyncadd (%p10359_p8), [#allocation19], 4294967280 }
 0x117   : > { %6707 = dma.done.wait (%p10360_p13), [#allocation17], 128   ;;  %p10361_p1 = pmov %p10354_p0 }
 0x118   : > { %p10362_p10 = pmov %p10354_p0 }
 0x119   : > { %6709 = vsyncadd (%p10361_p1), [#allocation17], 4294967168 }
 0x11a   : > { %6711 = dma.done.wait (%p10362_p10), [#allocation22], 16   ;;  %p10363_p5 = pmov %p10354_p0 }
 0x11c   : > { %6713 = vsyncadd (%p10363_p5), [#allocation22], 4294967280 }
 0x11d   : > { %676 = sfence }
 0x11e   : > { %s10364_s4 = sld [smem:[#allocation100_spill]]  ;;  %vm748_vm0 = vcmask 122880   ;;  %v10252_v2 = vmov 0.0|0.0   ;;  %v744_v4 = vld [vmem:[%s7168_s1] sm:$0x1]  ;;  %vm6756_vm1 = vmmov 0  }
 0x11f   : > { %6074 = vmatprep.subr.bf16.mxu0 %v10252_v2  ;;  %6080 = vmatprep.subr.bf16.mxu1 %v10252_v2  ;;  %v745_v5 = vld [vmem:[%s7168_s1 + $0x10] sm:$0x1]  ;;  %v746_v6 = vld [vmem:[%s7168_s1 + $0x20] sm:$0x1]  ;;  %v10254_v7 = vmov 0.0   ;;  %vm761_vm2 = vcmask 130048  }
 0x120   : > { %5702 = vmatprep.mubr.msk.f32.mxu0 %vm6756_vm1, %v10254_v7  ;;  %5728 = vmatprep.mubr.msk.f32.mxu1 %vm6756_vm1, %v10254_v7  ;;  %v747_v8 = vld [vmem:[%s7168_s1 + $0x30] sm:$0x1]  ;;  %749 = vst.msk [vmem:[#allocation2] sm:$0x1] %vm748_vm0, %v744_v4  ;;  %750 = vst.msk [vmem:[#allocation2 + $0x18] sm:$0x1] %vm748_vm0, %v745_v5 }
 0x121   : > { %751 = vst.msk [vmem:[#allocation2 + $0x30] sm:$0x1] %vm748_vm0, %v746_v6  ;;  %v753_v9 = vld [vmem:[%s7161_s25] sm:$0xff]  ;;  %v755_v10 = vld [vmem:[%s7161_s25 + $0x10] sm:$0xff]  ;;  %752 = vst.msk [vmem:[#allocation2 + $0x48] sm:$0x1] %vm748_vm0, %v747_v8 }
 0x122   : > { %v757_v11 = vld [vmem:[%s7161_s25 + $0x20] sm:$0xff]  ;;  %v759_v12 = vld [vmem:[%s7161_s25 + $0x30] sm:$0xff]  ;;  %762 = vst.msk [vmem:[#allocation2 + $0x1] sm:$0xff] %vm761_vm2, %v753_v9  ;;  %764 = vst.msk [vmem:[#allocation2 + $0x19] sm:$0xff] %vm761_vm2, %v755_v10  ;;  %s791_s22 = sld [smem:[#allocation11]]  ;;  %s5309_s8 = sld [smem:[#allocation11 + $0x1]] }
 0x123   : > { %766 = vst.msk [vmem:[#allocation2 + $0x31] sm:$0xff] %vm761_vm2, %v757_v11  ;;  %768 = vst.msk [vmem:[#allocation2 + $0x49] sm:$0xff] %vm761_vm2, %v759_v12  ;;  %s7240_s18 = sld [smem:[#allocation11 + $0x2]]  ;;  %s7242_s30 = sld [smem:[#allocation11 + $0x3]]  ;;  %v754_v13 = vld [vmem:[%s7161_s25 + $0x8] sm:$0xff]  ;;  %v756_v14 = vld [vmem:[%s7161_s25 + $0x18] sm:$0xff] }
 0x124   : > { %v929_v0 = vld [vmem:[%s10364_s4] sm:$0xff]  ;;  %v930_v1 = vld [vmem:[%s10364_s4 + $0x8] sm:$0xff]  ;;  %s7248_s26 = sld [smem:[#allocation12]]  ;;  %v760_v16 = vld [vmem:[%s7161_s25 + $0x38] sm:$0xff]  ;;  %763 = vst.msk [vmem:[#allocation2 + $0x9] sm:$0xff] %vm761_vm2, %v754_v13  ;;  %s7256_s3 = sld [smem:[#allocation11 + $0x81]] }
 0x125   : > { %v7216_v3 = vpack.c.bf16 %v930_v1, %v929_v0  ;;  %s7250_s11 = sld [smem:[#allocation11 + $0x80]]  ;;  %v758_v15 = vld [vmem:[%s7161_s25 + $0x28] sm:$0xff]  ;;  %765 = vst.msk [vmem:[#allocation2 + $0x21] sm:$0xff] %vm761_vm2, %v756_v14  ;;  %s7258_s7 = sld [smem:[#allocation11 + $0x82]]  ;;  %769 = vst.msk [vmem:[#allocation2 + $0x51] sm:$0xff] %vm761_vm2, %v760_v16 }
 0x126   : > { %767 = vst.msk [vmem:[#allocation2 + $0x39] sm:$0xff] %vm761_vm2, %v758_v15  ;;  %s10365_s5 = sld [smem:[#allocation99_spill]]  ;;  %s7268_s25 = sld [smem:[#allocation11 + $0x83]]  ;;  %v5305_v19 = vld [vmem:[%s7174_s21 + $0xf] sm:$0x1] }
 0x127   : > { %6076 = vmatpush3.bf16.msra.mxu0 %v7216_v3  ;;  %6082 = vmatpush3.bf16.msra.mxu1 %v7216_v3  ;;  %s7270_s1 = sld [smem:[#allocation12 + $0x1]]  ;;  %s7273_s24 = sld [smem:[#allocation11 + $0x100]]  ;;  %v5306_v20 = vld [vmem:[%s7174_s21 + $0x1f] sm:$0x1]  ;;  %775 = vst.msk [vmem:[#allocation2 + $0x11] sm:$0x1] %vm748_vm0, %v5305_v19 }
 0x128   : > { %6077 = vmatprep.subr.bf16.mxu0 %v10252_v2  ;;  %6083 = vmatprep.subr.bf16.mxu1 %v10252_v2  ;;  %s7275_s6 = sld [smem:[#allocation11 + $0x101]]  ;;  %v7279_v21 = vstv %s791_s22  ;;  %v7281_v22 = vstv %s5309_s8  ;;  %s7283_s27 = sld [smem:[#allocation11 + $0x102]]  ;;  %v5307_v23 = vld [vmem:[%s7174_s21 + $0x2f] sm:$0x1]  ;;  %776 = vst.msk [vmem:[#allocation2 + $0x29] sm:$0x1] %vm748_vm0, %v5306_v20 }
 0x129   : > { %s7285_s17 = sld [smem:[#allocation11 + $0x103]]  ;;  %v779_v24 = vld [vmem:[#allocation2] sm:$0xff]  ;;  %v782_v25 = vld [vmem:[#allocation2 + $0x18] sm:$0xff]  ;;  %v7290_v26 = vstv %s7240_s18  ;;  %v7293_v27 = vstv %s7242_s30  ;;  %s7295_s22 = sld [smem:[#allocation12 + $0x2]]  ;;  %777 = vst.msk [vmem:[#allocation2 + $0x41] sm:$0x1] %vm748_vm0, %v5307_v23 }
 0x12a   : > { %s7297_s8 = sld [smem:[#allocation11 + $0x180]]  ;;  %v785_v29 = vld [vmem:[#allocation2 + $0x30] sm:$0xff]  ;;  %v788_v30 = vld [vmem:[#allocation2 + $0x48] sm:$0xff]  ;;  %v793_v31 = vmul.f32 %v7279_v21, %v779_v24  ;;  %v798_v32 = vmul.f32 %v7281_v22, %v782_v25  ;;  %v7305_v33 = vstv %s7248_s26  ;;  %s7310_s18 = sld [smem:[#allocation11 + $0x181]]  ;;  %v7318_v38 = vstv %s7256_s3  ;;  %v5308_v47 = vld [vmem:[%s7174_s21 + $0x3f] sm:$0x1] }
 0x12b   : > { %v7308_v34 = vstv %s7250_s11  ;;  %s7312_s30 = sld [smem:[#allocation11 + $0x182]]  ;;  %v806_v35 = vmul.f32 %v7290_v26, %v785_v29  ;;  %v814_v36 = vmul.f32 %v7293_v27, %v788_v30  ;;  %s7320_s15 = sld [smem:[#allocation11 + $0x183]]  ;;  %v832_v40 = vmul.f32 %v7318_v38, %v782_v25  ;;  %778 = vst.msk [vmem:[#allocation2 + $0x59] sm:$0x1] %vm748_vm0, %v5308_v47  ;;  %v780_v19 = vld [vmem:[#allocation2 + $0x8] sm:$0xff] }
 0x12c   : > { %v927_v17 = vld [vmem:[%s10365_s5] sm:$0xff]  ;;  %v928_v18 = vld [vmem:[%s10365_s5 + $0x8] sm:$0xff]  ;;  %v827_v37 = vmul.f32 %v7308_v34, %v779_v24  ;;  %s7322_s26 = sld [smem:[#allocation12 + $0x3]]  ;;  %v801_v39 = vadd.f32 %v798_v32, %v793_v31  ;;  %v7326_v41 = vstv %s7258_s7  ;;  %v7329_v42 = vstv %s7268_s25  ;;  %s7331_s11 = sld [smem:[#allocation15]] }
 0x12d   : > { %v7299_v28 = vpack.c.bf16 %v928_v18, %v927_v17  ;;  %s7333_s29 = sld [smem:[#allocation15 + $0x1]]  ;;  %v840_v43 = vmul.f32 %v7326_v41, %v785_v29  ;;  %v848_v44 = vmul.f32 %v7329_v42, %v788_v30  ;;  %v7338_v45 = vstv %s7270_s1  ;;  %s7343_s3 = sld [smem:[#allocation15 + $0x2]]  ;;  %v783_v20 = vld [vmem:[#allocation2 + $0x20] sm:$0xff]  ;;  %v786_v23 = vld [vmem:[#allocation2 + $0x38] sm:$0xff] }
 0x12e   : > { %v7341_v46 = vstv %s7273_s24  ;;  %s7345_s7 = sld [smem:[#allocation15 + $0x3]]  ;;  %v809_v48 = vadd.f32 %v806_v35, %v801_v39  ;;  %v835_v49 = vadd.f32 %v832_v40, %v827_v37  ;;  %v7350_v51 = vstv %s7275_s6  ;;  %s7352_s16 = sld [smem:[#allocation14 + $0x1]] }
 0x12f   : > { %v861_v50 = vmul.f32 %v7341_v46, %v779_v24  ;;  %s7354_s28 = sld [smem:[#allocation14 + $0x81]]  ;;  %v866_v52 = vmul.f32 %v7350_v51, %v782_v25  ;;  %v7359_v53 = vstv %s7283_s27  ;;  %v7362_v54 = vstv %s7285_s17  ;;  %s7499_s1 = sld [smem:[#allocation14]] }
 0x130   : > { %v7365_v55 = vstv %s7295_s22  ;;  %s7367_s21 = sld [smem:[#allocation14 + $0x101]]  ;;  %v817_v56 = vadd.f32 %v814_v36, %v809_v48  ;;  %v843_v57 = vadd.f32 %v840_v43, %v835_v49  ;;  %v874_v58 = vmul.f32 %v7359_v53, %v785_v29  ;;  %s7504_s24 = sld [smem:[#allocation14 + $0x80]] }
 0x131   : > { %s7369_s25 = sld [smem:[#allocation14 + $0x181]]  ;;  %v882_v59 = vmul.f32 %v7362_v54, %v788_v30  ;;  %v869_v60 = vadd.f32 %v866_v52, %v861_v50  ;;  %v7374_v61 = vstv %s7297_s8  ;;  %v7377_v62 = vstv %s7310_s18  ;;  %s7536_s6 = sld [smem:[#allocation14 + $0x100]] }
 0x132   : > { %v7380_v63 = vstv %s7312_s30  ;;  %v7383_v0 = vadd.f32 %v7305_v33, %v817_v56  ;;  %v851_v1 = vadd.f32 %v848_v44, %v843_v57  ;;  %v895_v4 = vmul.f32 %v7374_v61, %v779_v24  ;;  %s7545_s27 = sld [smem:[#allocation14 + $0x180]]  ;;  %s7554_s17 = sld [smem:[#allocation14 + $0x3]] }
 0x133   : > { %v900_v5 = vmul.f32 %v7377_v62, %v782_v25  ;;  %v877_v6 = vadd.f32 %v874_v58, %v869_v60  ;;  %v908_v8 = vmul.f32 %v7380_v63, %v785_v29  ;;  %v7389_v9 = vstv %s7320_s15  ;;  %s7563_s22 = sld [smem:[#allocation14 + $0x83]]  ;;  %s7767_s30 = sld [smem:[#allocation14 + $0x2]] }
 0x134   : > { %v7392_v10 = vstv %s7322_s26  ;;  %v7395_v11 = vadd.f32 %v7338_v45, %v851_v1  ;;  %v916_v13 = vmul.f32 %v7389_v9, %v788_v30  ;;  %v7399_v14 = vstv %s7331_s11  ;;  %v789_v30 = vld [vmem:[#allocation2 + $0x50] sm:$0xff]  ;;  %s7659_s8 = sld [smem:[#allocation14 + $0x103]]  ;;  %s7796_s15 = sld [smem:[#allocation14 + $0x82]] }
 0x135   : > { %v903_v12 = vadd.f32 %v900_v5, %v895_v4  ;;  %v885_v15 = vadd.f32 %v882_v59, %v877_v6  ;;  %v7402_v16 = vstv %s7333_s29  ;;  %v7405_v17 = vstv %s7343_s3  ;;  %s7737_s18 = sld [smem:[#allocation14 + $0x183]]  ;;  %s7798_s26 = sld [smem:[#allocation14 + $0x102]] }
 0x136   : > { %v7408_v18 = vstv %s7345_s7  ;;  %v7411_v25 = vstv %s7352_s16  ;;  %v7414_v29 = vstv %s7354_s28  ;;  %v7417_v31 = vstv %s7367_s21  ;;  %s7803_s11 = sld [smem:[#allocation14 + $0x182]]  ;;  %s10368_s7 = sld [smem:[#allocation102_spill]] }
 0x137   : > { %v911_v24 = vadd.f32 %v908_v8, %v903_v12  ;;  %v7420_v32 = vadd.f32 %v7365_v55, %v885_v15  ;;  %v1058_v35 = vmul.f32 %v7411_v25, %v7383_v0  ;;  %v1066_v36 = vmul.f32 %v7414_v29, %v7395_v11  ;;  %s5405_s28 = sld [smem:[#allocation16 + $0x1]]  ;;  %s5406_s21 = sld [smem:[#allocation16 + $0x2]] }
 0x138   : > { %v7427_v37 = vstv %s7369_s25  ;;  %v794_v40 = vmul.f32 %v7279_v21, %v780_v19  ;;  %v799_v43 = vmul.f32 %v7281_v22, %v783_v20  ;;  %v807_v44 = vmul.f32 %v7290_v26, %v786_v23  ;;  %s5433_s25 = sld [smem:[#allocation16 + $0x81]]  ;;  %s8603_s29 = sld [smem:[#allocation16 + $0x3]] }
 0x139   : > { %v919_v39 = vadd.f32 %v916_v13, %v911_v24  ;;  %v7433_v47 = vadd.f32 %v1058_v35, %v7399_v14  ;;  %v7436_v48 = vadd.f32 %v1066_v36, %v7402_v16  ;;  %v1074_v49 = vmul.f32 %v7417_v31, %v7420_v32  ;;  %s8642_s3 = sld [smem:[#allocation16 + $0x6]]  ;;  %s8693_s16 = sld [smem:[#allocation16 + $0x104]] }
 0x13a   : > { %v815_v50 = vmul.f32 %v7293_v27, %v789_v30  ;;  %v802_v56 = vadd.f32 %v799_v43, %v794_v40  ;;  %v828_v57 = vmul.f32 %v7308_v34, %v780_v19  ;;  %v833_v58 = vmul.f32 %v7318_v38, %v783_v20  ;;  %s9471_s0 = sld [smem:[#allocation20 + $0x301]]  ;;  %s10481_s4 = smov 126  }
 0x13b   : > { %v7442_v52 = vadd.f32 %v7392_v10, %v919_v39  ;;  %v7447_v59 = vadd.f32 %v1074_v49, %v7405_v17  ;;  %v1088_v60 = vmul.f32 %v7433_v47, %v7433_v47  ;;  %v1091_v1 = vmul.f32 %v7436_v48, %v7436_v48  ;;  %v781_v49 = vld [vmem:[#allocation2 + $0x10] sm:$0x3]  ;;  %s9473_s2 = sld [smem:[#allocation20 + $0x381]] }
 0x13c   : > { %v841_v4 = vmul.f32 %v7326_v41, %v786_v23  ;;  %v810_v6 = vadd.f32 %v807_v44, %v802_v56  ;;  %v836_v8 = vadd.f32 %v833_v58, %v828_v57  ;;  %v849_v12 = vmul.f32 %v7329_v42, %v789_v30 }
 0x13d   : > { %v1082_v5 = vmul.f32 %v7427_v37, %v7442_v52  ;;  %v1094_v13 = vadd.f32 %v1091_v1, %v1088_v60  ;;  %v1097_v15 = vmul.f32 %v7447_v59, %v7447_v59  ;;  %v862_v24 = vmul.f32 %v7341_v46, %v780_v19 }
 0x13e   : > { %v867_v35 = vmul.f32 %v7350_v51, %v783_v20  ;;  %v818_v39 = vadd.f32 %v815_v50, %v810_v6  ;;  %v844_v40 = vadd.f32 %v841_v4, %v836_v8  ;;  %v875_v43 = vmul.f32 %v7359_v53, %v786_v23  ;;  %v784_v50 = vld [vmem:[#allocation2 + $0x28] sm:$0x3]  ;;  %v787_v4 = vld [vmem:[#allocation2 + $0x40] sm:$0x3]  ;;  %v790_v6 = vld [vmem:[#allocation2 + $0x58] sm:$0x3] }
 0x13f   : > { %v7462_v36 = vadd.f32 %v1082_v5, %v7408_v18  ;;  %v1100_v44 = vadd.f32 %v1097_v15, %v1094_v13  ;;  %v883_v57 = vmul.f32 %v7362_v54, %v789_v30  ;;  %v896_v58 = vmul.f32 %v7374_v61, %v780_v19 }
 0x140   : > { %v870_v56 = vadd.f32 %v867_v35, %v862_v24  ;;  %v7470_v1 = vadd.f32 %v7305_v33, %v818_v39  ;;  %v852_v2 = vadd.f32 %v849_v12, %v844_v40  ;;  %v901_v5 = vmul.f32 %v7377_v62, %v783_v20 }
 0x141   : > { %v1103_v60 = vmul.f32 %v7462_v36, %v7462_v36  ;;  %v909_v13 = vmul.f32 %v7380_v63, %v786_v23  ;;  %v917_v15 = vmul.f32 %v7389_v9, %v789_v30  ;;  %v795_v24 = vmul.f32 %v7279_v21, %v781_v49 }
 0x142   : > { %v878_v8 = vadd.f32 %v875_v43, %v870_v56  ;;  %v7477_v35 = vadd.f32 %v7338_v45, %v852_v2  ;;  %v904_v7 = vadd.f32 %v901_v5, %v896_v58  ;;  %v1059_v12 = vmul.f32 %v7411_v25, %v7470_v1 }
 0x143   : > { %v1106_v19 = vadd.f32 %v1103_v60, %v1100_v44  ;;  %v800_v20 = vmul.f32 %v7281_v22, %v784_v50  ;;  %v808_v40 = vmul.f32 %v7290_v26, %v787_v4  ;;  %v816_v43 = vmul.f32 %v7293_v27, %v790_v6 }
 0x144   : > { %v886_v39 = vadd.f32 %v883_v57, %v878_v8  ;;  %v912_v56 = vadd.f32 %v909_v13, %v904_v7  ;;  %v7485_v30 = vadd.f32 %v1059_v12, %v7399_v14  ;;  %v1067_v2 = vmul.f32 %v7414_v29, %v7477_v35 }
 0x145   : > { %v1109_v23 = vmax.f32 %v1106_v19, 1e-24  ;;  %v803_v44 = vadd.f32 %v800_v20, %v795_v24  ;;  %v829_v57 = vmul.f32 %v7308_v34, %v781_v49  ;;  %v834_v22 = vmul.f32 %v7318_v38, %v784_v50 }
 0x146   : > { %v7490_v21 = vadd.f32 %v7365_v55, %v886_v39  ;;  %v920_v26 = vadd.f32 %v917_v15, %v912_v56  ;;  %v7495_v27 = vadd.f32 %v1067_v2, %v7402_v16  ;;  %v1089_v7 = vmul.f32 %v7485_v30, %v7485_v30 }
 0x147   : > { %6396 = vrsqrt.f32 %v1109_v23  ;;  %v811_v60 = vadd.f32 %v808_v40, %v803_v44  ;;  %v837_v5 = vadd.f32 %v834_v22, %v829_v57  ;;  %v842_v8 = vmul.f32 %v7326_v41, %v787_v4 }
 0x148   : > { %v1075_v58 = vmul.f32 %v7417_v31, %v7490_v21  ;;  %v7507_v34 = vadd.f32 %v7392_v10, %v920_v26  ;;  %v1092_v38 = vmul.f32 %v7495_v27, %v7495_v27  ;;  %v850_v13 = vmul.f32 %v7329_v42, %v790_v6 }
 0x149   : > { %v863_v15 = vmul.f32 %v7341_v46, %v781_v49  ;;  %v819_v19 = vadd.f32 %v816_v43, %v811_v60  ;;  %v845_v12 = vadd.f32 %v842_v8, %v837_v5  ;;  %v868_v39 = vmul.f32 %v7350_v51, %v784_v50 }
 0x14a   : > { %v7514_v24 = vadd.f32 %v1075_v58, %v7405_v17  ;;  %v1083_v41 = vmul.f32 %v7427_v37, %v7507_v34  ;;  %v1095_v20 = vadd.f32 %v1092_v38, %v1089_v7  ;;  %v876_v40 = vmul.f32 %v7359_v53, %v787_v4 }
 0x14b   : > { %v884_v23 = vmul.f32 %v7362_v54, %v790_v6  ;;  %v7524_v46 = vadd.f32 %v7305_v33, %v819_v19  ;;  %v853_v56 = vadd.f32 %v850_v13, %v845_v12  ;;  %v871_v43 = vadd.f32 %v868_v39, %v863_v15 }
 0x14c   : > { %v1098_v42 = vmul.f32 %v7514_v24, %v7514_v24  ;;  %v7527_v2 = vadd.f32 %v1083_v41, %v7408_v18  ;;  %v897_v51 = vmul.f32 %v7374_v61, %v781_v49  ;;  %v902_v44 = vmul.f32 %v7377_v62, %v784_v50 }
 0x14d   : > { %v910_v53 = vmul.f32 %v7380_v63, %v787_v4  ;;  %v7533_v57 = vadd.f32 %v7338_v45, %v853_v56  ;;  %v879_v22 = vadd.f32 %v876_v40, %v871_v43  ;;  %v918_v33 = vmul.f32 %v7389_v9, %v790_v6 }
 0x14e   : > { %v1101_v54 = vadd.f32 %v1098_v42, %v1095_v20  ;;  %v1104_v26 = vmul.f32 %v7527_v2, %v7527_v2  ;;  %v905_v7 = vadd.f32 %v902_v44, %v897_v51  ;;  %v1060_v61 = vmul.f32 %v7411_v25, %v7524_v46 }
 0x14f   : > { %v7543_v49 = vstv %s7499_s1  ;;  %v887_v62 = vadd.f32 %v884_v23, %v879_v22  ;;  %v1068_v45 = vmul.f32 %v7414_v29, %v7533_v57  ;;  %v7552_v9 = vstv %s7504_s24  ;;  %s5434_s1 = sld [smem:[#allocation16 + $0x82]]  ;;  %s5408_s24 = sld [smem:[#allocation16 + $0x4]] }
 0x150   : > { %v943_v63 = vmul.f32 %v7543_v49, %v7383_v0  ;;  %v1107_v4 = vadd.f32 %v1104_v26, %v1101_v54  ;;  %v913_v6 = vadd.f32 %v910_v53, %v905_v7  ;;  %v7559_v25 = vadd.f32 %v1060_v61, %v7399_v14 }
 0x151   : > { %v7556_v50 = vpop.eup %6396  ;;  %v953_v58 = vmul.f32 %v7552_v9, %v7395_v11  ;;  %v7570_v5 = vadd.f32 %v7365_v55, %v887_v62  ;;  %v7573_v8 = vadd.f32 %v1068_v45, %v7402_v16  ;;  %v962_v23 = vstv %s7536_s6  ;;  %s5409_s6 = sld [smem:[#allocation16 + $0x5]] }
 0x152   : > { %v1115_v29 = vmul.f32 %v7556_v50, %v7433_v47  ;;  %v1127_v60 = vmul.f32 %v7556_v50, %v7436_v48  ;;  %v1110_v38 = vmax.f32 %v1107_v4, 1e-24  ;;  %v921_v13 = vadd.f32 %v918_v33, %v913_v6 }
 0x153   : > { %v1090_v15 = vmul.f32 %v7559_v25, %v7559_v25  ;;  %v7578_v19 = vadd.f32 %v7399_v14, %v943_v63  ;;  %v1076_v12 = vmul.f32 %v7417_v31, %v7570_v5  ;;  %v1093_v39 = vmul.f32 %v7573_v8, %v7573_v8 }
 0x154   : > { %vm1118_vm3 = vcmp.ge.f32.partialorder %v1115_v29, 0.0  ;;  %v1121_v47 = vmul.f32 0.01, %v1115_v29  ;;  %vm1130_vm4 = vcmp.ge.f32.partialorder %v1127_v60, 0.0  ;;  %v1133_v48 = vmul.f32 0.01, %v1127_v60 }
 0x155   : > { %6398 = vrsqrt.f32 %v1110_v38  ;;  %v7581_v55 = vadd.f32 %v7392_v10, %v921_v13  ;;  %v7588_v40 = vadd.f32 %v7402_v16, %v953_v58  ;;  %v7594_v10 = vadd.f32 %v1076_v12, %v7405_v17 }
 0x156   : > { %v1124_v41 = vsel %vm1118_vm3, %v1115_v29, %v1121_v47  ;;  %v1136_v20 = vsel %vm1130_vm4, %v1127_v60, %v1133_v48  ;;  %v1096_v42 = vadd.f32 %v1093_v39, %v1090_v15  ;;  %v972_v56 = vstv %s7545_s27  ;;  %s5411_s27 = sld [smem:[#allocation16 + $0x7]] }
 0x157   : > { %5703 = vmatmul.mubr.msk.f32.vlgmr.msra.gmra.mrb[0].mxu0 %vm761_vm2, %v1124_v41  ;;  %5729 = vmatmul.mubr.msk.f32.vlgmr.msra.gmra.mrb[0].mxu1 %vm761_vm2, %v1136_v20  ;;  %v1084_v31 = vmul.f32 %v7427_v37, %v7581_v55  ;;  %v10366_v43 = vmov 0.0   ;;  %v963_v51 = vmul.f32 %v962_v23, %v7420_v32  ;;  %v973_v44 = vmul.f32 %v972_v56, %v7442_v52 }
 0x158   : > { %5705 = vmatprep.mubr.msk.f32.mxu0 %vm6756_vm1, %v10366_v43  ;;  %5731 = vmatprep.mubr.msk.f32.mxu1 %vm6756_vm1, %v10366_v43  ;;  %v981_v53 = vmul.f32 %v7578_v19, %v7578_v19  ;;  %v7608_v54 = vstv %s7554_s17  ;;  %v1099_v22 = vmul.f32 %v7594_v10, %v7594_v10  ;;  %v984_v33 = vmul.f32 %v7588_v40, %v7588_v40  ;;  %s5412_s17 = sld [smem:[#allocation16 + $0x8]] }
 0x159   : > { %6079 = vmatpush3.bf16.msra.mxu0 %v7299_v28  ;;  %v7612_v37 = vadd.f32 %v1084_v31, %v7408_v18  ;;  %6085 = vmatpush3.bf16.msra.mxu1 %v7299_v28  ;;  %v7620_v26 = vstv %s7563_s22  ;;  %v7623_v7 = vadd.f32 %v7405_v17, %v963_v51  ;;  %v7626_v61 = vadd.f32 %v7408_v18, %v973_v44  ;;  %s5436_s22 = sld [smem:[#allocation16 + $0x84]] }
 0x15a   : > { %v944_v62 = vmul.f32 %v7543_v49, %v7470_v1  ;;  %v954_v45 = vmul.f32 %v7552_v9, %v7477_v35  ;;  %v10367_v63 = vmov 0.0|0.0   ;;  %v1102_v4 = vadd.f32 %v1099_v22, %v1096_v42 }
 0x15b   : > { %6086 = vmatprep.subr.bf16.mxu0 %v10367_v63  ;;  %v1105_v6 = vmul.f32 %v7612_v37, %v7612_v37  ;;  %v987_v58 = vadd.f32 %v984_v33, %v981_v53  ;;  %v964_v29 = vmul.f32 %v962_v23, %v7490_v21  ;;  %6092 = vmatprep.subr.bf16.mxu1 %v10367_v63 }
 0x15c   : > { %v990_v60 = vmul.f32 %v7623_v7, %v7623_v7  ;;  %v996_v38 = vmul.f32 %v7626_v61, %v7626_v61  ;;  %v7642_v13 = vadd.f32 %v7399_v14, %v944_v62  ;;  %v7645_v15 = vadd.f32 %v7402_v16, %v954_v45 }
 0x15d   : > { %v1108_v47 = vadd.f32 %v1105_v6, %v1102_v4  ;;  %v7648_v48 = vadd.f32 %v7405_v17, %v964_v29  ;;  %v974_v12 = vmul.f32 %v972_v56, %v7507_v34  ;;  %v945_v39 = vmul.f32 %v7543_v49, %v7524_v46 }
 0x15e   : > { %v993_v41 = vadd.f32 %v990_v60, %v987_v58  ;;  %v982_v20 = vmul.f32 %v7642_v13, %v7642_v13  ;;  %v985_v31 = vmul.f32 %v7645_v15, %v7645_v15  ;;  %v955_v42 = vmul.f32 %v7552_v9, %v7533_v57 }
 0x15f   : > { %v6399_v51 = vpop.eup %6398  ;;  %v1111_v44 = vmax.f32 %v1108_v47, 1e-24  ;;  %v7662_v53 = vadd.f32 %v7408_v18, %v974_v12  ;;  %v991_v49 = vmul.f32 %v7648_v48, %v7648_v48  ;;  %v7667_v22 = vadd.f32 %v7399_v14, %v945_v39 }
 0x160   : > { %v1116_v33 = vmul.f32 %v6399_v51, %v7485_v30  ;;  %v1128_v62 = vmul.f32 %v6399_v51, %v7495_v27  ;;  %v999_v45 = vadd.f32 %v996_v38, %v993_v41  ;;  %v988_v4 = vadd.f32 %v985_v31, %v982_v20 }
 0x161   : > { %6400 = vrsqrt.f32 %v1111_v44  ;;  %v997_v9 = vmul.f32 %v7662_v53, %v7662_v53  ;;  %v7674_v6 = vadd.f32 %v7402_v16, %v955_v42  ;;  %v965_v58 = vmul.f32 %v962_v23, %v7570_v5 }
 0x162   : > { %vm1119_vm5 = vcmp.ge.f32.partialorder %v1116_v33, 0.0  ;;  %v1122_v29 = vmul.f32 0.01, %v1116_v33  ;;  %vm1131_vm6 = vcmp.ge.f32.partialorder %v1128_v62, 0.0  ;;  %v1134_v60 = vmul.f32 0.01, %v1128_v62 }
 0x163   : > { %v1002_v47 = vmax.f32 %v999_v45, 1e-24  ;;  %v994_v12 = vadd.f32 %v991_v49, %v988_v4  ;;  %v7678_v30 = vadd.f32 %v7405_v17, %v965_v58  ;;  %v975_v27 = vmul.f32 %v972_v56, %v7581_v55 }
 0x164   : > { %v1125_v38 = vsel %vm1119_vm5, %v1116_v33, %v1122_v29  ;;  %v1137_v39 = vsel %vm1131_vm6, %v1128_v62, %v1134_v60  ;;  %v983_v41 = vmul.f32 %v7667_v22, %v7667_v22  ;;  %v986_v23 = vmul.f32 %v7674_v6, %v7674_v6 }
 0x165   : > { %5706 = vmatmul.mubr.msk.f32.gmra.mrb[2].mxu0 %vm761_vm2, %v1125_v38  ;;  %5732 = vmatmul.mubr.msk.f32.gmra.mrb[2].mxu1 %vm761_vm2, %v1137_v39  ;;  %6402 = vrsqrt.f32 %v1002_v47  ;;  %v1000_v20 = vadd.f32 %v997_v9, %v994_v12  ;;  %v7688_v31 = vadd.f32 %v7408_v18, %v975_v27  ;;  %v992_v56 = vmul.f32 %v7678_v30, %v7678_v30 }
 0x166   : > { %5708 = vmatprep.mubr.msk.f32.mxu0 %vm6756_vm1, %v10366_v43  ;;  %5734 = vmatprep.mubr.msk.f32.mxu1 %vm6756_vm1, %v10366_v43  ;;  %v989_v42 = vadd.f32 %v986_v23, %v983_v41  ;;  %v1139_v44 = vmul.f32 %v7556_v50, %v7447_v59  ;;  %v1151_v49 = vmul.f32 %v7556_v50, %v7462_v36  ;;  %v7701_v33 = vstv %s7659_s8  ;;  %s10369_s8 = sld [smem:[#allocation101_spill]] }
 0x167   : > { %v1003_v62 = vmax.f32 %v1000_v20, 1e-24  ;;  %v998_v45 = vmul.f32 %v7688_v31, %v7688_v31  ;;  %v1140_v4 = vmul.f32 %v6399_v51, %v7514_v24  ;;  %v1152_v9 = vmul.f32 %v6399_v51, %v7527_v2 }
 0x168   : > { %v995_v58 = vadd.f32 %v992_v56, %v989_v42  ;;  %vm1142_vm7 = vcmp.ge.f32.partialorder %v1139_v44, 0.0  ;;  %v1145_v29 = vmul.f32 0.01, %v1139_v44  ;;  %vm1154_vm8 = vcmp.ge.f32.partialorder %v1151_v49, 0.0 }
 0x169   : > { %6404 = vrsqrt.f32 %v1003_v62  ;;  %v1157_v60 = vmul.f32 0.01, %v1151_v49  ;;  %vm1143_vm9 = vcmp.ge.f32.partialorder %v1140_v4, 0.0  ;;  %v1146_v59 = vmul.f32 0.01, %v1140_v4 }
 0x16a   : > { %v1001_v47 = vadd.f32 %v998_v45, %v995_v58  ;;  %v7707_v36 = vsel %vm1142_vm7, %v1139_v44, %v1145_v29  ;;  %vm1155_vm10 = vcmp.ge.f32.partialorder %v1152_v9, 0.0  ;;  %v1158_v50 = vmul.f32 0.01, %v1152_v9 }
 0x16b   : > { %v6401_v12 = vpop.eup %6400  ;;  %v7709_v27 = vsel %vm1154_vm8, %v1151_v49, %v1157_v60  ;;  %v7711_v38 = vsel %vm1143_vm9, %v1140_v4, %v1146_v59  ;;  %v1984_v24 = vmul.f32 %v7608_v54, %v7383_v0  ;;  %v1992_v2 = vmul.f32 %v7620_v26, %v7395_v11 }
 0x16c   : > { %v1117_v51 = vmul.f32 %v6401_v12, %v7559_v25  ;;  %v1129_v39 = vmul.f32 %v6401_v12, %v7573_v8  ;;  %v1004_v41 = vmax.f32 %v1001_v47, 1e-24  ;;  %v7719_v23 = vsel %vm1155_vm10, %v1152_v9, %v1158_v50 }
 0x16d   : > { %v1141_v20 = vmul.f32 %v6401_v12, %v7594_v10  ;;  %v1153_v56 = vmul.f32 %v6401_v12, %v7612_v37  ;;  %v7724_v42 = vadd.f32 %v1984_v24, %v7399_v14  ;;  %v7727_v44 = vadd.f32 %v1992_v2, %v7402_v16 }
 0x16e   : > { %vm1120_vm11 = vcmp.ge.f32.partialorder %v1117_v51, 0.0  ;;  %v1123_v49 = vmul.f32 0.01, %v1117_v51  ;;  %vm1132_vm12 = vcmp.ge.f32.partialorder %v1129_v39, 0.0  ;;  %v1135_v62 = vmul.f32 0.01, %v1129_v39 }
 0x16f   : > { %v6403_v25 = vpop.eup %6402  ;;  %6406 = vrsqrt.f32 %v1004_v41  ;;  %vm1144_vm13 = vcmp.ge.f32.partialorder %v1141_v20, 0.0  ;;  %v1147_v8 = vmul.f32 0.01, %v1141_v20  ;;  %vm1156_vm14 = vcmp.ge.f32.partialorder %v1153_v56, 0.0 }
 0x170   : > { %v1126_v45 = vsel %vm1120_vm11, %v1117_v51, %v1123_v49  ;;  %v1138_v4 = vsel %vm1132_vm12, %v1129_v39, %v1135_v62  ;;  %v1008_v10 = vmul.f32 %v6403_v25, %v7578_v19  ;;  %v1020_v37 = vmul.f32 %v6403_v25, %v7588_v40 }
 0x171   : > { %5709 = vmatmul.mubr.msk.f32.gmra.mrb[4].mxu0 %vm761_vm2, %v1126_v45  ;;  %5735 = vmatmul.mubr.msk.f32.gmra.mrb[4].mxu1 %vm761_vm2, %v1138_v4  ;;  %v7733_v9 = vsel %vm1144_vm13, %v1141_v20, %v1147_v8  ;;  %v1159_v58 = vmul.f32 0.01, %v1153_v56  ;;  %v1032_v29 = vmul.f32 %v6403_v25, %v7623_v7  ;;  %v1044_v60 = vmul.f32 %v6403_v25, %v7626_v61 }
 0x172   : > { %5715 = vmatprep.mubr.msk.f32.mxu0 %vm6756_vm1, %v10366_v43  ;;  %5741 = vmatprep.mubr.msk.f32.mxu1 %vm6756_vm1, %v10366_v43  ;;  %vm1011_vm15 = vcmp.ge.f32.partialorder %v1008_v10, 0.0  ;;  %v1014_v19 = vmul.f32 0.01, %v1008_v10  ;;  %vm1023_vm0 = vcmp.ge.f32.partialorder %v1020_v37, 0.0  ;;  %v1026_v40 = vmul.f32 0.01, %v1020_v37 }
 0x173   : > { %v6405_v59 = vpop.eup %6404  ;;  %v7744_v47 = vsel %vm1156_vm14, %v1153_v56, %v1159_v58  ;;  %vm1035_vm3 = vcmp.ge.f32.partialorder %v1032_v29, 0.0  ;;  %v1038_v7 = vmul.f32 0.01, %v1032_v29  ;;  %vm1047_vm4 = vcmp.ge.f32.partialorder %v1044_v60, 0.0 }
 0x174   : > { %v1017_v61 = vsel %vm1011_vm15, %v1008_v10, %v1014_v19  ;;  %v1029_v50 = vsel %vm1023_vm0, %v1020_v37, %v1026_v40  ;;  %v1009_v12 = vmul.f32 %v6405_v59, %v7642_v13  ;;  %v1021_v24 = vmul.f32 %v6405_v59, %v7645_v15 }
 0x175   : > { %5716 = vmatmul.mubr.msk.f32.vlgmr.msra.gmra.mrb[0].mxu0 %vm761_vm2, %v1017_v61  ;;  %5742 = vmatmul.mubr.msk.f32.vlgmr.msra.gmra.mrb[0].mxu1 %vm761_vm2, %v1029_v50  ;;  %v7750_v2 = vsel %vm1035_vm3, %v1032_v29, %v1038_v7  ;;  %v1050_v51 = vmul.f32 0.01, %v1044_v60  ;;  %v1033_v39 = vmul.f32 %v6405_v59, %v7648_v48  ;;  %v1045_v41 = vmul.f32 %v6405_v59, %v7662_v53 }
 0x176   : > { %5718 = vmatprep.mubr.msk.f32.mxu0 %vm6756_vm1, %v10366_v43  ;;  %5744 = vmatprep.mubr.msk.f32.mxu1 %vm6756_vm1, %v10366_v43  ;;  %vm1012_vm5 = vcmp.ge.f32.partialorder %v1009_v12, 0.0  ;;  %v1015_v13 = vmul.f32 0.01, %v1009_v12  ;;  %vm1024_vm6 = vcmp.ge.f32.partialorder %v1021_v24, 0.0  ;;  %v1027_v15 = vmul.f32 0.01, %v1021_v24 }
 0x177   : > { %6088 = vmatpush3.bf16.msra.mxu0 %v7216_v3  ;;  %6094 = vmatpush3.bf16.msra.mxu1 %v7216_v3  ;;  %v7761_v20 = vsel %vm1047_vm4, %v1044_v60, %v1050_v51  ;;  %vm1036_vm7 = vcmp.ge.f32.partialorder %v1033_v39, 0.0  ;;  %v1039_v48 = vmul.f32 0.01, %v1033_v39  ;;  %vm1048_vm8 = vcmp.ge.f32.partialorder %v1045_v41, 0.0 }
 0x178   : > { %v1018_v53 = vsel %vm1012_vm5, %v1009_v12, %v1015_v13  ;;  %v1030_v56 = vsel %vm1024_vm6, %v1021_v24, %v1027_v15  ;;  %6089 = vmatprep.subr.bf16.mxu0 %v10367_v63  ;;  %6095 = vmatprep.subr.bf16.mxu1 %v10367_v63  ;;  %v1051_v49 = vmul.f32 0.01, %v1045_v41  ;;  %v2000_v62 = vmul.f32 %v7701_v33, %v7420_v32 }
 0x179   : > { %v6407_v25 = vpop.eup %6406  ;;  %5719 = vmatmul.mubr.msk.f32.gmra.mrb[2].mxu0 %vm761_vm2, %v1018_v53  ;;  %5745 = vmatmul.mubr.msk.f32.gmra.mrb[2].mxu1 %vm761_vm2, %v1030_v56  ;;  %v7771_v8 = vsel %vm1036_vm7, %v1033_v39, %v1039_v48  ;;  %v7774_v45 = vstv %s7737_s18  ;;  %v2014_v4 = vmul.f32 %v7724_v42, %v7724_v42  ;;  %v2017_v10 = vmul.f32 %v7727_v44, %v7727_v44  ;;  %s5437_s18 = sld [smem:[#allocation16 + $0x85]] }
 0x17a   : > { %5721 = vmatprep.mubr.msk.f32.mxu0 %vm6756_vm1, %v10366_v43  ;;  %5747 = vmatprep.mubr.msk.f32.mxu1 %vm6756_vm1, %v10366_v43  ;;  %v1010_v37 = vmul.f32 %v6407_v25, %v7667_v22  ;;  %v1022_v58 = vmul.f32 %v6407_v25, %v7674_v6  ;;  %v7787_v29 = vsel %vm1048_vm8, %v1045_v41, %v1051_v49  ;;  %v7824_v48 = vstv %s7767_s30  ;;  %s5439_s30 = sld [smem:[#allocation16 + $0x87]] }
 0x17b   : > { %v1034_v60 = vmul.f32 %v6407_v25, %v7678_v30  ;;  %v1046_v19 = vmul.f32 %v6407_v25, %v7688_v31  ;;  %v7792_v40 = vadd.f32 %v2000_v62, %v7405_v17  ;;  %v2008_v59 = vmul.f32 %v7774_v45, %v7442_v52 }
 0x17c   : > { %vm1013_vm9 = vcmp.ge.f32.partialorder %v1010_v37, 0.0  ;;  %v1016_v22 = vmul.f32 0.01, %v1010_v37  ;;  %vm1025_vm10 = vcmp.ge.f32.partialorder %v1022_v58, 0.0  ;;  %v1028_v6 = vmul.f32 0.01, %v1022_v58 }
 0x17d   : > { %vm1037_vm11 = vcmp.ge.f32.partialorder %v1034_v60, 0.0  ;;  %v1040_v7 = vmul.f32 0.01, %v1034_v60  ;;  %vm1049_vm12 = vcmp.ge.f32.partialorder %v1046_v19, 0.0  ;;  %v1052_v30 = vmul.f32 0.01, %v1046_v19 }
 0x17e   : > { %v1019_v31 = vsel %vm1013_vm9, %v1010_v37, %v1016_v22  ;;  %v1031_v61 = vsel %vm1025_vm10, %v1022_v58, %v1028_v6  ;;  %v7801_v50 = vadd.f32 %v2008_v59, %v7408_v18  ;;  %v2020_v12 = vadd.f32 %v2017_v10, %v2014_v4 }
 0x17f   : > { %5722 = vmatmul.mubr.msk.f32.gmra.mrb[4].mxu0 %vm761_vm2, %v1019_v31  ;;  %5748 = vmatmul.mubr.msk.f32.gmra.mrb[4].mxu1 %vm761_vm2, %v1031_v61  ;;  %v7807_v24 = vsel %vm1037_vm11, %v1034_v60, %v1040_v7  ;;  %v7809_v51 = vsel %vm1049_vm12, %v1046_v19, %v1052_v30  ;;  %v2023_v39 = vmul.f32 %v7792_v40, %v7792_v40  ;;  %v7853_v19 = vstv %s7796_s15  ;;  %s5440_s15 = sld [smem:[#allocation16 + $0x88]] }
 0x180   : > { %5754 = vmatprep.mubr.msk.f32.mxu0 %vm6756_vm1, %v10366_v43  ;;  %5780 = vmatprep.mubr.msk.f32.mxu1 %vm6756_vm1, %v10366_v43  ;;  %v2029_v41 = vmul.f32 %v7801_v50, %v7801_v50  ;;  %v1985_v13 = vmul.f32 %v7608_v54, %v7470_v1  ;;  %v1993_v15 = vmul.f32 %v7620_v26, %v7477_v35 }
 0x181   : > { %v2026_v53 = vadd.f32 %v2023_v39, %v2020_v12  ;;  %v2001_v56 = vmul.f32 %v7701_v33, %v7490_v21  ;;  %v2009_v49 = vmul.f32 %v7774_v45, %v7507_v34  ;;  %v1986_v62 = vmul.f32 %v7608_v54, %v7524_v46 }
 0x182   : > { %v7833_v25 = vadd.f32 %v1985_v13, %v7399_v14  ;;  %v7836_v4 = vadd.f32 %v1993_v15, %v7402_v16  ;;  %v1994_v10 = vmul.f32 %v7620_v26, %v7533_v57  ;;  %v2002_v37 = vmul.f32 %v7701_v33, %v7570_v5 }
 0x183   : > { %5755 = vmatmul.mubr.msk.f32.vlgmr.msra.gmra.mrb[6].mxu0 %vm761_vm2, %v7707_v36  ;;  %5781 = vmatmul.mubr.msk.f32.vlgmr.msra.gmra.mrb[6].mxu1 %vm761_vm2, %v7709_v27  ;;  %v2032_v54 = vadd.f32 %v2029_v41, %v2026_v53  ;;  %v7847_v58 = vadd.f32 %v2001_v56, %v7405_v17  ;;  %v7850_v60 = vadd.f32 %v2009_v49, %v7408_v18  ;;  %v7867_v27 = vstv %s7798_s26  ;;  %s6758_s26 = smov 127  }
 0x184   : > { %5757 = vmatprep.mubr.msk.f32.mxu0 %vm6756_vm1, %v10366_v43  ;;  %5783 = vmatprep.mubr.msk.f32.mxu1 %vm6756_vm1, %v10366_v43  ;;  %v2015_v26 = vmul.f32 %v7833_v25, %v7833_v25  ;;  %v2018_v33 = vmul.f32 %v7836_v4, %v7836_v4  ;;  %v7864_v36 = vadd.f32 %v1986_v62, %v7399_v14  ;;  %v7886_v12 = vstv %s7803_s11  ;;  %s10277_s11 = smov 126  }
 0x185   : > { %6091 = vmatpush3.bf16.msra.mxu0 %v7299_v28  ;;  %6097 = vmatpush3.bf16.msra.mxu1 %v7299_v28  ;;  %v2035_v59 = vmax.f32 %v2032_v54, 1e-24  ;;  %v2024_v22 = vmul.f32 %v7847_v58, %v7847_v58  ;;  %v2030_v6 = vmul.f32 %v7850_v60, %v7850_v60  ;;  %v7876_v7 = vadd.f32 %v1994_v10, %v7402_v16 }
 0x186   : > { %6098 = vmatprep.subr.bf16.mxu0 %v10367_v63  ;;  %6104 = vmatprep.subr.bf16.mxu1 %v10367_v63  ;;  %v2021_v30 = vadd.f32 %v2018_v33, %v2015_v26  ;;  %v7881_v31 = vadd.f32 %v2002_v37, %v7405_v17  ;;  %v2010_v61 = vmul.f32 %v7774_v45, %v7581_v55 }
 0x187   : > { %5758 = vmatmul.mubr.msk.f32.gmra.mrb[8].mxu0 %vm761_vm2, %v7711_v38  ;;  %5784 = vmatmul.mubr.msk.f32.gmra.mrb[8].mxu1 %vm761_vm2, %v7719_v23  ;;  %6408 = vrsqrt.f32 %v2035_v59  ;;  %v2016_v39 = vmul.f32 %v7864_v36, %v7864_v36  ;;  %v2019_v41 = vmul.f32 %v7876_v7, %v7876_v7  ;;  %v1877_v13 = vmul.f32 %v7824_v48, %v7383_v0 }
 0x188   : > { %5760 = vmatprep.mubr.msk.f32.mxu0 %vm6756_vm1, %v10366_v43  ;;  %5786 = vmatprep.mubr.msk.f32.mxu1 %vm6756_vm1, %v10366_v43  ;;  %v2027_v38 = vadd.f32 %v2024_v22, %v2021_v30  ;;  %v7903_v45 = vadd.f32 %v2010_v61, %v7408_v18  ;;  %v2025_v23 = vmul.f32 %v7881_v31, %v7881_v31 }
 0x189   : > { %v2022_v15 = vadd.f32 %v2019_v41, %v2016_v39  ;;  %v7908_v53 = vadd.f32 %v1877_v13, %v7399_v14  ;;  %v1885_v0 = vmul.f32 %v7853_v19, %v7395_v11  ;;  %v1893_v56 = vmul.f32 %v7867_v27, %v7420_v32 }
 0x18a   : > { %v2033_v49 = vadd.f32 %v2030_v6, %v2027_v38  ;;  %v2031_v62 = vmul.f32 %v7903_v45, %v7903_v45  ;;  %v1901_v10 = vmul.f32 %v7886_v12, %v7442_v52  ;;  %v1878_v37 = vmul.f32 %v7824_v48, %v7470_v1 }
 0x18b   : > { %5761 = vmatmul.mubr.msk.f32.gmra.mrb[10].mxu0 %vm761_vm2, %v7733_v9  ;;  %5787 = vmatmul.mubr.msk.f32.gmra.mrb[10].mxu1 %vm761_vm2, %v7744_v47  ;;  %v2028_v11 = vadd.f32 %v2025_v23, %v2022_v15  ;;  %v7925_v54 = vadd.f32 %v1885_v0, %v7402_v16  ;;  %v7928_v32 = vadd.f32 %v1893_v56, %v7405_v17 }
 0x18c   : > { %5767 = vmatprep.mubr.msk.f32.mxu0 %vm6756_vm1, %v10366_v43  ;;  %5793 = vmatprep.mubr.msk.f32.mxu1 %vm6756_vm1, %v10366_v43  ;;  %v2036_v52 = vmax.f32 %v2033_v49, 1e-24  ;;  %v7935_v1 = vadd.f32 %v1901_v10, %v7408_v18  ;;  %v1907_v9 = vmul.f32 %v7908_v53, %v7908_v53  ;;  %v7940_v47 = vadd.f32 %v1878_v37, %v7399_v14 }
 0x18d   : > { %v2034_v26 = vadd.f32 %v2031_v62, %v2028_v11  ;;  %v1910_v33 = vmul.f32 %v7925_v54, %v7925_v54  ;;  %v1916_v59 = vmul.f32 %v7928_v32, %v7928_v32  ;;  %v1886_v22 = vmul.f32 %v7853_v19, %v7477_v35 }
 0x18e   : > { %6410 = vrsqrt.f32 %v2036_v52  ;;  %v1922_v6 = vmul.f32 %v7935_v1, %v7935_v1  ;;  %v1894_v30 = vmul.f32 %v7867_v27, %v7490_v21  ;;  %v1902_v61 = vmul.f32 %v7886_v12, %v7507_v34 }
 0x18f   : > { %5768 = vmatmul.mubr.msk.f32.vlgmr.msra.gmra.mrb[6].mxu0 %vm761_vm2, %v7750_v2  ;;  %5794 = vmatmul.mubr.msk.f32.vlgmr.msra.gmra.mrb[6].mxu1 %vm761_vm2, %v7761_v20  ;;  %v2037_v39 = vmax.f32 %v2034_v26, 1e-24  ;;  %v1913_v41 = vadd.f32 %v1910_v33, %v1907_v9  ;;  %v7959_v35 = vadd.f32 %v1886_v22, %v7402_v16  ;;  %v1908_v13 = vmul.f32 %v7940_v47, %v7940_v47 }
 0x190   : > { %5770 = vmatprep.mubr.msk.f32.mxu0 %vm6756_vm1, %v10366_v43  ;;  %5796 = vmatprep.mubr.msk.f32.mxu1 %vm6756_vm1, %v10366_v43  ;;  %v7968_v21 = vadd.f32 %v1894_v30, %v7405_v17  ;;  %v7971_v34 = vadd.f32 %v1902_v61, %v7408_v18  ;;  %v1879_v2 = vmul.f32 %v7824_v48, %v7524_v46 }
 0x191   : > { %v7975_v20 = vpop.eup %6408  ;;  %6100 = vmatpush3.bf16.msra.mxu0 %v7216_v3  ;;  %6106 = vmatpush3.bf16.msra.mxu1 %v7216_v3  ;;  %6412 = vrsqrt.f32 %v2037_v39  ;;  %v1919_v38 = vadd.f32 %v1916_v59, %v1913_v41  ;;  %v1911_v23 = vmul.f32 %v7959_v35, %v7959_v35  ;;  %v1887_v15 = vmul.f32 %v7853_v19, %v7533_v57 }
 0x192   : > { %v2041_v0 = vmul.f32 %v7975_v20, %v7724_v42  ;;  %v2053_v46 = vmul.f32 %v7975_v20, %v7727_v44  ;;  %6101 = vmatprep.subr.bf16.mxu0 %v10367_v63  ;;  %6107 = vmatprep.subr.bf16.mxu1 %v10367_v63  ;;  %v1917_v48 = vmul.f32 %v7968_v21, %v7968_v21 }
 0x193   : > { %5771 = vmatmul.mubr.msk.f32.gmra.mrb[8].mxu0 %vm761_vm2, %v7771_v8  ;;  %5797 = vmatmul.mubr.msk.f32.gmra.mrb[8].mxu1 %vm761_vm2, %v7787_v29  ;;  %v1925_v57 = vadd.f32 %v1922_v6, %v1919_v38  ;;  %v1914_v19 = vadd.f32 %v1911_v23, %v1908_v13  ;;  %v1923_v42 = vmul.f32 %v7971_v34, %v7971_v34 }
 0x194   : > { %5773 = vmatprep.mubr.msk.f32.mxu0 %vm6756_vm1, %v10366_v43  ;;  %5799 = vmatprep.mubr.msk.f32.mxu1 %vm6756_vm1, %v10366_v43  ;;  %vm2044_vm13 = vcmp.ge.f32.partialorder %v2041_v0, 0.0  ;;  %v2047_v44 = vmul.f32 0.01, %v2041_v0  ;;  %vm2056_vm14 = vcmp.ge.f32.partialorder %v2053_v46, 0.0  ;;  %v2059_v56 = vmul.f32 0.01, %v2053_v46 }
 0x195   : > { %v1928_v49 = vmax.f32 %v1925_v57, 1e-24  ;;  %v1920_v8 = vadd.f32 %v1917_v48, %v1914_v19  ;;  %v8002_v62 = vadd.f32 %v1879_v2, %v7399_v14  ;;  %v8005_v29 = vadd.f32 %v1887_v15, %v7402_v16 }
 0x196   : > { %v2050_v10 = vsel %vm2044_vm13, %v2041_v0, %v2047_v44  ;;  %v1895_v37 = vmul.f32 %v7867_v27, %v7570_v5  ;;  %v1903_v11 = vmul.f32 %v7886_v12, %v7581_v55  ;;  %v2062_v5 = vsel %vm2056_vm14, %v2053_v46, %v2059_v56 }
 0x197   : > { %5774 = vmatmul.mubr.msk.f32.gmra.mrb[10].mxu0 %vm761_vm2, %v7807_v24  ;;  %5800 = vmatmul.mubr.msk.f32.gmra.mrb[10].mxu1 %vm761_vm2, %v7809_v51  ;;  %6414 = vrsqrt.f32 %v1928_v49  ;;  %v1926_v52 = vadd.f32 %v1923_v42, %v1920_v8  ;;  %v1909_v14 = vmul.f32 %v8002_v62, %v8002_v62  ;;  %v1912_v16 = vmul.f32 %v8005_v29, %v8005_v29 }
 0x198   : > { %v8019_v9 = vpop.eup %6410  ;;  %5806 = vmatprep.mubr.msk.f32.mxu0 %vm6756_vm1, %v10366_v43  ;;  %5832 = vmatprep.mubr.msk.f32.mxu1 %vm6756_vm1, %v10366_v43  ;;  %v8027_v55 = vadd.f32 %v1895_v37, %v7405_v17  ;;  %v8030_v24 = vadd.f32 %v1903_v11, %v7408_v18  ;;  %v2077_v49 = vmul.f32 %v7975_v20, %v7801_v50 }
 0x199   : > { %v2042_v51 = vmul.f32 %v8019_v9, %v7833_v25  ;;  %v2054_v27 = vmul.f32 %v8019_v9, %v7836_v4  ;;  %v1929_v12 = vmax.f32 %v1926_v52, 1e-24  ;;  %v1915_v26 = vadd.f32 %v1912_v16, %v1909_v14 }
 0x19a   : > { %v1918_v33 = vmul.f32 %v8027_v55, %v8027_v55  ;;  %v1924_v59 = vmul.f32 %v8030_v24, %v8030_v24  ;;  %v2078_v37 = vmul.f32 %v8019_v9, %v7850_v60  ;;  %vm2080_vm12 = vcmp.ge.f32.partialorder %v2077_v49, 0.0 }
 0x19b   : > { %v8040_v22 = vpop.eup %6412  ;;  %5807 = vmatmul.mubr.msk.f32.vlgmr.msra.gmra.mrb[12].mxu0 %vm761_vm2, %v2050_v10  ;;  %5833 = vmatmul.mubr.msk.f32.vlgmr.msra.gmra.mrb[12].mxu1 %vm761_vm2, %v2062_v5  ;;  %vm2045_vm15 = vcmp.ge.f32.partialorder %v2042_v51, 0.0  ;;  %v2048_v17 = vmul.f32 0.01, %v2042_v51  ;;  %vm2057_vm0 = vcmp.ge.f32.partialorder %v2054_v27, 0.0  ;;  %v2060_v18 = vmul.f32 0.01, %v2054_v27 }
 0x19c   : > { %5809 = vmatprep.mubr.msk.f32.mxu0 %vm6756_vm1, %v10366_v43  ;;  %5835 = vmatprep.mubr.msk.f32.mxu1 %vm6756_vm1, %v10366_v43  ;;  %v2043_v25 = vmul.f32 %v8040_v22, %v7864_v36  ;;  %v2055_v4 = vmul.f32 %v8040_v22, %v7876_v7  ;;  %6416 = vrsqrt.f32 %v1929_v12  ;;  %v1921_v6 = vadd.f32 %v1918_v33, %v1915_v26 }
 0x19d   : > { %v2051_v30 = vsel %vm2045_vm15, %v2042_v51, %v2048_v17  ;;  %v2063_v61 = vsel %vm2057_vm0, %v2054_v27, %v2060_v18  ;;  %6103 = vmatpush3.bf16.msra.mxu0 %v7299_v28  ;;  %6109 = vmatpush3.bf16.msra.mxu1 %v7299_v28  ;;  %v2066_v10 = vmul.f32 %v8019_v9, %v7847_v58  ;;  %v2084_v60 = vmul.f32 0.01, %v2078_v37 }
 0x19e   : > { %vm2046_vm3 = vcmp.ge.f32.partialorder %v2043_v25, 0.0  ;;  %v2049_v39 = vmul.f32 0.01, %v2043_v25  ;;  %vm2058_vm4 = vcmp.ge.f32.partialorder %v2055_v4, 0.0  ;;  %v2061_v41 = vmul.f32 0.01, %v2055_v4  ;;  %6110 = vmatprep.subr.bf16.mxu0 %v10367_v63  ;;  %6116 = vmatprep.subr.bf16.mxu1 %v10367_v63 }
 0x19f   : > { %5810 = vmatmul.mubr.msk.f32.gmra.mrb[14].mxu0 %vm761_vm2, %v2051_v30  ;;  %5836 = vmatmul.mubr.msk.f32.gmra.mrb[14].mxu1 %vm761_vm2, %v2063_v61  ;;  %v1927_v36 = vadd.f32 %v1924_v59, %v1921_v6  ;;  %v2067_v5 = vmul.f32 %v8040_v22, %v7881_v31  ;;  %vm2069_vm13 = vcmp.ge.f32.partialorder %v2066_v10, 0.0  ;;  %v2079_v9 = vmul.f32 %v8040_v22, %v7903_v45 }
 0x1a0   : > { %5812 = vmatprep.mubr.msk.f32.mxu0 %vm6756_vm1, %v10366_v43  ;;  %5838 = vmatprep.mubr.msk.f32.mxu1 %vm6756_vm1, %v10366_v43  ;;  %v2052_v7 = vsel %vm2046_vm3, %v2043_v25, %v2049_v39  ;;  %v2064_v13 = vsel %vm2058_vm4, %v2055_v4, %v2061_v41  ;;  %vm2081_vm14 = vcmp.ge.f32.partialorder %v2078_v37, 0.0 }
 0x1a1   : > { %v8062_v2 = vpop.eup %6414  ;;  %v1930_v38 = vmax.f32 %v1927_v36, 1e-24  ;;  %v2073_v27 = vmul.f32 0.01, %v2067_v5  ;;  %v2087_v12 = vsel %vm2081_vm14, %v2078_v37, %v2084_v60  ;;  %vm2070_vm15 = vcmp.ge.f32.partialorder %v2067_v5, 0.0 }
 0x1a2   : > { %v1934_v23 = vmul.f32 %v8062_v2, %v7908_v53  ;;  %v1946_v15 = vmul.f32 %v8062_v2, %v7925_v54  ;;  %v1958_v31 = vmul.f32 %v8062_v2, %v7928_v32  ;;  %v2085_v26 = vmul.f32 0.01, %v2079_v9 }
 0x1a3   : > { %5813 = vmatmul.mubr.msk.f32.gmra.mrb[16].mxu0 %vm761_vm2, %v2052_v7  ;;  %5839 = vmatmul.mubr.msk.f32.gmra.mrb[16].mxu1 %vm761_vm2, %v2064_v13  ;;  %6418 = vrsqrt.f32 %v1930_v38  ;;  %v1970_v45 = vmul.f32 %v8062_v2, %v7935_v1  ;;  %vm2082_vm0 = vcmp.ge.f32.partialorder %v2079_v9, 0.0  ;;  %v2076_v32 = vsel %vm2070_vm15, %v2067_v5, %v2073_v27 }
 0x1a4   : > { %5819 = vmatprep.mubr.msk.f32.mxu0 %vm6756_vm1, %v10366_v43  ;;  %5845 = vmatprep.mubr.msk.f32.mxu1 %vm6756_vm1, %v10366_v43  ;;  %vm1937_vm5 = vcmp.ge.f32.partialorder %v1934_v23, 0.0  ;;  %v1940_v0 = vmul.f32 0.01, %v1934_v23  ;;  %vm1949_vm6 = vcmp.ge.f32.partialorder %v1946_v15, 0.0  ;;  %v1952_v46 = vmul.f32 0.01, %v1946_v15 }
 0x1a5   : > { %v1964_v33 = vmul.f32 0.01, %v1958_v31  ;;  %vm1961_vm3 = vcmp.ge.f32.partialorder %v1958_v31, 0.0  ;;  %v1976_v1 = vmul.f32 0.01, %v1970_v45  ;;  %vm1973_vm4 = vcmp.ge.f32.partialorder %v1970_v45, 0.0 }
 0x1a6   : > { %v8074_v48 = vpop.eup %6416  ;;  %v1943_v53 = vsel %vm1937_vm5, %v1934_v23, %v1940_v0  ;;  %v1955_v57 = vsel %vm1949_vm6, %v1946_v15, %v1952_v46 }
 0x1a7   : > { %5820 = vmatmul.mubr.msk.f32.vlgmr.msra.gmra.mrb[12].mxu0 %vm761_vm2, %v1943_v53  ;;  %5846 = vmatmul.mubr.msk.f32.vlgmr.msra.gmra.mrb[12].mxu1 %vm761_vm2, %v1955_v57  ;;  %v1935_v54 = vmul.f32 %v8074_v48, %v7940_v47  ;;  %v1947_v19 = vmul.f32 %v8074_v48, %v7959_v35  ;;  %v2065_v47 = vmul.f32 %v7975_v20, %v7792_v40  ;;  %v2083_v20 = vmul.f32 0.01, %v2077_v49 }
 0x1a8   : > { %5822 = vmatprep.mubr.msk.f32.mxu0 %vm6756_vm1, %v10366_v43  ;;  %5848 = vmatprep.mubr.msk.f32.mxu1 %vm6756_vm1, %v10366_v43  ;;  %v1959_v59 = vmul.f32 %v8074_v48, %v7968_v21  ;;  %v1971_v22 = vmul.f32 %v8074_v48, %v7971_v34  ;;  %v1967_v17 = vsel %vm1961_vm3, %v1958_v31, %v1964_v33  ;;  %v8239_v33 = vld [vmem:[%s10368_s7 + $0x18] sm:$0xff] }
 0x1a9   : > { %vm1938_vm7 = vcmp.ge.f32.partialorder %v1935_v54, 0.0  ;;  %v1941_v42 = vmul.f32 0.01, %v1935_v54  ;;  %vm1950_vm8 = vcmp.ge.f32.partialorder %v1947_v19, 0.0  ;;  %v1953_v44 = vmul.f32 0.01, %v1947_v19  ;;  %6112 = vmatpush3.bf16.msra.mxu0 %v7216_v3  ;;  %6118 = vmatpush3.bf16.msra.mxu1 %v7216_v3 }
 0x1aa   : > { %6113 = vmatprep.subr.bf16.mxu0 %v10367_v63  ;;  %6119 = vmatprep.subr.bf16.mxu1 %v10367_v63  ;;  %vm2068_vm9 = vcmp.ge.f32.partialorder %v2065_v47, 0.0  ;;  %v2071_v50 = vmul.f32 0.01, %v2065_v47  ;;  %v2086_v58 = vsel %vm2080_vm12, %v2077_v49, %v2083_v20  ;;  %v1965_v18 = vmul.f32 0.01, %v1959_v59 }
 0x1ab   : > { %v1944_v35 = vsel %vm1938_vm7, %v1935_v54, %v1941_v42  ;;  %v1956_v56 = vsel %vm1950_vm8, %v1947_v19, %v1953_v44  ;;  %v1979_v21 = vsel %vm1973_vm4, %v1970_v45, %v1976_v1  ;;  %v1977_v25 = vmul.f32 0.01, %v1971_v22  ;;  %v8206_v45 = vld [vmem:[%s10368_s7 + $0x8] sm:$0xff] }
 0x1ac   : > { %5823 = vmatmul.mubr.msk.f32.gmra.mrb[14].mxu0 %vm761_vm2, %v1944_v35  ;;  %5849 = vmatmul.mubr.msk.f32.gmra.mrb[14].mxu1 %vm761_vm2, %v1956_v56  ;;  %vm1962_vm5 = vcmp.ge.f32.partialorder %v1959_v59, 0.0  ;;  %vm1974_vm6 = vcmp.ge.f32.partialorder %v1971_v22, 0.0 }
 0x1ad   : > { %v8096_v8 = vpop.eup %6418  ;;  %5825 = vmatprep.mubr.msk.f32.mxu0 %vm6756_vm1, %v10366_v43  ;;  %5851 = vmatprep.mubr.msk.f32.mxu1 %vm6756_vm1, %v10366_v43  ;;  %v1968_v6 = vsel %vm1962_vm5, %v1959_v59, %v1965_v18  ;;  %v1980_v30 = vsel %vm1974_vm6, %v1971_v22, %v1977_v25  ;;  %v8253_v59 = vld [vmem:[%s10368_s7 + $0x20] sm:$0x3] }
 0x1ae   : > { %v1936_v3 = vmul.f32 %v8096_v8, %v8002_v62  ;;  %v1948_v40 = vmul.f32 %v8096_v8, %v8005_v29  ;;  %v2074_v62 = vsel %vm2068_vm9, %v2065_v47, %v2071_v50  ;;  %v2072_v29 = vmul.f32 0.01, %v2066_v10  ;;  %v8266_v18 = vld [vmem:[%s10369_s8] sm:$0xff] }
 0x1af   : > { %v1960_v4 = vmul.f32 %v8096_v8, %v8027_v55  ;;  %v1972_v34 = vmul.f32 %v8096_v8, %v8030_v24  ;;  %vm2801_vm9 = vcmask 146432  }
 0x1b0   : > { %vm1939_vm10 = vcmp.ge.f32.partialorder %v1936_v3, 0.0  ;;  %v1942_v11 = vmul.f32 0.01, %v1936_v3  ;;  %vm1951_vm11 = vcmp.ge.f32.partialorder %v1948_v40, 0.0  ;;  %v1954_v52 = vmul.f32 0.01, %v1948_v40 }
 0x1b1   : > { %v2075_v51 = vsel %vm2069_vm13, %v2066_v10, %v2072_v29  ;;  %v1966_v61 = vmul.f32 0.01, %v1960_v4  ;;  %v1978_v39 = vmul.f32 0.01, %v1972_v34  ;;  %vm1963_vm7 = vcmp.ge.f32.partialorder %v1960_v4, 0.0 }
 0x1b2   : > { %v1945_v14 = vsel %vm1939_vm10, %v1936_v3, %v1942_v11  ;;  %v1957_v16 = vsel %vm1951_vm11, %v1948_v40, %v1954_v52  ;;  %vm1975_vm8 = vcmp.ge.f32.partialorder %v1972_v34, 0.0  ;;  %vm3193_vm10 = vcmask 1045504  }
 0x1b3   : > { %5826 = vmatmul.mubr.msk.f32.gmra.mrb[16].mxu0 %vm761_vm2, %v1945_v14  ;;  %5852 = vmatmul.mubr.msk.f32.gmra.mrb[16].mxu1 %vm761_vm2, %v1957_v16  ;;  %v1969_v55 = vsel %vm1963_vm7, %v1960_v4, %v1966_v61  ;;  %v1981_v24 = vsel %vm1975_vm8, %v1972_v34, %v1978_v39  ;;  %v8279_v61 = vld [vmem:[%s10369_s8 + $0x8] sm:$0xff]  ;;  %vm4953_vm11 = vcmask 261120  }
 0x1b4   : > { %5858 = vmatprep.mubr.msk.f32.mxu0 %vm6756_vm1, %v10366_v43  ;;  %5884 = vmatprep.mubr.msk.f32.mxu1 %vm6756_vm1, %v10366_v43 }
 0x1b7   : > { %5859 = vmatmul.mubr.msk.f32.vlgmr.msra.gmra.mrb[18].mxu0 %vm761_vm2, %v2074_v62  ;;  %5885 = vmatmul.mubr.msk.f32.vlgmr.msra.gmra.mrb[18].mxu1 %vm761_vm2, %v2086_v58 }
 0x1b8   : > { %5861 = vmatprep.mubr.msk.f32.mxu0 %vm6756_vm1, %v10366_v43  ;;  %5887 = vmatprep.mubr.msk.f32.mxu1 %vm6756_vm1, %v10366_v43 }
 0x1b9   : > { %6115 = vmatpush3.bf16.msra.mxu0 %v7299_v28  ;;  %6121 = vmatpush3.bf16.msra.mxu1 %v7299_v28  ;;  %v2088_v28 = vsel %vm2082_vm0, %v2079_v9, %v2085_v26 }
 0x1ba   : > { %6122 = vmatprep.subr.bf16.mxu0 %v10367_v63  ;;  %6128 = vmatprep.subr.bf16.mxu1 %v10367_v63 }
 0x1bb   : > { %5862 = vmatmul.mubr.msk.f32.gmra.mrb[20].mxu0 %vm761_vm2, %v2075_v51  ;;  %5888 = vmatmul.mubr.msk.f32.gmra.mrb[20].mxu1 %vm761_vm2, %v2087_v12  ;;  %v8193_v51 = vld [vmem:[%s10368_s7] sm:$0xff] }
 0x1bc   : > { %5864 = vmatprep.mubr.msk.f32.mxu0 %vm6756_vm1, %v10366_v43  ;;  %5890 = vmatprep.mubr.msk.f32.mxu1 %vm6756_vm1, %v10366_v43 }
 0x1bf   : > { %5865 = vmatmul.mubr.msk.f32.gmra.mrb[22].mxu0 %vm761_vm2, %v2076_v32  ;;  %5891 = vmatmul.mubr.msk.f32.gmra.mrb[22].mxu1 %vm761_vm2, %v2088_v28  ;;  %v8221_v32 = vld [vmem:[%s10368_s7 + $0x10] sm:$0xff] }
 0x1c0   : > { %5871 = vmatprep.mubr.msk.f32.mxu0 %vm6756_vm1, %v10366_v43  ;;  %5897 = vmatprep.mubr.msk.f32.mxu1 %vm6756_vm1, %v10366_v43 }
 0x1c3   : > { %5872 = vmatmul.mubr.msk.f32.vlgmr.msra.gmra.mrb[18].mxu0 %vm761_vm2, %v1967_v17  ;;  %5898 = vmatmul.mubr.msk.f32.vlgmr.msra.gmra.mrb[18].mxu1 %vm761_vm2, %v1979_v21 }
 0x1c4   : > { %5874 = vmatprep.mubr.msk.f32.mxu0 %vm6756_vm1, %v10366_v43  ;;  %5900 = vmatprep.mubr.msk.f32.mxu1 %vm6756_vm1, %v10366_v43 }
 0x1c7   : > { %5875 = vmatmul.mubr.msk.f32.gmra.mrb[20].mxu0 %vm761_vm2, %v1968_v6  ;;  %5901 = vmatmul.mubr.msk.f32.gmra.mrb[20].mxu1 %vm761_vm2, %v1980_v30 }
 0x1c8   : > { %5877 = vmatprep.mubr.msk.f32.mxu0 %vm6756_vm1, %v10366_v43  ;;  %5903 = vmatprep.mubr.msk.f32.mxu1 %vm6756_vm1, %v10366_v43 }
 0x1cb   : > { %5878 = vmatmul.mubr.msk.f32.gmra.mrb[22].mxu0 %vm761_vm2, %v1969_v55  ;;  %5904 = vmatmul.mubr.msk.f32.gmra.mrb[22].mxu1 %vm761_vm2, %v1981_v24  ;;  %vm2817_vm2 = vcmask 1041408  }
 0x1cc   : > { %5912 = vmatprep.mubr.msk.f32.mxu0 %vm6756_vm1, %v10366_v43  ;;  %5954 = vmatprep.mubr.msk.f32.mxu1 %vm6756_vm1, %v10366_v43 }
 0x248   : > { %v1327_v41 = vpop.f32.mrb[0].mxu0  ;;  %v1505_v36 = vpop.f32.mrb[0].mxu1 }
 0x249   : > { %v5717_v7 = vpop.f32.mrb[1].mxu0  ;;  %v5743_v13 = vpop.f32.mrb[1].mxu1 }
 0x24a   : > { %v934_v7 = vld [vmem:[%s10369_s8 + $0x18] sm:$0xff]  ;;  %v8406_v13 = vstv %s5405_s28  ;;  %s8698_s28 = sld [smem:[#allocation16 + $0x105]] }
 0x24c   : > { %v1332_v2 = vpop.f32.mrb[2].mxu0  ;;  %v1510_v38 = vpop.f32.mrb[2].mxu1 }
 0x24d   : > { %v6126_v23 = vpack.c.bf16 %v1332_v2, %v1327_v41  ;;  %v6132_v15 = vpack.c.bf16 %v1510_v38, %v1505_v36  ;;  %v5720_v0 = vpop.f32.mrb[3].mxu0  ;;  %v5746_v46 = vpop.f32.mrb[3].mxu1  ;;  %v933_v36 = vld [vmem:[%s10369_s8 + $0x10] sm:$0xff]  ;;  %v8408_v2 = vstv %s5406_s21  ;;  %v8410_v38 = vstv %s5408_s24  ;;  %s8712_s21 = sld [smem:[#allocation16 + $0x83]]  ;;  %s8731_s24 = sld [smem:[#allocation16 + $0x108]] }
 0x24e   : > { %v8418_v0 = vstv %s5411_s27  ;;  %v8420_v46 = vstv %s5412_s17  ;;  %s8744_s27 = sld [smem:[#allocation16 + $0x185]]  ;;  %s8750_s17 = sld [smem:[#allocation16 + $0x187]] }
 0x252   : > { %v1337_v48 = vpop.f32.mrb[4].mxu0  ;;  %v1515_v53 = vpop.f32.mrb[4].mxu1 }
 0x253   : > { %v5723_v57 = vpop.f32.mrb[5].mxu0  ;;  %v5749_v54 = vpop.f32.mrb[5].mxu1 }
 0x254   : > { %v8426_v57 = vstv %s5437_s18  ;;  %v8428_v54 = vstv %s5439_s30  ;;  %s9147_s18 = sld [smem:[#allocation16 + $0x101]]  ;;  %s9156_s30 = sld [smem:[#allocation16 + $0x103]] }
 0x262   : > { %v8172_v19 = vpop.f32.mrb[6].mxu0  ;;  %v8174_v42 = vpop.f32.mrb[6].mxu1 }
 0x263   : > { %v5769_v44 = vpop.f32.mrb[7].mxu0  ;;  %v5795_v47 = vpop.f32.mrb[7].mxu1 }
 0x266   : > { %v8176_v35 = vpop.f32.mrb[8].mxu0  ;;  %v8178_v56 = vpop.f32.mrb[8].mxu1 }
 0x267   : > { %v6138_v49 = vpack.c.bf16 %v8176_v35, %v8172_v19  ;;  %v6144_v8 = vpack.c.bf16 %v8178_v56, %v8174_v42  ;;  %v5772_v3 = vpop.f32.mrb[9].mxu0  ;;  %v5798_v40 = vpop.f32.mrb[9].mxu1 }
 0x268   : > { %v8444_v40 = vstv %s5440_s15  ;;  %s9171_s15 = sld [smem:[#allocation16 + $0x183]] }
 0x26a   : > { %v8184_v50 = vpop.f32.mrb[10].mxu0  ;;  %v8186_v20 = vpop.f32.mrb[10].mxu1 }
 0x26b   : > { %v5775_v10 = vpop.f32.mrb[11].mxu0  ;;  %v5801_v37 = vpop.f32.mrb[11].mxu1 }
 0x27a   : > { %v2253_v11 = vpop.f32.mrb[12].mxu0  ;;  %v2431_v52 = vpop.f32.mrb[12].mxu1 }
 0x27b   : > { %v5821_v14 = vpop.f32.mrb[13].mxu0  ;;  %v5847_v16 = vpop.f32.mrb[13].mxu1 }
 0x27f   : > { %v2258_v62 = vpop.f32.mrb[14].mxu0  ;;  %v2436_v29 = vpop.f32.mrb[14].mxu1 }
 0x280   : > { %v6123_v5 = vpack.c.bf16 %v2258_v62, %v2253_v11  ;;  %v6129_v58 = vpack.c.bf16 %v2436_v29, %v2431_v52  ;;  %v5824_v60 = vpop.f32.mrb[15].mxu0  ;;  %v5850_v9 = vpop.f32.mrb[15].mxu1 }
 0x282   : > { %6124 = vmatpush3.bf16.msra.mxu0 %v6123_v5  ;;  %6130 = vmatpush3.bf16.msra.mxu1 %v6129_v58 }
 0x283   : > { %5910 = vmatprep.subr.mxu0 %v10366_v43  ;;  %5952 = vmatprep.subr.mxu1 %v10366_v43 }
 0x286   : > { %v2263_v27 = vpop.f32.mrb[16].mxu0  ;;  %v2441_v31 = vpop.f32.mrb[16].mxu1 }
 0x287   : > { %v5827_v12 = vpop.f32.mrb[17].mxu0  ;;  %v5853_v26 = vpop.f32.mrb[17].mxu1  ;;  %5911 = vmatpush3.msk.msra.mxu0 %vm2817_vm2, %v2263_v27  ;;  %5953 = vmatpush3.msk.msra.mxu1 %vm2817_vm2, %v2441_v31 }
 0x288   : > { %5913 = vmatmul.mubr.msk.f32.vlgmr.msra.gmra.mrb[24].mxu0 %vm2801_vm9, %v8193_v51  ;;  %6125 = vmatprep.subr.bf16.mxu0 %v10367_v63 }
 0x289   : > { %5955 = vmatmul.mubr.msk.f32.vlgmr.msra.gmra.mrb[24].mxu1 %vm2801_vm9, %v8193_v51  ;;  %6131 = vmatprep.subr.bf16.mxu1 %v10367_v63 }
 0x28a   : > { %6127 = vmatpush3.bf16.msra.mxu0 %v6126_v23  ;;  %6133 = vmatpush3.bf16.msra.mxu1 %v6132_v15  ;;  %v8414_v23 = vstv %s5433_s25  ;;  %v8416_v15 = vstv %s5434_s1  ;;  %s8714_s25 = sld [smem:[#allocation16 + $0x86]]  ;;  %s8729_s1 = sld [smem:[#allocation16 + $0x107]] }
 0x28b   : > { %5915 = vmatprep.mubr.msk.f32.mxu0 %vm6756_vm1, %v10366_v43  ;;  %5957 = vmatprep.mubr.msk.f32.mxu1 %vm6756_vm1, %v10366_v43 }
 0x28c   : > { %5916 = vmatmul.mubr.msk.f32.gmra.mrb[26].mxu0 %vm2801_vm9, %v8206_v45  ;;  %5931 = vmatprep.subr.mxu0 %v10366_v43 }
 0x28d   : > { %5958 = vmatmul.mubr.msk.f32.gmra.mrb[26].mxu1 %vm2801_vm9, %v8206_v45  ;;  %5973 = vmatprep.subr.mxu1 %v10366_v43 }
 0x28e   : > { %5932 = vmatpush3.msk.msra.mxu0 %vm2817_vm2, %v1337_v48  ;;  %5974 = vmatpush3.msk.msra.mxu1 %vm2817_vm2, %v1515_v53  ;;  %v8424_v53 = vstv %s5436_s22  ;;  %s8760_s22 = sld [smem:[#allocation16 + $0x188]] }
 0x28f   : > { %5918 = vmatprep.mubr.msk.f32.mxu0 %vm6756_vm1, %v10366_v43  ;;  %5960 = vmatprep.mubr.msk.f32.mxu1 %vm6756_vm1, %v10366_v43 }
 0x290   : > { %5919 = vmatmul.mubr.msk.f32.gmra.mrb[28].mxu0 %vm2801_vm9, %v8221_v32  ;;  %6134 = vmatprep.subr.bf16.mxu0 %v10367_v63 }
 0x291   : > { %5961 = vmatmul.mubr.msk.f32.gmra.mrb[28].mxu1 %vm2801_vm9, %v8221_v32  ;;  %5921 = vmatprep.mubr.msk.f32.mxu0 %vm6756_vm1, %v10366_v43 }
 0x292   : > { %5963 = vmatprep.mubr.msk.f32.mxu1 %vm6756_vm1, %v10366_v43  ;;  %6140 = vmatprep.subr.bf16.mxu1 %v10367_v63 }
 0x294   : > { %5922 = vmatmul.mubr.msk.f32.gmra.mrb[30].mxu0 %vm2801_vm9, %v8239_v33 }
 0x295   : > { %5964 = vmatmul.mubr.msk.f32.gmra.mrb[30].mxu1 %vm2801_vm9, %v8239_v33  ;;  %5924 = vmatprep.mubr.msk.f32.mxu0 %vm6756_vm1, %v10366_v43 }
 0x296   : > { %5966 = vmatprep.mubr.msk.f32.mxu1 %vm6756_vm1, %v10366_v43  ;;  %v2609_v28 = vpop.f32.mrb[18].mxu0  ;;  %v2787_v1 = vpop.f32.mrb[18].mxu1 }
 0x297   : > { %v5873_v22 = vpop.f32.mrb[19].mxu0  ;;  %v5899_v17 = vpop.f32.mrb[19].mxu1 }
 0x298   : > { %5925 = vmatmul.mubr.msk.f32.gmra.mrb[32].mxu0 %vm2801_vm9, %v8253_v59 }
 0x299   : > { %5967 = vmatmul.mubr.msk.f32.gmra.mrb[32].mxu1 %vm2801_vm9, %v8253_v59  ;;  %5933 = vmatprep.mubr.msk.f32.mxu0 %vm6756_vm1, %v10366_v43 }
 0x29a   : > { %5975 = vmatprep.mubr.msk.f32.mxu1 %vm6756_vm1, %v10366_v43  ;;  %v2614_v21 = vpop.f32.mrb[20].mxu0  ;;  %v2792_v25 = vpop.f32.mrb[20].mxu1 }
 0x29b   : > { %v6135_v4 = vpack.c.bf16 %v2614_v21, %v2609_v28  ;;  %v6141_v34 = vpack.c.bf16 %v2792_v25, %v2787_v1  ;;  %v5876_v6 = vpop.f32.mrb[21].mxu0  ;;  %v5902_v30 = vpop.f32.mrb[21].mxu1 }
 0x29c   : > { %5934 = vmatmul.mubr.msk.f32.vlgmr.msra.gmra.mrb[24].mxu0 %vm2801_vm9, %v8266_v18 }
 0x29d   : > { %5976 = vmatmul.mubr.msk.f32.vlgmr.msra.gmra.mrb[24].mxu1 %vm2801_vm9, %v8266_v18  ;;  %5936 = vmatprep.mubr.msk.f32.mxu0 %vm6756_vm1, %v10366_v43 }
 0x29e   : > { %5978 = vmatprep.mubr.msk.f32.mxu1 %vm6756_vm1, %v10366_v43  ;;  %6136 = vmatpush3.bf16.msra.mxu0 %v6135_v4  ;;  %v2619_v39 = vpop.f32.mrb[22].mxu0  ;;  %v2797_v55 = vpop.f32.mrb[22].mxu1 }
 0x29f   : > { %6142 = vmatpush3.bf16.msra.mxu1 %v6141_v34  ;;  %5994 = vmatprep.subr.mxu0 %v10366_v43  ;;  %v5879_v24 = vpop.f32.mrb[23].mxu0  ;;  %v5905_v41 = vpop.f32.mrb[23].mxu1 }
 0x2a0   : > { %5937 = vmatmul.mubr.msk.f32.gmra.mrb[26].mxu0 %vm2801_vm9, %v8279_v61  ;;  %6036 = vmatprep.subr.mxu1 %v10366_v43 }
 0x2a1   : > { %5979 = vmatmul.mubr.msk.f32.gmra.mrb[26].mxu1 %vm2801_vm9, %v8279_v61  ;;  %5939 = vmatprep.mubr.msk.f32.mxu0 %vm6756_vm1, %v10366_v43 }
 0x2a2   : > { %5981 = vmatprep.mubr.msk.f32.mxu1 %vm6756_vm1, %v10366_v43  ;;  %5995 = vmatpush3.msk.msra.mxu0 %vm2817_vm2, %v2619_v39 }
 0x2a3   : > { %6037 = vmatpush3.msk.msra.mxu1 %vm2817_vm2, %v2797_v55  ;;  %6137 = vmatprep.subr.bf16.mxu0 %v10367_v63 }
 0x2a4   : > { %5940 = vmatmul.mubr.msk.f32.gmra.mrb[28].mxu0 %vm2801_vm9, %v933_v36  ;;  %6143 = vmatprep.subr.bf16.mxu1 %v10367_v63  ;;  %v935_v63 = vld [vmem:[%s10369_s8 + $0x20] sm:$0x3] }
 0x2a5   : > { %5982 = vmatmul.mubr.msk.f32.gmra.mrb[28].mxu1 %vm2801_vm9, %v933_v36  ;;  %5942 = vmatprep.mubr.msk.f32.mxu0 %vm6756_vm1, %v10366_v43 }
 0x2a6   : > { %5984 = vmatprep.mubr.msk.f32.mxu1 %vm6756_vm1, %v10366_v43 }
 0x2a8   : > { %5943 = vmatmul.mubr.msk.f32.gmra.mrb[30].mxu0 %vm2801_vm9, %v934_v7 }
 0x2a9   : > { %5985 = vmatmul.mubr.msk.f32.gmra.mrb[30].mxu1 %vm2801_vm9, %v934_v7  ;;  %5945 = vmatprep.mubr.msk.f32.mxu0 %vm6756_vm1, %v10366_v43 }
 0x2aa   : > { %5987 = vmatprep.mubr.msk.f32.mxu1 %vm6756_vm1, %v10366_v43 }
 0x2ac   : > { %5946 = vmatmul.mubr.msk.f32.gmra.mrb[32].mxu0 %vm2801_vm9, %v935_v63 }
 0x2ad   : > { %5988 = vmatmul.mubr.msk.f32.gmra.mrb[32].mxu1 %vm2801_vm9, %v935_v63  ;;  %5996 = vmatprep.mubr.msk.f32.mxu0 %vm6756_vm1, %v10366_v43 }
 0x2ae   : > { %6038 = vmatprep.mubr.msk.f32.mxu1 %vm6756_vm1, %v10366_v43 }
 0x2b0   : > { %5997 = vmatmul.mubr.msk.f32.vlgmr.msra.gmra.mrb[34].mxu0 %vm2801_vm9, %v8193_v51 }
 0x2b1   : > { %6139 = vmatpush3.bf16.msra.mxu0 %v6138_v49  ;;  %6039 = vmatmul.mubr.msk.f32.vlgmr.msra.gmra.mrb[34].mxu1 %vm2801_vm9, %v8193_v51 }
 0x2b2   : > { %6145 = vmatpush3.bf16.msra.mxu1 %v6144_v8  ;;  %6015 = vmatprep.subr.mxu0 %v10366_v43 }
 0x2b3   : > { %6057 = vmatprep.subr.mxu1 %v10366_v43  ;;  %5999 = vmatprep.mubr.msk.f32.mxu0 %vm6756_vm1, %v10366_v43 }
 0x2b4   : > { %6000 = vmatmul.mubr.msk.f32.gmra.mrb[36].mxu0 %vm2801_vm9, %v8206_v45  ;;  %6041 = vmatprep.mubr.msk.f32.mxu1 %vm6756_vm1, %v10366_v43 }
 0x2b5   : > { %6016 = vmatpush3.msk.msra.mxu0 %vm2817_vm2, %v8184_v50  ;;  %6002 = vmatprep.mubr.msk.f32.mxu0 %vm6756_vm1, %v10366_v43 }
 0x2b6   : > { %6058 = vmatpush3.msk.msra.mxu1 %vm2817_vm2, %v8186_v20 }
 0x2b7   : > { %6042 = vmatmul.mubr.msk.f32.gmra.mrb[36].mxu1 %vm2801_vm9, %v8206_v45 }
 0x2b8   : > { %6003 = vmatmul.mubr.msk.f32.gmra.mrb[38].mxu0 %vm2801_vm9, %v8221_v32  ;;  %6044 = vmatprep.mubr.msk.f32.mxu1 %vm6756_vm1, %v10366_v43 }
 0x2b9   : > { %6005 = vmatprep.mubr.msk.f32.mxu0 %vm6756_vm1, %v10366_v43 }
 0x2bb   : > { %6045 = vmatmul.mubr.msk.f32.gmra.mrb[38].mxu1 %vm2801_vm9, %v8221_v32 }
 0x2bc   : > { %6006 = vmatmul.mubr.msk.f32.gmra.mrb[40].mxu0 %vm2801_vm9, %v8239_v33  ;;  %6047 = vmatprep.mubr.msk.f32.mxu1 %vm6756_vm1, %v10366_v43 }
 0x2bd   : > { %6008 = vmatprep.mubr.msk.f32.mxu0 %vm6756_vm1, %v10366_v43 }
 0x2bf   : > { %6048 = vmatmul.mubr.msk.f32.gmra.mrb[40].mxu1 %vm2801_vm9, %v8239_v33 }
 0x2c0   : > { %6009 = vmatmul.mubr.msk.f32.gmra.mrb[42].mxu0 %vm2801_vm9, %v8253_v59  ;;  %6050 = vmatprep.mubr.msk.f32.mxu1 %vm6756_vm1, %v10366_v43 }
 0x2c1   : > { %6017 = vmatprep.mubr.msk.f32.mxu0 %vm6756_vm1, %v10366_v43 }
 0x2c3   : > { %6051 = vmatmul.mubr.msk.f32.gmra.mrb[42].mxu1 %vm2801_vm9, %v8253_v59 }
 0x2c4   : > { %6018 = vmatmul.mubr.msk.f32.vlgmr.msra.gmra.mrb[34].mxu0 %vm2801_vm9, %v8266_v18  ;;  %6059 = vmatprep.mubr.msk.f32.mxu1 %vm6756_vm1, %v10366_v43 }
 0x2c5   : > { %6020 = vmatprep.mubr.msk.f32.mxu0 %vm6756_vm1, %v10366_v43 }
 0x2c7   : > { %6060 = vmatmul.mubr.msk.f32.vlgmr.msra.gmra.mrb[34].mxu1 %vm2801_vm9, %v8266_v18 }
 0x2c8   : > { %6021 = vmatmul.mubr.msk.f32.gmra.mrb[36].mxu0 %vm2801_vm9, %v8279_v61  ;;  %6062 = vmatprep.mubr.msk.f32.mxu1 %vm6756_vm1, %v10366_v43 }
 0x2c9   : > { %6023 = vmatprep.mubr.msk.f32.mxu0 %vm6756_vm1, %v10366_v43 }
 0x2cb   : > { %6063 = vmatmul.mubr.msk.f32.gmra.mrb[36].mxu1 %vm2801_vm9, %v8279_v61 }
 0x2cc   : > { %6024 = vmatmul.mubr.msk.f32.gmra.mrb[38].mxu0 %vm2801_vm9, %v933_v36  ;;  %6065 = vmatprep.mubr.msk.f32.mxu1 %vm6756_vm1, %v10366_v43 }
 0x2cd   : > { %6026 = vmatprep.mubr.msk.f32.mxu0 %vm6756_vm1, %v10366_v43 }
 0x2cf   : > { %6066 = vmatmul.mubr.msk.f32.gmra.mrb[38].mxu1 %vm2801_vm9, %v933_v36 }
 0x2d0   : > { %6027 = vmatmul.mubr.msk.f32.gmra.mrb[40].mxu0 %vm2801_vm9, %v934_v7  ;;  %6068 = vmatprep.mubr.msk.f32.mxu1 %vm6756_vm1, %v10366_v43 }
 0x2d1   : > { %6029 = vmatprep.mubr.msk.f32.mxu0 %vm6756_vm1, %v10366_v43 }
 0x2d3   : > { %6069 = vmatmul.mubr.msk.f32.gmra.mrb[40].mxu1 %vm2801_vm9, %v934_v7 }
 0x2d4   : > { %6030 = vmatmul.mubr.msk.f32.gmra.mrb[42].mxu0 %vm2801_vm9, %v935_v63  ;;  %6071 = vmatprep.mubr.msk.f32.mxu1 %vm6756_vm1, %v10366_v43  ;;  %v8412_v43 = vstv %s5409_s6  ;;  %vm3089_vm1 = vcmask 1046528   ;;  %s8742_s6 = sld [smem:[#allocation16 + $0x184]] }
 0x2d7   : > { %6072 = vmatmul.mubr.msk.f32.gmra.mrb[42].mxu1 %vm2801_vm9, %v935_v63 }
 0x36f   : > { %v8422_v48 = vpop.f32.mrb[24].mxu0 }
 0x370   : > { %10370 = vst [vmem:[#allocation44_spill] sm:$0xff] %v8422_v48  ;;  %v8430_v19 = vpop.f32.mrb[24].mxu1  ;;  %v5935_v42 = vpop.f32.mrb[25].mxu0  ;;  %v3027_v44 = vmul.f32 %v8406_v13, %v8422_v48  ;;  %v3109_v47 = vmul.f32 %v8410_v38, %v8422_v48  ;;  %v3146_v35 = vmul.f32 %v8412_v43, %v8422_v48  ;;  %v3053_v49 = vmul.f32 %v8408_v2, %v8422_v48 }
 0x371   : > { %v5977_v56 = vpop.f32.mrb[25].mxu1  ;;  %v3213_v8 = vmul.f32 %v8418_v0, %v8422_v48  ;;  %v3250_v3 = vmul.f32 %v8420_v46, %v8422_v48  ;;  %v3533_v50 = vmul.f32 %v8414_v23, %v8430_v19  ;;  %v8451_v20 = vmul.f32 %v8416_v15, %v8430_v19 }
 0x372   : > { %3035 = vrot.lane.b32.xlu0 %v3027_v44, %s6758_s26  ;;  %v3119_v10 = vrot.slane %v3109_v47, 1  ;;  %v3156_v37 = vrot.slane %v3146_v35, 1  ;;  %v3614_v16 = vmul.f32 %v8424_v53, %v8430_v19  ;;  %v3651_v62 = vmul.f32 %v8426_v57, %v8430_v19 }
 0x373   : > { %v8453_v11 = vpop.f32.mrb[26].mxu0  ;;  %v3223_v52 = vrot.slane %v3213_v8, 2  ;;  %v3260_v14 = vrot.slane %v3250_v3, 2  ;;  %v8469_v51 = vmul.f32 %v8428_v54, %v8430_v19  ;;  %v8479_v45 = vmul.f32 %v8444_v40, %v8430_v19 }
 0x374   : > { %10371 = vst [vmem:[#allocation45_spill] sm:$0xff] %v8453_v11  ;;  %v8459_v29 = vpop.f32.mrb[26].mxu1  ;;  %v5938_v5 = vpop.f32.mrb[27].mxu0  ;;  %v3054_v58 = vmul.f32 %v8408_v2, %v8453_v11  ;;  %v3110_v60 = vmul.f32 %v8410_v38, %v8453_v11  ;;  %v3147_v9 = vmul.f32 %v8412_v43, %v8453_v11  ;;  %v3214_v12 = vmul.f32 %v8418_v0, %v8453_v11 }
 0x375   : > { %v5980_v27 = vpop.f32.mrb[27].mxu1  ;;  %v3534_v31 = vmul.f32 %v8414_v23, %v8459_v29  ;;  %v3251_v26 = vmul.f32 %v8420_v46, %v8453_v11  ;;  %v3560_v32 = vmul.f32 %v8416_v15, %v8459_v29  ;;  %v3615_v28 = vmul.f32 %v8424_v53, %v8459_v29 }
 0x376   : > { %3061 = vrot.lane.b32.xlu0 %v3053_v49, %s10277_s11  ;;  %3063 = vrot.lane.b32.xlu1 %v3054_v58, %s10277_s11  ;;  %v3120_v33 = vrot.slane %v3110_v60, 1  ;;  %v3157_v59 = vrot.slane %v3147_v9, 1  ;;  %v3224_v22 = vrot.slane %v3214_v12, 2  ;;  %v3624_v18 = vrot.slane %v3614_v16, 1 }
 0x377   : > { %v8487_v1 = vpop.f32.mrb[28].mxu0  ;;  %v3261_v17 = vrot.slane %v3251_v26, 2  ;;  %v3652_v21 = vmul.f32 %v8426_v57, %v8459_v29  ;;  %v3661_v61 = vrot.slane %v3651_v62, 1  ;;  %v3625_v42 = vrot.slane %v3615_v28, 1 }
 0x378   : > { %10372 = vst [vmem:[#allocation46_spill] sm:$0xff] %v8487_v1  ;;  %v8491_v25 = vpop.f32.mrb[28].mxu1  ;;  %v5941_v4 = vpop.f32.mrb[29].mxu0  ;;  %v8494_v34 = vsel %vm3089_vm1, %v3119_v10, %v3120_v33  ;;  %v8498_v6 = vmul.f32 %v8410_v38, %v8487_v1  ;;  %v8501_v30 = vsel %vm3089_vm1, %v3156_v37, %v3157_v59  ;;  %v8505_v55 = vmul.f32 %v8412_v43, %v8487_v1 }
 0x379   : > { %10373 = vst [vmem:[#allocation47_spill] sm:$0xff] %v8491_v25  ;;  %v5983_v39 = vpop.f32.mrb[29].mxu1  ;;  %v8508_v24 = vsel %vm3193_vm10, %v3223_v52, %v3224_v22  ;;  %v8512_v41 = vmul.f32 %v8418_v0, %v8487_v1  ;;  %v8515_v36 = vsel %vm3193_vm10, %v3260_v14, %v3261_v17  ;;  %v8522_v63 = vmul.f32 %v8420_v46, %v8487_v1 }
 0x37a   : > { %3541 = vrot.lane.b32.xlu0 %v3533_v50, %s6758_s26  ;;  %3543 = vrot.lane.b32.xlu1 %v3534_v31, %s6758_s26  ;;  %v3122_v7 = vrot.slane %v8498_v6, 1  ;;  %v8526_v44 = vmul.f32 %v8424_v53, %v8491_v25  ;;  %v3159_v35 = vrot.slane %v8505_v55, 1  ;;  %v3662_v49 = vrot.slane %v3652_v21, 1 }
 0x37b   : > { %v8528_v47 = vpop.f32.mrb[30].mxu0  ;;  %v3226_v56 = vrot.slane %v8512_v41, 2  ;;  %v8534_v8 = vmul.f32 %v8426_v57, %v8491_v25  ;;  %v3263_v37 = vrot.slane %v8522_v63, 2  ;;  %v8543_v52 = vsel %vm3089_vm1, %v3624_v18, %v3625_v42 }
 0x37c   : > { %v8536_v3 = vpop.f32.mrb[30].mxu1  ;;  %v5944_v50 = vpop.f32.mrb[31].mxu0  ;;  %v3123_v10 = vsel %vm3089_vm1, %v3120_v33, %v3122_v7  ;;  %v3627_v14 = vrot.slane %v8526_v44, 1  ;;  %v3160_v62 = vsel %vm3089_vm1, %v3157_v59, %v3159_v35  ;;  %v8555_v58 = vsel %vm3089_vm1, %v3661_v61, %v3662_v49 }
 0x37d   : > { %v5986_v16 = vpop.f32.mrb[31].mxu1  ;;  %v8552_v5 = vsel %vm3193_vm10, %v3224_v22, %v3226_v56  ;;  %v3664_v60 = vrot.slane %v8534_v8, 1  ;;  %v8562_v9 = vsel %vm3193_vm10, %v3261_v17, %v3263_v37  ;;  %v3718_v31 = vmul.f32 %v8428_v54, %v8459_v29 }
 0x37e   : > { %3567 = vrot.lane.b32.xlu0 %v8451_v20, %s10277_s11  ;;  %3569 = vrot.lane.b32.xlu1 %v3560_v32, %s10277_s11  ;;  %v8567_v27 = vsel %vm3089_vm1, %v3625_v42, %v3627_v14  ;;  %v3028_v26 = vmul.f32 %v8406_v13, %v8453_v11  ;;  %v8582_v32 = vmul.f32 %v8428_v54, %v8491_v25  ;;  %v3727_v17 = vrot.slane %v8469_v51, 2 }
 0x37f   : > { %v8571_v12 = vpop.f32.mrb[32].mxu0  ;;  %v8578_v20 = vsel %vm3089_vm1, %v3662_v49, %v3664_v60  ;;  %v3755_v33 = vmul.f32 %v8444_v40, %v8459_v29  ;;  %v3029_v22 = vmul.f32 %v8406_v13, %v8487_v1  ;;  %v3728_v18 = vrot.slane %v3718_v31, 2 }
 0x380   : > { %v8586_v59 = vpop.f32.mrb[32].mxu1  ;;  %v5947_v28 = vpop.f32.mrb[33].mxu0  ;;  %v8593_v21 = vmul.f32 %v8444_v40, %v8491_v25  ;;  %v3730_v61 = vrot.slane %v8582_v32, 2  ;;  %v3764_v39 = vrot.slane %v8479_v45, 2  ;;  %v3112_v45 = vmul.f32 %v8410_v38, %v8528_v47 }
 0x381   : > { %v5989_v4 = vpop.f32.mrb[33].mxu1  ;;  %v3765_v63 = vrot.slane %v3755_v33, 2  ;;  %v8600_v42 = vsel %vm3193_vm10, %v3727_v17, %v3728_v18  ;;  %v3149_v31 = vmul.f32 %v8412_v43, %v8528_v47  ;;  %v3216_v33 = vmul.f32 %v8418_v0, %v8528_v47 }
 0x382   : > { %3037 = vrot.lane.b32.xlu0 %v3028_v26, %s6758_s26  ;;  %3039 = vrot.lane.b32.xlu1 %v3029_v22, %s6758_s26  ;;  %v10256_v51 = vrot.slane %v8593_v21, 2  ;;  %v8608_v49 = vsel %vm3193_vm10, %v3728_v18, %v3730_v61  ;;  %v3113_v26 = vmul.f32 %v8410_v38, %v8571_v12  ;;  %v3124_v28 = vrot.slane %v3112_v45, 1 }
 0x383   : > { %v8611_v50 = vsel %vm3193_vm10, %v3764_v39, %v3765_v63  ;;  %v3150_v22 = vmul.f32 %v8412_v43, %v8571_v12  ;;  %v3253_v17 = vmul.f32 %v8420_v46, %v8528_v47  ;;  %v3217_v18 = vmul.f32 %v8418_v0, %v8571_v12 }
 0x384   : > { %v8618_v16 = vsel %vm3193_vm10, %v3765_v63, %v10256_v51  ;;  %v3161_v4 = vrot.slane %v3149_v31, 1  ;;  %v3126_v38 = vrot.slane %v3113_v26, 1  ;;  %v3228_v39 = vrot.slane %v3216_v33, 2 }
 0x385   : > { %v3617_v63 = vmul.f32 %v8424_v53, %v8536_v3  ;;  %v8640_v43 = vsel %vm3089_vm1, %v3122_v7, %v3124_v28  ;;  %v3163_v45 = vrot.slane %v3150_v22, 1  ;;  %v3265_v51 = vrot.slane %v3253_v17, 2 }
 0x386   : > { %3128 = vrot.lane.b32.xlu0 %v8494_v34, %s6758_s26  ;;  %3130 = vrot.lane.b32.xlu1 %v3123_v10, %s6758_s26  ;;  %v3230_v0 = vrot.slane %v3217_v18, 2  ;;  %v8647_v34 = vsel %vm3089_vm1, %v3159_v35, %v3161_v4  ;;  %v8650_v10 = vsel %vm3089_vm1, %v3124_v28, %v3126_v38  ;;  %v8655_v6 = vsel %vm3193_vm10, %v3226_v56, %v3228_v39 }
 0x387   : > { %v3629_v7 = vrot.slane %v3617_v63, 1  ;;  %v8658_v31 = vsel %vm3089_vm1, %v3161_v4, %v3163_v45  ;;  %v8661_v26 = vsel %vm3193_vm10, %v3263_v37, %v3265_v51  ;;  %v3254_v35 = vmul.f32 %v8420_v46, %v8571_v12 }
 0x388   : > { %v8664_v55 = vsel %vm3193_vm10, %v3228_v39, %v3230_v0  ;;  %v3654_v56 = vmul.f32 %v8426_v57, %v8536_v3  ;;  %v3618_v37 = vmul.f32 %v8424_v53, %v8586_v59  ;;  %v8681_v33 = vstv %s8603_s29  ;;  %s9173_s29 = sld [smem:[#allocation16 + $0x106]] }
 0x389   : > { %v8674_v41 = vsel %vm3089_vm1, %v3627_v14, %v3629_v7  ;;  %v3267_v28 = vrot.slane %v3254_v35, 2  ;;  %v3720_v46 = vmul.f32 %v8428_v54, %v8536_v3  ;;  %v3757_v44 = vmul.f32 %v8444_v40, %v8536_v3 }
 0x38a   : > { %3165 = vrot.lane.b32.xlu0 %v8501_v30, %s10277_s11  ;;  %3167 = vrot.lane.b32.xlu1 %v3160_v62, %s10277_s11  ;;  %10374 = vst [vmem:[#allocation48_spill] sm:$0xff] %v8674_v41  ;;  %v3655_v30 = vmul.f32 %v8426_v57, %v8586_v59  ;;  %v3666_v14 = vrot.slane %v3654_v56, 1  ;;  %v3631_v62 = vrot.slane %v3618_v37, 1  ;;  %v3721_v22 = vmul.f32 %v8428_v54, %v8586_v59 }
 0x38b   : > { %v3758_v53 = vmul.f32 %v8444_v40, %v8586_v59  ;;  %v8696_v17 = vsel %vm3193_vm10, %v3265_v51, %v3267_v28  ;;  %v3732_v18 = vrot.slane %v3720_v46, 2  ;;  %v3769_v57 = vrot.slane %v3757_v44, 2 }
 0x38c   : > { %10375 = vst [vmem:[#allocation49_spill] sm:$0xff] %v8696_v17  ;;  %v3668_v4 = vrot.slane %v3655_v30, 1  ;;  %v8707_v54 = vsel %vm3089_vm1, %v3664_v60, %v3666_v14  ;;  %v8710_v40 = vsel %vm3089_vm1, %v3629_v7, %v3631_v62  ;;  %v3734_v51 = vrot.slane %v3721_v22, 2 }
 0x38d   : > { %10376 = vst [vmem:[#allocation50_spill] sm:$0xff] %v8707_v54  ;;  %10377 = vst [vmem:[#allocation51_spill] sm:$0xff] %v8710_v40  ;;  %v3771_v38 = vrot.slane %v3758_v53, 2  ;;  %v10380_v8 = vrot.slane %v8593_v21, 2  ;;  %v8734_v39 = vstv %s8642_s3  ;;  %v3079_v21 = vmul.f32 %v8681_v33, %v8422_v48  ;;  %s9179_s3 = sld [smem:[#allocation16 + $0x102]] }
 0x38e   : > { %3232 = vrot.lane.b32.xlu0 %v8508_v24, %s6758_s26  ;;  %3234 = vrot.lane.b32.xlu1 %v8552_v5, %s6758_s26  ;;  %v8719_v24 = vsel %vm3193_vm10, %v3730_v61, %v3732_v18  ;;  %v8722_v5 = vsel %vm3089_vm1, %v3666_v14, %v3668_v4  ;;  %v8737_v63 = vsel %vm3193_vm10, %v3732_v18, %v3734_v51  ;;  %v8772_v46 = vstv %s8693_s16  ;;  %s9191_s16 = sld [smem:[#allocation16 + $0x186]] }
 0x38f   : > { %10378 = vst [vmem:[#allocation52_spill] sm:$0xff] %v8719_v24  ;;  %10379 = vst [vmem:[#allocation53_spill] sm:$0xff] %v8722_v5  ;;  %v8727_v60 = vsel %vm3193_vm10, %v10380_v8, %v3769_v57  ;;  %v8740_v32 = vsel %vm3193_vm10, %v3769_v57, %v3771_v38  ;;  %v3080_v61 = vmul.f32 %v8681_v33, %v8453_v11  ;;  %v3090_v35 = vrot.slane %v3079_v21, 1 }
 0x390   : > { %10381 = vst [vmem:[#allocation54_spill] sm:$0xff] %v8727_v60  ;;  %10382 = vst [vmem:[#allocation55_spill] sm:$0xff] %v8737_v63  ;;  %v8758_v45 = vmul.f32 %v8681_v33, %v8487_v1  ;;  %v3183_v0 = vmul.f32 %v8734_v39, %v8422_v48  ;;  %v3184_v7 = vmul.f32 %v8734_v39, %v8453_v11  ;;  %v8775_v30 = vstv %s8698_s28  ;;  %s9288_s28 = sld [smem:[#allocation16 + $0x181]] }
 0x391   : > { %10383 = vst [vmem:[#allocation56_spill] sm:$0xff] %v8740_v32  ;;  %v3091_v56 = vrot.slane %v3080_v61, 1  ;;  %v8794_v53 = vstv %s8712_s21  ;;  %v8799_v4 = vstv %s8729_s1  ;;  %v8802_v57 = vstv %s8731_s24  ;;  %s5494_s21 = sld [smem:[#allocation16 + $0x182]]  ;;  %s5432_s1 = sld [smem:[#allocation16 + $0x80]] }
 0x392   : > { %3269 = vrot.lane.b32.xlu0 %v8515_v36, %s10277_s11  ;;  %3271 = vrot.lane.b32.xlu1 %v8562_v9, %s10277_s11  ;;  %v8768_v36 = vmul.f32 %v8734_v39, %v8487_v1  ;;  %v10258_v9 = vrot.slane %v8758_v45, 1  ;;  %v3194_v37 = vrot.slane %v3183_v0, 2  ;;  %v3195_v28 = vrot.slane %v3184_v7, 2  ;;  %s9428_s24 = sld [smem:[#allocation18]] }
 0x393   : > { %v8778_v44 = vsel %vm3089_vm1, %v3090_v35, %v3091_v56  ;;  %v8817_v21 = vstv %s8742_s6  ;;  %v8820_v61 = vstv %s8744_s27  ;;  %v8824_v0 = vmul.f32 %v8408_v2, %v8487_v1  ;;  %s9430_s6 = sld [smem:[#allocation20]] }
 0x394   : > { %10384 = vst [vmem:[#allocation57_spill] sm:$0xff] %v8778_v44  ;;  %v10257_v14 = vrot.slane %v8768_v36, 2  ;;  %v8788_v62 = vsel %vm3089_vm1, %v3091_v56, %v10258_v9  ;;  %v8791_v22 = vsel %vm3193_vm10, %v3194_v37, %v3195_v28  ;;  %v8828_v7 = vmul.f32 %v8406_v13, %v8528_v47  ;;  %s9432_s27 = sld [smem:[#allocation20 + $0x80]] }
 0x395   : > { %10385 = vst [vmem:[#allocation58_spill] sm:$0xff] %v8788_v62  ;;  %10386 = vst [vmem:[#allocation59_spill] sm:$0xff] %v8791_v22  ;;  %v8831_v35 = vstv %s8750_s17  ;;  %v8835_v56 = vmul.f32 %v8794_v53, %v8459_v29  ;;  %v8843_v37 = vmul.f32 %v8414_v23, %v8491_v25  ;;  %v8847_v13 = vmul.f32 %v8408_v2, %v8528_v47  ;;  %s9434_s17 = sld [smem:[#allocation20 + $0x100]] }
 0x396   : > { %3633 = vrot.lane.b32.xlu0 %v8543_v52, %s6758_s26  ;;  %3635 = vrot.lane.b32.xlu1 %v8567_v27, %s6758_s26  ;;  %v8807_v52 = vsel %vm3193_vm10, %v3195_v28, %v10257_v14  ;;  %v8810_v27 = vstv %s8714_s25  ;;  %v8856_v14 = vmul.f32 %v8794_v53, %v8430_v19  ;;  %v8877_v60 = vmul.f32 %v8794_v53, %v8491_v25  ;;  %s3019_s25 = sld [smem:[#allocation16]] }
 0x397   : > { %v8796_v18 = vpop.f32.mrb[34].mxu0  ;;  %10388 = vst [vmem:[#allocation61_spill] sm:$0xff] %v8807_v52 }
 0x398   : > { %10387 = vst [vmem:[#allocation60_spill] sm:$0xff] %v8796_v18  ;;  %v6019_v51 = vpop.f32.mrb[35].mxu0  ;;  %v4150_v38 = vmul.f32 %v8772_v46, %v8796_v18  ;;  %v4187_v8 = vmul.f32 %v8775_v30, %v8796_v18  ;;  %v4253_v2 = vmul.f32 %v8799_v4, %v8796_v18  ;;  %v4290_v22 = vmul.f32 %v8802_v57, %v8796_v18 }
 0x399   : > { %v8852_v51 = vstv %s8760_s22  ;;  %s9436_s22 = sld [smem:[#allocation20 + $0x180]] }
 0x39a   : > { %3670 = vrot.lane.b32.xlu0 %v8555_v58, %s10277_s11  ;;  %3672 = vrot.lane.b32.xlu1 %v8578_v20, %s10277_s11  ;;  %v8849_v28 = vpop.f32.mrb[34].mxu1  ;;  %v4160_v11 = vrot.slane %v4150_v38, 1  ;;  %v4197_v44 = vrot.slane %v4187_v8, 1  ;;  %v4263_v40 = vrot.slane %v4253_v2, 2 }
 0x39b   : > { %10389 = vst [vmem:[#allocation62_spill] sm:$0xff] %v8849_v28  ;;  %v8858_v58 = vpop.f32.mrb[36].mxu0  ;;  %v6061_v9 = vpop.f32.mrb[35].mxu1  ;;  %v4686_v20 = vmul.f32 %v8817_v21, %v8849_v28  ;;  %v4723_v52 = vmul.f32 %v8820_v61, %v8849_v28 }
 0x39c   : > { %10390 = vst [vmem:[#allocation63_spill] sm:$0xff] %v8858_v58  ;;  %v6022_v62 = vpop.f32.mrb[37].mxu0  ;;  %v4151_v1 = vmul.f32 %v8772_v46, %v8858_v58  ;;  %v4188_v9 = vmul.f32 %v8775_v30, %v8858_v58  ;;  %v4254_v32 = vmul.f32 %v8799_v4, %v8858_v58  ;;  %v8887_v5 = vmul.f32 %v8802_v57, %v8858_v58 }
 0x39d   : > { %v4696_v48 = vrot.slane %v4686_v20, 1  ;;  %v4733_v20 = vrot.slane %v4723_v52, 1 }
 0x39e   : > { %3736 = vrot.lane.b32.xlu0 %v8600_v42, %s6758_s26  ;;  %3738 = vrot.lane.b32.xlu1 %v8608_v49, %s6758_s26  ;;  %v8883_v62 = vpop.f32.mrb[36].mxu1  ;;  %v4161_v38 = vrot.slane %v4151_v1, 1  ;;  %v4198_v8 = vrot.slane %v4188_v9, 1  ;;  %v4300_v49 = vrot.slane %v4290_v22, 2  ;;  %v4264_v41 = vrot.slane %v4254_v32, 2 }
 0x39f   : > { %10391 = vst [vmem:[#allocation64_spill] sm:$0xff] %v8883_v62  ;;  %v8889_v63 = vpop.f32.mrb[38].mxu0  ;;  %v6064_v24 = vpop.f32.mrb[37].mxu1  ;;  %v4687_v18 = vmul.f32 %v8817_v21, %v8883_v62  ;;  %v4724_v42 = vmul.f32 %v8820_v61, %v8883_v62  ;;  %v4301_v22 = vrot.slane %v8887_v5, 2  ;;  %v4789_v32 = vmul.f32 %v8831_v35, %v8849_v28 }
 0x3a0   : > { %10392 = vst [vmem:[#allocation65_spill] sm:$0xff] %v8889_v63  ;;  %v6025_v54 = vpop.f32.mrb[39].mxu0  ;;  %v8896_v1 = vsel %vm3089_vm1, %v4160_v11, %v4161_v38  ;;  %v8899_v52 = vsel %vm3089_vm1, %v4197_v44, %v4198_v8  ;;  %v8903_v9 = vmul.f32 %v8772_v46, %v8889_v63  ;;  %v8907_v24 = vmul.f32 %v8775_v30, %v8889_v63 }
 0x3a1   : > { %10393 = vst [vmem:[#allocation66_spill] sm:$0xff] %v8896_v1  ;;  %10394 = vst [vmem:[#allocation67_spill] sm:$0xff] %v8899_v52  ;;  %v4697_v58 = vrot.slane %v4687_v18, 1  ;;  %v4734_v17 = vrot.slane %v4724_v42, 1  ;;  %v8920_v2 = vmul.f32 %v8799_v4, %v8889_v63  ;;  %v8937_v44 = vsel %vm3193_vm10, %v4263_v40, %v4264_v41 }
 0x3a2   : > { %3773 = vrot.lane.b32.xlu0 %v8611_v50, %s10277_s11  ;;  %3775 = vrot.lane.b32.xlu1 %v8618_v16, %s10277_s11  ;;  %v8914_v11 = vpop.f32.mrb[38].mxu1  ;;  %10399 = vst [vmem:[#allocation72_spill] sm:$0xff] %v8937_v44  ;;  %v10400_v52 = vrot.slane %v8903_v9, 1 }
 0x3a3   : > { %10395 = vst [vmem:[#allocation68_spill] sm:$0xff] %v8914_v11  ;;  %v8924_v5 = vpop.f32.mrb[40].mxu0  ;;  %v6067_v18 = vpop.f32.mrb[39].mxu1  ;;  %v8927_v50 = vsel %vm3089_vm1, %v4696_v48, %v4697_v58  ;;  %v8930_v16 = vsel %vm3089_vm1, %v4733_v20, %v4734_v17  ;;  %v8934_v42 = vmul.f32 %v8817_v21, %v8914_v11  ;;  %v8951_v20 = vmul.f32 %v8820_v61, %v8914_v11 }
 0x3a4   : > { %10396 = vst [vmem:[#allocation69_spill] sm:$0xff] %v8924_v5  ;;  %10397 = vst [vmem:[#allocation70_spill] sm:$0xff] %v8927_v50  ;;  %v6028_v54 = vpop.f32.mrb[41].mxu0  ;;  %v8942_v1 = vsel %vm3089_vm1, %v4161_v38, %v10400_v52  ;;  %v10402_v18 = vrot.slane %v8907_v24, 1  ;;  %v4790_v38 = vmul.f32 %v8831_v35, %v8883_v62  ;;  %v4799_v52 = vrot.slane %v4789_v32, 2 }
 0x3a5   : > { %10398 = vst [vmem:[#allocation71_spill] sm:$0xff] %v8930_v16  ;;  %10401 = vst [vmem:[#allocation73_spill] sm:$0xff] %v8942_v1  ;;  %v8954_v16 = vsel %vm3193_vm10, %v4300_v49, %v4301_v22  ;;  %v8969_v49 = vmul.f32 %v8802_v57, %v8889_v63  ;;  %v4826_v54 = vmul.f32 %v8852_v51, %v8849_v28 }
 0x3a6   : > { %v8947_v48 = vsel %vm3089_vm1, %v4198_v8, %v10402_v18  ;;  %10404 = vst [vmem:[#allocation75_spill] sm:$0xff] %v8954_v16  ;;  %3065 = vrot.lane.b32.xlu0 %v8824_v0, %s10277_s11  ;;  %3041 = vrot.lane.b32.xlu1 %v8828_v7, %s6758_s26  ;;  %v8964_v8 = vpop.f32.mrb[40].mxu1  ;;  %v4827_v32 = vmul.f32 %v8852_v51, %v8883_v62  ;;  %v10406_v16 = vrot.slane %v8934_v42, 1  ;;  %v10408_v18 = vrot.slane %v8920_v2, 2 }
 0x3a7   : > { %10403 = vst [vmem:[#allocation74_spill] sm:$0xff] %v8947_v48  ;;  %10405 = vst [vmem:[#allocation76_spill] sm:$0xff] %v8964_v8  ;;  %v8975_v40 = vpop.f32.mrb[42].mxu0  ;;  %v6070_v0 = vpop.f32.mrb[41].mxu1  ;;  %v4800_v48 = vrot.slane %v4790_v38, 2  ;;  %v8989_v50 = vmul.f32 %v8831_v35, %v8914_v11  ;;  %v10409_v62 = vrot.slane %v8951_v20, 1  ;;  %v9003_v38 = vmul.f32 %v8852_v51, %v8914_v11 }
 0x3a8   : > { %v8980_v7 = vsel %vm3089_vm1, %v4697_v58, %v10406_v16  ;;  %v8985_v44 = vsel %vm3193_vm10, %v4264_v41, %v10408_v18  ;;  %v6031_v1 = vpop.f32.mrb[43].mxu0  ;;  %v10273_v28 = vrot.slane %v8969_v49, 2  ;;  %v4836_v58 = vrot.slane %v4826_v54, 2 }
 0x3a9   : > { %10407 = vst [vmem:[#allocation77_spill] sm:$0xff] %v8980_v7  ;;  %v8994_v0 = vsel %vm3089_vm1, %v4734_v17, %v10409_v62  ;;  %v4837_v16 = vrot.slane %v4827_v32, 2  ;;  %v8998_v7 = vsel %vm3193_vm10, %v4799_v52, %v4800_v48  ;;  %v10270_v41 = vrot.slane %v8989_v50, 2 }
 0x3aa   : > { %v3595_v1 = vrot.slane %v8856_v14, 1  ;;  %3545 = vrot.lane.b32.xlu0 %v8843_v37, %s6758_s26  ;;  %3067 = vrot.lane.b32.xlu1 %v8847_v13, %s10277_s11  ;;  %v9010_v17 = vpop.f32.mrb[42].mxu1  ;;  %v9015_v62 = vsel %vm3193_vm10, %v4301_v22, %v10273_v28  ;;  %v10271_v52 = vrot.slane %v8877_v60, 1  ;;  %v10272_v37 = vrot.slane %v9003_v38, 2 }
 0x3ab   : > { %v9018_v54 = vsel %vm3193_vm10, %v4836_v58, %v4837_v16  ;;  %v6073_v18 = vpop.f32.mrb[43].mxu1  ;;  %v9024_v14 = vsel %vm3193_vm10, %v4800_v48, %v10270_v41  ;;  %v10410_v13 = vrot.slane %v8835_v56, 1  ;;  %v3688_v22 = vmul.f32 %v8810_v27, %v8430_v19 }
 0x3ac   : > { %v3561_v58 = vmul.f32 %v8416_v15, %v8491_v25  ;;  %v3536_v18 = vmul.f32 %v8414_v23, %v8536_v3  ;;  %v9056_v23 = vmul.f32 %v8810_v27, %v8491_v25  ;;  %v4153_v56 = vmul.f32 %v8772_v46, %v8924_v5 }
 0x3ad   : > { %v9030_v32 = vsel %vm3089_vm1, %v3595_v1, %v10410_v13  ;;  %v10411_v48 = vmov %v10410_v13  ;;  %v9048_v1 = vsel %vm3193_vm10, %v4837_v16, %v10272_v37  ;;  %v3689_v13 = vmul.f32 %v8810_v27, %v8459_v29 }
 0x3ae   : > { %v9043_v41 = vsel %vm3089_vm1, %v10411_v48, %v10271_v52  ;;  %10412 = vst [vmem:[#allocation78_spill] sm:$0xff] %v9048_v1  ;;  %3571 = vrot.lane.b32.xlu0 %v3561_v58, %s10277_s11  ;;  %3547 = vrot.lane.b32.xlu1 %v3536_v18, %s6758_s26  ;;  %v3698_v48 = vrot.slane %v3688_v22, 2  ;;  %v3562_v16 = vmul.f32 %v8416_v15, %v8536_v3  ;;  %v10274_v37 = vrot.slane %v9056_v23, 2 }
 0x3af   : > { %v3699_v52 = vrot.slane %v3689_v13, 2  ;;  %v4165_v28 = vrot.slane %v4153_v56, 1  ;;  %v10413_v22 = vrot.slane %v8903_v9, 1  ;;  %v4190_v18 = vmul.f32 %v8775_v30, %v8924_v5 }
 0x3b0   : > { %v4154_v13 = vmul.f32 %v8772_v46, %v8975_v40  ;;  %v4191_v56 = vmul.f32 %v8775_v30, %v8975_v40  ;;  %v4690_v9 = vmul.f32 %v8817_v21, %v9010_v17  ;;  %v10415_v46 = vrot.slane %v8907_v24, 1 }
 0x3b1   : > { %v9064_v1 = vsel %vm3193_vm10, %v3698_v48, %v3699_v52  ;;  %v9072_v58 = vsel %vm3193_vm10, %v3699_v52, %v10274_v37  ;;  %v9077_v15 = vsel %vm3089_vm1, %v10413_v22, %v4165_v28  ;;  %v4202_v48 = vrot.slane %v4190_v18, 1 }
 0x3b2   : > { %3132 = vrot.lane.b32.xlu0 %v8640_v43, %s6758_s26  ;;  %3573 = vrot.lane.b32.xlu1 %v3562_v16, %s10277_s11  ;;  %10414 = vst [vmem:[#allocation79_spill] sm:$0xff] %v9077_v15  ;;  %v4689_v43 = vmul.f32 %v8817_v21, %v8964_v8  ;;  %v4726_v52 = vmul.f32 %v8820_v61, %v8964_v8  ;;  %v4167_v16 = vrot.slane %v4154_v13, 1  ;;  %v4204_v37 = vrot.slane %v4191_v56, 1 }
 0x3b3   : > { %v9098_v30 = vsel %vm3089_vm1, %v10415_v46, %v4202_v48  ;;  %v4703_v25 = vrot.slane %v4690_v9, 1  ;;  %v4256_v15 = vmul.f32 %v8799_v4, %v8924_v5  ;;  %v10416_v13 = vrot.slane %v8934_v42, 1 }
 0x3b4   : > { %v4701_v22 = vrot.slane %v4689_v43, 1  ;;  %v4738_v18 = vrot.slane %v4726_v52, 1  ;;  %v9103_v21 = vsel %vm3089_vm1, %v4165_v28, %v4167_v16  ;;  %v4727_v24 = vmul.f32 %v8820_v61, %v9010_v17 }
 0x3b5   : > { %v10417_v43 = vrot.slane %v8951_v20, 1  ;;  %v4268_v28 = vrot.slane %v4256_v15, 2  ;;  %v3082_v42 = vmul.f32 %v8681_v33, %v8528_v47  ;;  %v3083_v61 = vmul.f32 %v8681_v33, %v8571_v12 }
 0x3b6   : > { %3169 = vrot.lane.b32.xlu0 %v8647_v34, %s10277_s11  ;;  %3134 = vrot.lane.b32.xlu1 %v8650_v10, %s6758_s26  ;;  %v9108_v34 = vsel %vm3089_vm1, %v10416_v13, %v4701_v22  ;;  %v9111_v10 = vsel %vm3089_vm1, %v4202_v48, %v4204_v37  ;;  %v9121_v52 = vsel %vm3089_vm1, %v4701_v22, %v4703_v25  ;;  %v4740_v9 = vrot.slane %v4727_v24, 1 }
 0x3b7   : > { %v9118_v56 = vsel %vm3089_vm1, %v10417_v43, %v4738_v18  ;;  %v4293_v37 = vmul.f32 %v8802_v57, %v8924_v5  ;;  %v4257_v48 = vmul.f32 %v8799_v4, %v8975_v40  ;;  %v10418_v25 = vrot.slane %v8920_v2, 2 }
 0x3b8   : > { %v3095_v15 = vrot.slane %v3082_v42, 1  ;;  %v4792_v16 = vmul.f32 %v8831_v35, %v8964_v8  ;;  %v4294_v4 = vmul.f32 %v8802_v57, %v8975_v40  ;;  %v9145_v33 = vsel %vm3089_vm1, %v4738_v18, %v4740_v9 }
 0x3b9   : > { %v9138_v20 = vsel %vm3193_vm10, %v10418_v25, %v4268_v28  ;;  %v4305_v22 = vrot.slane %v4293_v37, 2  ;;  %v3097_v46 = vrot.slane %v3083_v61, 1  ;;  %v3186_v43 = vmul.f32 %v8734_v39, %v8528_v47 }
 0x3ba   : > { %3236 = vrot.lane.b32.xlu0 %v8655_v6, %s6758_s26  ;;  %3171 = vrot.lane.b32.xlu1 %v8658_v31, %s10277_s11  ;;  %v4270_v6 = vrot.slane %v4257_v48, 2  ;;  %v10419_v31 = vrot.slane %v8758_v45, 1  ;;  %v4804_v13 = vrot.slane %v4792_v16, 2  ;;  %v4307_v24 = vrot.slane %v4294_v4, 2 }
 0x3bb   : > { %v10420_v57 = vrot.slane %v8969_v49, 2  ;;  %v9167_v45 = vsel %vm3089_vm1, %v3095_v15, %v3097_v46  ;;  %v4829_v9 = vmul.f32 %v8852_v51, %v8964_v8  ;;  %v10421_v49 = vrot.slane %v8989_v50, 2  ;;  %v10428_v46 = vld [vmem:[#allocation48_spill] sm:$0xff] }
 0x3bc   : > { %v9152_v2 = vsel %vm3089_vm1, %v10419_v31, %v3095_v15  ;;  %v9164_v42 = vsel %vm3193_vm10, %v4268_v28, %v4270_v6  ;;  %v9187_v37 = vsel %vm3193_vm10, %v4305_v22, %v4307_v24  ;;  %v3199_v48 = vrot.slane %v3186_v43, 2 }
 0x3bd   : > { %v9161_v18 = vsel %vm3193_vm10, %v10420_v57, %v4305_v22  ;;  %v9184_v28 = vsel %vm3193_vm10, %v10421_v49, %v4804_v13  ;;  %10423 = vst [vmem:[#allocation81_spill] sm:$0xff] %v9187_v37  ;;  %v4793_v61 = vmul.f32 %v8831_v35, %v9010_v17  ;;  %v4830_v25 = vmul.f32 %v8852_v51, %v9010_v17 }
 0x3be   : > { %3273 = vrot.lane.b32.xlu0 %v8661_v26, %s10277_s11  ;;  %3238 = vrot.lane.b32.xlu1 %v8664_v55, %s6758_s26  ;;  %10422 = vst [vmem:[#allocation80_spill] sm:$0xff] %v9184_v28  ;;  %v4841_v26 = vrot.slane %v4829_v9, 2  ;;  %v3187_v55 = vmul.f32 %v8734_v39, %v8571_v12  ;;  %v3588_v50 = vmul.f32 %v8794_v53, %v8536_v3  ;;  %v10424_v15 = vrot.slane %v8768_v36, 2 }
 0x3bf   : > { %v4806_v4 = vrot.slane %v4793_v61, 2  ;;  %v3589_v35 = vmul.f32 %v8794_v53, %v8586_v59  ;;  %v3691_v22 = vmul.f32 %v8810_v27, %v8536_v3  ;;  %v10426_v12 = vrot.slane %v9003_v38, 2  ;;  %v10429_v53 = vld [vmem:[#allocation49_spill] sm:$0xff] }
 0x3c0   : > { %v9202_v16 = vsel %vm3193_vm10, %v10424_v15, %v3199_v48  ;;  %v3201_v51 = vrot.slane %v3187_v55, 2  ;;  %v4843_v6 = vrot.slane %v4830_v25, 2  ;;  %v3600_v36 = vrot.slane %v3588_v50, 1  ;;  %v10436_v15 = vld [vmem:[#allocation50_spill] sm:$0xff] }
 0x3c1   : > { %10425 = vst [vmem:[#allocation82_spill] sm:$0xff] %v9202_v16  ;;  %v9211_v39 = vsel %vm3193_vm10, %v10426_v12, %v4841_v26  ;;  %v9218_v31 = vsel %vm3193_vm10, %v4804_v13, %v4806_v4  ;;  %v3602_v38 = vrot.slane %v3589_v35, 1  ;;  %v3703_v24 = vrot.slane %v3691_v22, 2  ;;  %v10439_v22 = vld [vmem:[#allocation60_spill] sm:$0xff] }
 0x3c2   : > { %10427 = vst [vmem:[#allocation83_spill] sm:$0xff] %v9211_v39  ;;  %3637 = vrot.lane.b32.xlu0 %v10428_v46, %s6758_s26  ;;  %3275 = vrot.lane.b32.xlu1 %v10429_v53, %s10277_s11  ;;  %10430 = vst [vmem:[#allocation48_spill] sm:$0xff] %v9218_v31  ;;  %v3692_v43 = vmul.f32 %v8810_v27, %v8586_v59  ;;  %v9223_v57 = vsel %vm3193_vm10, %v3199_v48, %v3201_v51  ;;  %v10433_v49 = vrot.slane %v8877_v60, 1  ;;  %v10437_v60 = vld [vmem:[#allocation51_spill] sm:$0xff]  ;;  %v10441_v46 = vld [vmem:[#allocation62_spill] sm:$0xff] }
 0x3c3   : > { %10431 = vst [vmem:[#allocation49_spill] sm:$0xff] %v9223_v57  ;;  %v9226_v9 = vsel %vm3193_vm10, %v4841_v26, %v4843_v6  ;;  %v9234_v13 = vsel %vm3089_vm1, %v3600_v36, %v3602_v38  ;;  %v10434_v55 = vrot.slane %v9056_v23, 2  ;;  %v9242_v27 = vstv %s9147_s18  ;;  %v10440_v51 = vld [vmem:[#allocation63_spill] sm:$0xff]  ;;  %v10442_v38 = vld [vmem:[#allocation64_spill] sm:$0xff]  ;;  %s9438_s18 = sld [smem:[#allocation20 + $0x200]] }
 0x3c4   : > { %10432 = vst [vmem:[#allocation84_spill] sm:$0xff] %v9226_v9  ;;  %v9231_v61 = vsel %vm3089_vm1, %v10433_v49, %v3600_v36  ;;  %v3705_v59 = vrot.slane %v3692_v43, 2  ;;  %v4120_v48 = vstv %s9156_s30  ;;  %v4656_v50 = vstv %s9171_s15  ;;  %v10444_v9 = vld [vmem:[#allocation53_spill] sm:$0xff]  ;;  %s9444_s30 = sld [smem:[#allocation20 + $0x280]] }
 0x3c5   : > { %v9239_v25 = vsel %vm3193_vm10, %v10434_v55, %v3703_v24  ;;  %v4223_v26 = vstv %s9173_s29  ;;  %v9252_v4 = vstv %s9179_s3  ;;  %v4759_v23 = vstv %s9191_s16  ;;  %s9446_s15 = sld [smem:[#allocation20 + $0x300]]  ;;  %s9452_s3 = sld [smem:[#allocation18 + $0x1]] }
 0x3c6   : > { %10435 = vst [vmem:[#allocation85_spill] sm:$0xff] %v9239_v25  ;;  %3674 = vrot.lane.b32.xlu0 %v10436_v15, %s10277_s11  ;;  %3639 = vrot.lane.b32.xlu1 %v10437_v60, %s6758_s26  ;;  %v9255_v35 = vsel %vm3193_vm10, %v3703_v24, %v3705_v59  ;;  %v4121_v12 = vmul.f32 %v4120_v48, %v10439_v22  ;;  %v10443_v25 = vld [vmem:[#allocation52_spill] sm:$0xff]  ;;  %s9448_s29 = sld [smem:[#allocation20 + $0x380]]  ;;  %s9454_s16 = sld [smem:[#allocation20 + $0x1]] }
 0x3c7   : > { %10438 = vst [vmem:[#allocation50_spill] sm:$0xff] %v9255_v35  ;;  %v4122_v6 = vmul.f32 %v4120_v48, %v10440_v51  ;;  %v4123_v36 = vmul.f32 %v4120_v48, %v8889_v63  ;;  %v4657_v53 = vmul.f32 %v4656_v50, %v10441_v46  ;;  %v4658_v43 = vmul.f32 %v4656_v50, %v10442_v38 }
 0x3c8   : > { %v4659_v49 = vmul.f32 %v4656_v50, %v8914_v11  ;;  %v4224_v55 = vmul.f32 %v4223_v26, %v10439_v22  ;;  %v4225_v15 = vmul.f32 %v4223_v26, %v10440_v51  ;;  %v4131_v60 = vrot.slane %v4121_v12, 1 }
 0x3c9   : > { %v4132_v24 = vrot.slane %v4122_v6, 1  ;;  %v4134_v59 = vrot.slane %v4123_v36, 1  ;;  %v4667_v35 = vrot.slane %v4657_v53, 1  ;;  %v4668_v57 = vrot.slane %v4658_v43, 1 }
 0x3ca   : > { %3740 = vrot.lane.b32.xlu0 %v10443_v25, %s6758_s26  ;;  %3676 = vrot.lane.b32.xlu1 %v10444_v9, %s10277_s11  ;;  %v4670_v31 = vrot.slane %v4659_v49, 1  ;;  %v4234_v39 = vrot.slane %v4224_v55, 2  ;;  %v4235_v16 = vrot.slane %v4225_v15, 2  ;;  %v4226_v12 = vmul.f32 %v4223_v26, %v8889_v63  ;;  %v10450_v15 = vld [vmem:[#allocation54_spill] sm:$0xff] }
 0x3cb   : > { %v9271_v37 = vsel %vm3089_vm1, %v4131_v60, %v4132_v24  ;;  %v9274_v28 = vsel %vm3089_vm1, %v4132_v24, %v4134_v59  ;;  %v4760_v6 = vmul.f32 %v4759_v23, %v10441_v46  ;;  %v9279_v36 = vsel %vm3089_vm1, %v4667_v35, %v4668_v57  ;;  %v10451_v35 = vld [vmem:[#allocation55_spill] sm:$0xff] }
 0x3cc   : > { %10445 = vst [vmem:[#allocation51_spill] sm:$0xff] %v9271_v37  ;;  %10446 = vst [vmem:[#allocation52_spill] sm:$0xff] %v9274_v28  ;;  %v9282_v25 = vsel %vm3089_vm1, %v4668_v57, %v4670_v31  ;;  %v9285_v9 = vsel %vm3193_vm10, %v4234_v39, %v4235_v16  ;;  %v4761_v53 = vmul.f32 %v4759_v23, %v10442_v38  ;;  %v4237_v43 = vrot.slane %v4226_v12, 2 }
 0x3cd   : > { %10447 = vst [vmem:[#allocation53_spill] sm:$0xff] %v9279_v36  ;;  %10448 = vst [vmem:[#allocation86_spill] sm:$0xff] %v9282_v25  ;;  %v4770_v49 = vrot.slane %v4760_v6, 2  ;;  %v4762_v55 = vmul.f32 %v4759_v23, %v8914_v11  ;;  %v4069_v57 = vmul.f32 %v9242_v27, %v10439_v22  ;;  %v4095_v39 = vmul.f32 %v9252_v4, %v10439_v22 }
 0x3ce   : > { %10449 = vst [vmem:[#allocation87_spill] sm:$0xff] %v9285_v9  ;;  %3777 = vrot.lane.b32.xlu0 %v10450_v15, %s10277_s11  ;;  %3742 = vrot.lane.b32.xlu1 %v10451_v35, %s6758_s26  ;;  %v4070_v60 = vmul.f32 %v9242_v27, %v10440_v51  ;;  %v4771_v24 = vrot.slane %v4761_v53, 2  ;;  %v9302_v12 = vsel %vm3193_vm10, %v4235_v16, %v4237_v43 }
 0x3cf   : > { %10452 = vst [vmem:[#allocation54_spill] sm:$0xff] %v9302_v12  ;;  %v4773_v6 = vrot.slane %v4762_v55, 2  ;;  %v4124_v9 = vmul.f32 %v4120_v48, %v8924_v5  ;;  %v4125_v15 = vmul.f32 %v4120_v48, %v8975_v40  ;;  %v4660_v25 = vmul.f32 %v4656_v50, %v8964_v8  ;;  %v10455_v48 = vld [vmem:[#allocation56_spill] sm:$0xff] }
 0x3d0   : > { %v9307_v35 = vsel %vm3193_vm10, %v4770_v49, %v4771_v24  ;;  %v4661_v36 = vmul.f32 %v4656_v50, %v9010_v17  ;;  %v4227_v28 = vmul.f32 %v4223_v26, %v8924_v5  ;;  %v4228_v55 = vmul.f32 %v4223_v26, %v8975_v40 }
 0x3d1   : > { %10453 = vst [vmem:[#allocation55_spill] sm:$0xff] %v9307_v35  ;;  %v9313_v53 = vsel %vm3193_vm10, %v4771_v24, %v4773_v6  ;;  %v4136_v16 = vrot.slane %v4124_v9, 1  ;;  %v4138_v12 = vrot.slane %v4125_v15, 1  ;;  %v4672_v49 = vrot.slane %v4660_v25, 1 }
 0x3d2   : > { %10454 = vst [vmem:[#allocation88_spill] sm:$0xff] %v9313_v53  ;;  %3779 = vrot.lane.b32.xlu1 %v10455_v48, %s10277_s11  ;;  %4077 = vrot.lane.b32.xlu0 %v4069_v57, %s6758_s26  ;;  %v4674_v35 = vrot.slane %v4661_v36, 1  ;;  %v4239_v37 = vrot.slane %v4227_v28, 2  ;;  %v4763_v50 = vmul.f32 %v4759_v23, %v8964_v8  ;;  %v4241_v9 = vrot.slane %v4228_v55, 2 }
 0x3d3   : > { %v9321_v22 = vsel %vm3089_vm1, %v4134_v59, %v4136_v16  ;;  %v9324_v24 = vsel %vm3089_vm1, %v4136_v16, %v4138_v12  ;;  %v4764_v15 = vmul.f32 %v4759_v23, %v9010_v17  ;;  %v9328_v40 = vsel %vm3089_vm1, %v4670_v31, %v4672_v49  ;;  %v10465_v16 = vld [vmem:[#allocation44_spill] sm:$0xff] }
 0x3d4   : > { %10456 = vst [vmem:[#allocation56_spill] sm:$0xff] %v9321_v22  ;;  %10457 = vst [vmem:[#allocation89_spill] sm:$0xff] %v9324_v24  ;;  %v9331_v26 = vsel %vm3089_vm1, %v4672_v49, %v4674_v35  ;;  %v9334_v36 = vsel %vm3193_vm10, %v4237_v43, %v4239_v37  ;;  %v4775_v28 = vrot.slane %v4763_v50, 2  ;;  %v9337_v25 = vstv %s9288_s28  ;;  %v10464_v35 = vld [vmem:[#allocation66_spill] sm:$0xff]  ;;  %v10466_v50 = vld [vmem:[#allocation67_spill] sm:$0xff]  ;;  %s9456_s28 = sld [smem:[#allocation20 + $0x81]] }
 0x3d5   : > { %10458 = vst [vmem:[#allocation90_spill] sm:$0xff] %v9328_v40  ;;  %10459 = vst [vmem:[#allocation91_spill] sm:$0xff] %v9331_v26  ;;  %v9340_v59 = vsel %vm3193_vm10, %v4239_v37, %v4241_v9  ;;  %v4777_v57 = vrot.slane %v4764_v15, 2  ;;  %v4605_v23 = vmul.f32 %v9337_v25, %v10441_v46  ;;  %v4096_v43 = vmul.f32 %v9252_v4, %v10440_v51  ;;  %v10467_v9 = vld [vmem:[#allocation73_spill] sm:$0xff] }
 0x3d6   : > { %10460 = vst [vmem:[#allocation92_spill] sm:$0xff] %v9334_v36  ;;  %10461 = vst [vmem:[#allocation93_spill] sm:$0xff] %v9340_v59  ;;  %4103 = vrot.lane.b32.xlu0 %v4095_v39, %s10277_s11  ;;  %4079 = vrot.lane.b32.xlu1 %v4070_v60, %s6758_s26  ;;  %v9345_v17 = vsel %vm3193_vm10, %v4773_v6, %v4775_v28  ;;  %v9354_v37 = vstv %s5494_s21  ;;  %v4606_v60 = vmul.f32 %v9337_v25, %v10442_v38  ;;  %s9460_s21 = sld [smem:[#allocation20 + $0x101]] }
 0x3d7   : > { %10462 = vst [vmem:[#allocation94_spill] sm:$0xff] %v9345_v17  ;;  %v9348_v31 = vsel %vm3193_vm10, %v4775_v28, %v4777_v57  ;;  %v4631_v39 = vmul.f32 %v9354_v37, %v10441_v46  ;;  %v4632_v12 = vmul.f32 %v9354_v37, %v10442_v38  ;;  %v9366_v6 = vstv %s3019_s25  ;;  %s9462_s25 = sld [smem:[#allocation20 + $0x181]] }
 0x3d8   : > { %10463 = vst [vmem:[#allocation95_spill] sm:$0xff] %v9348_v31  ;;  %v3021_v55 = vmul.f32 %v9366_v6, %v10465_v16  ;;  %v9377_v57 = vstv %s5432_s1  ;;  %s9466_s1 = sld [smem:[#allocation20 + $0x201]]  ;;  %v9548_v59 = vmul.f32 %v9366_v6, %v8528_v47 }
 0x3da   : > { %4613 = vrot.lane.b32.xlu0 %v4605_v23, %s6758_s26  ;;  %4105 = vrot.lane.b32.xlu1 %v4096_v43, %s10277_s11  ;;  %v10468_v43 = vld [vmem:[#allocation70_spill] sm:$0xff] }
 0x3de   : > { %4639 = vrot.lane.b32.xlu0 %v4631_v39, %s10277_s11  ;;  %4615 = vrot.lane.b32.xlu1 %v4606_v60, %s6758_s26  ;;  %v10469_v39 = vld [vmem:[#allocation74_spill] sm:$0xff]  ;;  %v3527_v60 = vmul.f32 %v9377_v57, %v8430_v19  ;;  %v10473_v19 = vld [vmem:[#allocation72_spill] sm:$0xff] }
 0x3e2   : > { %4169 = vrot.lane.b32.xlu0 %v10464_v35, %s6758_s26  ;;  %4641 = vrot.lane.b32.xlu1 %v4632_v12, %s10277_s11  ;;  %v3528_v12 = vmul.f32 %v9377_v57, %v8459_v29  ;;  %v10470_v35 = vld [vmem:[#allocation57_spill] sm:$0xff] }
 0x3e3   : > { %v10474_v29 = vld [vmem:[#allocation45_spill] sm:$0xff] }
 0x3e4   : > { %v3036_v48 = vpop.permute.xlu0 %3035 }
 0x3e5   : > { %v3047_v49 = vadd.f32 %v3036_v48, %v3021_v55 }
 0x3e6   : > { %4206 = vrot.lane.b32.xlu0 %v10466_v50, %s10277_s11  ;;  %4171 = vrot.lane.b32.xlu1 %v10467_v9, %s6758_s26 }
 0x3e8   : > { %v3062_v15 = vpop.permute.xlu0 %3061  ;;  %v3064_v28 = vpop.permute.xlu1 %3063 }
 0x3e9   : > { %v3073_v23 = vadd.f32 %v3062_v15, %v3047_v49  ;;  %v10471_v49 = vld [vmem:[#allocation71_spill] sm:$0xff]  ;;  %v10472_v15 = vld [vmem:[#allocation77_spill] sm:$0xff] }
 0x3ea   : > { %4705 = vrot.lane.b32.xlu0 %v10468_v43, %s6758_s26  ;;  %4208 = vrot.lane.b32.xlu1 %v10469_v39, %s10277_s11 }
 0x3eb   : > { %v3103_v16 = vadd.f32 %v10470_v35, %v3073_v23  ;;  %v3022_v23 = vmul.f32 %v9366_v6, %v10474_v29 }
 0x3ec   : > { %v3542_v55 = vpop.permute.xlu0 %3541  ;;  %v3544_v48 = vpop.permute.xlu1 %3543 }
 0x3ed   : > { %v3553_v50 = vadd.f32 %v3542_v55, %v3527_v60  ;;  %v3554_v9 = vadd.f32 %v3544_v48, %v3528_v12  ;;  %v10475_v60 = vld [vmem:[#allocation46_spill] sm:$0xff] }
 0x3ee   : > { %4742 = vrot.lane.b32.xlu0 %v10471_v49, %s10277_s11  ;;  %4707 = vrot.lane.b32.xlu1 %v10472_v15, %s6758_s26  ;;  %v3023_v12 = vmul.f32 %v9366_v6, %v10475_v60  ;;  %v10476_v15 = vld [vmem:[#allocation75_spill] sm:$0xff] }
 0x3f0   : > { %v3568_v43 = vpop.permute.xlu0 %3567  ;;  %v3570_v39 = vpop.permute.xlu1 %3569 }
 0x3f1   : > { %v3579_v31 = vadd.f32 %v3568_v43, %v3553_v50  ;;  %v3580_v17 = vadd.f32 %v3570_v39, %v3554_v9 }
 0x3f2   : > { %4272 = vrot.lane.b32.xlu0 %v10473_v19, %s6758_s26  ;;  %4744 = vrot.lane.b32.xlu1 %v8994_v0, %s10277_s11 }
 0x3f3   : > { %v9401_v35 = vadd.f32 %v9030_v32, %v3579_v31  ;;  %v9404_v55 = vadd.f32 %v9043_v41, %v3580_v17  ;;  %v10477_v32 = vld [vmem:[#allocation58_spill] sm:$0xff] }
 0x3f4   : > { %v3038_v48 = vpop.permute.xlu0 %3037  ;;  %v3040_v50 = vpop.permute.xlu1 %3039 }
 0x3f5   : > { %v3048_v9 = vadd.f32 %v3038_v48, %v3022_v23  ;;  %v9406_v49 = vadd.f32 %v3040_v50, %v3023_v12 }
 0x3f6   : > { %4309 = vrot.lane.b32.xlu0 %v10476_v15, %s10277_s11  ;;  %4274 = vrot.lane.b32.xlu1 %v8985_v44, %s6758_s26  ;;  %v10478_v44 = vld [vmem:[#allocation59_spill] sm:$0xff]  ;;  %v10480_v15 = vld [vmem:[#allocation78_spill] sm:$0xff] }
 0x3f7   : > { %v3074_v0 = vadd.f32 %v3064_v28, %v3048_v9 }
 0x3f8   : > { %v3129_v43 = vpop.permute.xlu0 %3128  ;;  %v3131_v39 = vpop.permute.xlu1 %3130 }
 0x3f9   : > { %v3140_v19 = vadd.f32 %v3129_v43, %v3103_v16  ;;  %v3104_v31 = vadd.f32 %v10477_v32, %v3074_v0  ;;  %v10479_v16 = vld [vmem:[#allocation61_spill] sm:$0xff]  ;;  %v4097_v0 = vmul.f32 %v9252_v4, %v8889_v63  ;;  %v4072_v43 = vmul.f32 %v9242_v27, %v8924_v5 }
 0x3fa   : > { %4808 = vrot.lane.b32.xlu0 %v8998_v7, %s6758_s26  ;;  %4311 = vrot.lane.b32.xlu1 %v9015_v62, %s10277_s11  ;;  %v4071_v62 = vmul.f32 %v9242_v27, %v8889_v63 }
 0x3fb   : > { %v3141_v41 = vadd.f32 %v3131_v39, %v3104_v31  ;;  %v4607_v31 = vmul.f32 %v9337_v25, %v8914_v11 }
 0x3fc   : > { %v3166_v17 = vpop.permute.xlu0 %3165  ;;  %v3168_v29 = vpop.permute.xlu1 %3167 }
 0x3fd   : > { %v3177_v23 = vadd.f32 %v3166_v17, %v3140_v19  ;;  %v3178_v60 = vadd.f32 %v3168_v29, %v3141_v41  ;;  %v4098_v41 = vmul.f32 %v9252_v4, %v8924_v5  ;;  %v9476_v17 = vstv %s9428_s24  ;;  %s5474_s24 = sld [smem:[#allocation20 + $0x102]] }
 0x3fe   : > { %4845 = vrot.lane.b32.xlu0 %v9018_v54, %s10277_s11  ;;  %4810 = vrot.lane.b32.xlu1 %v9024_v14, %s6758_s26  ;;  %v9479_v29 = vstv %s9430_s6  ;;  %v9483_v4 = vstv %s9432_s27  ;;  %s5475_s6 = sld [smem:[#allocation20 + $0x182]] }
 0x3ff   : > { %v3207_v28 = vadd.f32 %v10478_v44, %v3177_v23  ;;  %v3208_v12 = vadd.f32 %v10479_v16, %v3178_v60  ;;  %v9486_v23 = vstv %s9434_s17  ;;  %v9489_v60 = vstv %s9436_s22  ;;  %s5476_s27 = sld [smem:[#allocation20 + $0x202]] }
 0x400   : > { %v3233_v48 = vpop.permute.xlu0 %3232  ;;  %v3235_v7 = vpop.permute.xlu1 %3234  ;;  %v4633_v16 = vmul.f32 %v9354_v37, %v8914_v11  ;;  %s9753_s17 = sld [smem:[#allocation20 + $0x282]] }
 0x401   : > { %v3244_v50 = vadd.f32 %v3233_v48, %v3207_v28  ;;  %v3245_v9 = vadd.f32 %v3235_v7, %v3208_v12  ;;  %v9494_v12 = vstv %s9438_s18  ;;  %s9755_s22 = sld [smem:[#allocation20 + $0x302]] }
 0x402   : > { %4847 = vrot.lane.b32.xlu1 %v10480_v15, %s10277_s11  ;;  %4081 = vrot.lane.b32.xlu0 %v4071_v62, %s6758_s26  ;;  %10482 = vst [vmem:[#allocation66_spill] sm:$0xff] %v9494_v12  ;;  %v4608_v62 = vmul.f32 %v9337_v25, %v8964_v8  ;;  %v9507_v15 = vstv %s9448_s29  ;;  %v9514_v25 = vstv %s9452_s3  ;;  %s9757_s18 = sld [smem:[#allocation20 + $0x382]]  ;;  %s9766_s29 = sld [smem:[#allocation20 + $0x83]] }
 0x403   : > { %10485 = vst [vmem:[#allocation73_spill] sm:$0xff] %v9507_v15  ;;  %10486 = vst [vmem:[#allocation70_spill] sm:$0xff] %v9514_v25  ;;  %s9773_s3 = sld [smem:[#allocation20 + $0x103]] }
 0x404   : > { %v3270_v54 = vpop.permute.xlu0 %3269  ;;  %v3272_v14 = vpop.permute.xlu1 %3271 }
 0x405   : > { %v3281_v39 = vadd.f32 %v3270_v54, %v3244_v50  ;;  %v3282_v19 = vadd.f32 %v3272_v14, %v3245_v9  ;;  %v9501_v50 = vstv %s9444_s30  ;;  %v9504_v9 = vstv %s9446_s15  ;;  %s9762_s30 = sld [smem:[#allocation18 + $0x3]] }
 0x406   : > { %4107 = vrot.lane.b32.xlu0 %v4097_v0, %s10277_s11  ;;  %4083 = vrot.lane.b32.xlu1 %v4072_v43, %s6758_s26  ;;  %s9468_s11 = sld [smem:[#allocation20 + $0x281]]  ;;  %10483 = vst [vmem:[#allocation44_spill] sm:$0xff] %v9501_v50  ;;  %10484 = vst [vmem:[#allocation67_spill] sm:$0xff] %v9504_v9  ;;  %v9517_v14 = vstv %s9454_s16  ;;  %s9764_s15 = sld [smem:[#allocation20 + $0x3]] }
 0x407   : > { %v3287_v0 = vadd.f32 %v9476_v17, %v3281_v39  ;;  %v10487_v39 = vld [vmem:[#allocation79_spill] sm:$0xff]  ;;  %s9775_s16 = sld [smem:[#allocation20 + $0x183]] }
 0x408   : > { %v3634_v27 = vpop.permute.xlu0 %3633  ;;  %v3636_v32 = vpop.permute.xlu1 %3635 }
 0x409   : > { %v3645_v48 = vadd.f32 %v3634_v27, %v9401_v35  ;;  %v3646_v7 = vadd.f32 %v3636_v32, %v9404_v55  ;;  %v4634_v35 = vmul.f32 %v9354_v37, %v8964_v8  ;;  %v9521_v32 = vstv %s9456_s28  ;;  %s9783_s28 = sld [smem:[#allocation20 + $0x203]] }
 0x40a   : > { %4617 = vrot.lane.b32.xlu0 %v4607_v31, %s6758_s26  ;;  %4109 = vrot.lane.b32.xlu1 %v4098_v41, %s10481_s4  ;;  %v9524_v31 = vstv %s9460_s21  ;;  %v9527_v41 = vstv %s9462_s25  ;;  %v3299_v36 = vmul.f32 %v9483_v4, %v3287_v0  ;;  %v3305_v26 = vmul.f32 %v9486_v23, %v3287_v0  ;;  %s9785_s21 = sld [smem:[#allocation20 + $0x283]] }
 0x40b   : > { %v3311_v47 = vmul.f32 %v9489_v60, %v3287_v0  ;;  %s9803_s25 = sld [smem:[#allocation20 + $0x303]] }
 0x40c   : > { %v3671_v44 = vpop.permute.xlu0 %3670  ;;  %v3673_v28 = vpop.permute.xlu1 %3672 }
 0x40d   : > { %v3682_v54 = vadd.f32 %v3671_v44, %v3645_v48  ;;  %v3683_v55 = vadd.f32 %v3673_v28, %v3646_v7  ;;  %v9532_v28 = vstv %s9466_s1  ;;  %v3288_v48 = vadd.f32 %v9476_v17, %v3282_v19  ;;  %s9805_s1 = sld [smem:[#allocation20 + $0x383]] }
 0x40e   : > { %4643 = vrot.lane.b32.xlu0 %v4633_v16, %s10481_s4  ;;  %4619 = vrot.lane.b32.xlu1 %v4608_v62, %s6758_s26  ;;  %v9535_v16 = vstv %s9468_s11  ;;  %v9541_v7 = vstv %s9471_s0  ;;  %v9557_v19 = vmul.f32 %v9377_v57, %v8536_v3  ;;  %v3335_v3 = vmul.f32 %v9507_v15, %v3287_v0  ;;  %s5462_s0 = sld [smem:[#allocation16 + $0x100]]  ;;  %s5473_s11 = sld [smem:[#allocation20 + $0x82]] }
 0x40f   : > { %v3711_v37 = vadd.f32 %v9064_v1, %v3682_v54  ;;  %v3712_v44 = vadd.f32 %v9072_v58, %v3683_v55  ;;  %v9544_v62 = vstv %s9473_s2  ;;  %v10488_v58 = vld [vmem:[#allocation47_spill] sm:$0xff]  ;;  %v3300_v40 = vmul.f32 %v9483_v4, %v3288_v48  ;;  %s5492_s2 = sld [smem:[#allocation16 + $0x180]] }
 0x410   : > { %v3737_v43 = vpop.permute.xlu0 %3736  ;;  %v3739_v27 = vpop.permute.xlu1 %3738  ;;  %v9553_v55 = vmul.f32 %v9377_v57, %v10488_v58  ;;  %v3329_v58 = vmul.f32 %v9504_v9, %v3287_v0  ;;  %v3294_v57 = vmul.f32 %v9479_v29, %v3288_v48  ;;  %v3306_v24 = vmul.f32 %v9486_v23, %v3288_v48 }
 0x411   : > { %v3748_v1 = vadd.f32 %v3737_v43, %v3711_v37  ;;  %v3749_v54 = vadd.f32 %v3739_v27, %v3712_v44  ;;  %v3323_v27 = vmul.f32 %v9501_v50, %v3287_v0  ;;  %v3312_v22 = vmul.f32 %v9489_v60, %v3288_v48 }
 0x412   : > { %4173 = vrot.lane.b32.xlu0 %v10487_v39, %s6758_s26  ;;  %4645 = vrot.lane.b32.xlu1 %v4634_v35, %s10481_s4  ;;  %v3293_v39 = vmul.f32 %v9479_v29, %v3287_v0  ;;  %v3317_v35 = vmul.f32 %v9494_v12, %v3287_v0  ;;  %v3318_v8 = vmul.f32 %v9494_v12, %v3288_v48 }
 0x413   : > { %v3324_v0 = vmul.f32 %v9501_v50, %v3288_v48 }
 0x414   : > { %v3774_v6 = vpop.permute.xlu0 %3773  ;;  %v3776_v43 = vpop.permute.xlu1 %3775 }
 0x415   : > { %v3785_v37 = vadd.f32 %v3774_v6, %v3748_v1  ;;  %v3786_v44 = vadd.f32 %v3776_v43, %v3749_v54  ;;  %v3330_v54 = vmul.f32 %v9504_v9, %v3288_v48  ;;  %v3336_v6 = vmul.f32 %v9507_v15, %v3288_v48 }
 0x416   : > { %4210 = vrot.lane.b32.xlu0 %v9098_v30, %s10481_s4  ;;  %4175 = vrot.lane.b32.xlu1 %v9103_v21, %s6758_s26 }
 0x417   : > { %v3791_v1 = vadd.f32 %v9514_v25, %v3785_v37  ;;  %v3792_v43 = vadd.f32 %v9514_v25, %v3786_v44 }
 0x418   : > { %v3066_v30 = vpop.permute.xlu0 %3065  ;;  %v3042_v11 = vpop.permute.xlu1 %3041 }
 0x419   : > { %v3797_v5 = vmul.f32 %v9517_v14, %v3791_v1  ;;  %v3807_v63 = vmul.f32 %v9521_v32, %v3791_v1  ;;  %v3817_v53 = vmul.f32 %v9524_v31, %v3791_v1  ;;  %v3827_v37 = vmul.f32 %v9527_v41, %v3791_v1 }
 0x41a   : > { %v3837_v21 = vmul.f32 %v9532_v28, %v3791_v1  ;;  %v3847_v38 = vmul.f32 %v9535_v16, %v3791_v1  ;;  %v3857_v46 = vmul.f32 %v9541_v7, %v3791_v1  ;;  %v3867_v48 = vmul.f32 %v9544_v62, %v3791_v1  ;;  %4709 = vrot.lane.b32.xlu0 %v9108_v34, %s6758_s26 }
 0x41b   : > { %v9591_v44 = vadd.f32 %v3797_v5, %v3293_v39  ;;  %v9593_v51 = vadd.f32 %v3807_v63, %v3299_v36  ;;  %v9595_v15 = vadd.f32 %v3817_v53, %v3305_v26  ;;  %v9597_v9 = vadd.f32 %v3827_v37, %v3311_v47  ;;  %4212 = vrot.lane.b32.xlu1 %v9111_v10, %s10481_s4 }
 0x41c   : > { %v9601_v50 = vadd.f32 %v3837_v21, %v3317_v35  ;;  %v9603_v25 = vadd.f32 %v3847_v38, %v3323_v27  ;;  %v9605_v12 = vadd.f32 %v3857_v46, %v3329_v58  ;;  %v9607_v1 = vadd.f32 %v3867_v48, %v3335_v3  ;;  %v3546_v34 = vpop.permute.xlu0 %3545  ;;  %v3068_v5 = vpop.permute.xlu1 %3067 }
 0x41d   : > { %v3798_v63 = vmul.f32 %v9517_v14, %v3792_v43  ;;  %v3808_v53 = vmul.f32 %v9521_v32, %v3792_v43  ;;  %v3818_v26 = vmul.f32 %v9524_v31, %v3792_v43  ;;  %v3828_v36 = vmul.f32 %v9527_v41, %v3792_v43 }
 0x41e   : > { %v3838_v10 = vmul.f32 %v9532_v28, %v3792_v43  ;;  %v3848_v39 = vmul.f32 %v9535_v16, %v3792_v43  ;;  %v3858_v38 = vmul.f32 %v9541_v7, %v3792_v43  ;;  %v3868_v46 = vmul.f32 %v9544_v62, %v3792_v43  ;;  %4746 = vrot.lane.b32.xlu0 %v9118_v56, %s10481_s4 }
 0x41f   : > { %v9619_v47 = vadd.f32 %v3798_v63, %v3294_v57  ;;  %v9621_v35 = vadd.f32 %v3808_v53, %v3300_v40  ;;  %v9623_v27 = vadd.f32 %v3818_v26, %v3306_v24  ;;  %v9625_v58 = vadd.f32 %v3828_v36, %v3312_v22  ;;  %4711 = vrot.lane.b32.xlu1 %v9121_v52, %s6758_s26  ;;  %v10498_v36 = vld [vmem:[#allocation49_spill] sm:$0xff] }
 0x420   : > { %v9629_v3 = vadd.f32 %v3838_v10, %v3318_v8  ;;  %v9631_v37 = vadd.f32 %v3848_v39, %v3324_v0  ;;  %v9633_v21 = vadd.f32 %v3858_v38, %v3330_v54  ;;  %v9635_v43 = vadd.f32 %v3868_v46, %v3336_v6  ;;  %v3572_v56 = vpop.permute.xlu0 %3571  ;;  %v3548_v57 = vpop.permute.xlu1 %3547 }
 0x421   : > { %v3075_v40 = vadd.f32 %v3066_v30, %v9406_v49  ;;  %v3050_v24 = vadd.f32 %v3042_v11, %v9548_v59  ;;  %v3555_v22 = vadd.f32 %v3546_v34, %v9553_v55  ;;  %v3556_v48 = vadd.f32 %v3548_v57, %v9557_v19  ;;  %v10493_v30 = vld [vmem:[#allocation80_spill] sm:$0xff]  ;;  %v10494_v34 = vld [vmem:[#allocation81_spill] sm:$0xff] }
 0x422   : > { %10489 = vst [vmem:[#allocation74_spill] sm:$0xff] %v9629_v3  ;;  %10490 = vst [vmem:[#allocation57_spill] sm:$0xff] %v9631_v37  ;;  %4276 = vrot.lane.b32.xlu0 %v9138_v20, %s6758_s26  ;;  %v10499_v57 = vld [vmem:[#allocation84_spill] sm:$0xff] }
 0x423   : > { %10491 = vst [vmem:[#allocation71_spill] sm:$0xff] %v9633_v21  ;;  %10492 = vst [vmem:[#allocation77_spill] sm:$0xff] %v9635_v43  ;;  %v3076_v8 = vadd.f32 %v3068_v5, %v3050_v24  ;;  %v3581_v52 = vadd.f32 %v3572_v56, %v3555_v22  ;;  %4748 = vrot.lane.b32.xlu1 %v9145_v33, %s10481_s4  ;;  %v3105_v0 = vadd.f32 %v9152_v2, %v3075_v40 }
 0x424   : > { %v3133_v54 = vpop.permute.xlu0 %3132  ;;  %v3574_v6 = vpop.permute.xlu1 %3573 }
 0x425   : > { %v3142_v63 = vadd.f32 %v3133_v54, %v3105_v0  ;;  %v3582_v49 = vadd.f32 %v3574_v6, %v3556_v48  ;;  %v3106_v11 = vadd.f32 %v9167_v45, %v3076_v8  ;;  %v3610_v59 = vadd.f32 %v9231_v61, %v3581_v52  ;;  %v10495_v45 = vld [vmem:[#allocation82_spill] sm:$0xff] }
 0x426   : > { %4313 = vrot.lane.b32.xlu0 %v9161_v18, %s10481_s4 }
 0x427   : > { %4278 = vrot.lane.b32.xlu1 %v9164_v42, %s6758_s26  ;;  %v3611_v20 = vadd.f32 %v9234_v13, %v3582_v49  ;;  %v10496_v42 = vld [vmem:[#allocation83_spill] sm:$0xff]  ;;  %v10497_v13 = vld [vmem:[#allocation48_spill] sm:$0xff]  ;;  %v10500_v49 = vld [vmem:[#allocation85_spill] sm:$0xff] }
 0x428   : > { %v3170_v55 = vpop.permute.xlu0 %3169  ;;  %v3135_v33 = vpop.permute.xlu1 %3134 }
 0x429   : > { %v3179_v19 = vadd.f32 %v3170_v55, %v3142_v63  ;;  %v3143_v2 = vadd.f32 %v3135_v33, %v3106_v11 }
 0x42a   : > { %4812 = vrot.lane.b32.xlu0 %v10493_v30, %s6758_s26 }
 0x42b   : > { %4315 = vrot.lane.b32.xlu1 %v10494_v34, %s10481_s4  ;;  %v3209_v61 = vadd.f32 %v10495_v45, %v3179_v19  ;;  %v9668_v34 = vstv %s5462_s0  ;;  %s9817_s0 = sld [smem:[#allocation21]] }
 0x42c   : > { %v3237_v5 = vpop.permute.xlu0 %3236  ;;  %v3172_v53 = vpop.permute.xlu1 %3171 }
 0x42d   : > { %v3246_v18 = vadd.f32 %v3237_v5, %v3209_v61  ;;  %v3180_v26 = vadd.f32 %v3172_v53, %v3143_v2  ;;  %v10501_v2 = vld [vmem:[#allocation50_spill] sm:$0xff] }
 0x42e   : > { %4849 = vrot.lane.b32.xlu0 %v10496_v42, %s10481_s4  ;;  %v9674_v42 = vstv %s5492_s2  ;;  %s9819_s2 = sld [smem:[#allocation21 + $0x1]] }
 0x42f   : > { %4814 = vrot.lane.b32.xlu1 %v10497_v13, %s6758_s26  ;;  %v3210_v10 = vadd.f32 %v10498_v36, %v3180_v26  ;;  %s5472_s26 = sld [smem:[#allocation20 + $0x2]] }
 0x430   : > { %v3274_v39 = vpop.permute.xlu0 %3273  ;;  %v3239_v38 = vpop.permute.xlu1 %3238 }
 0x431   : > { %v3283_v46 = vadd.f32 %v3274_v39, %v3246_v18  ;;  %v3247_v56 = vadd.f32 %v3239_v38, %v3210_v10  ;;  %v10502_v18 = vld [vmem:[#allocation60_spill] sm:$0xff]  ;;  %v10503_v10 = vld [vmem:[#allocation66_spill] sm:$0xff] }
 0x432   : > { %v4063_v26 = vmul.f32 %v9668_v34, %v10502_v18  ;;  %v10504_v38 = vld [vmem:[#allocation70_spill] sm:$0xff] }
 0x433   : > { %4851 = vrot.lane.b32.xlu1 %v10499_v57, %s10481_s4  ;;  %v3289_v33 = vadd.f32 %v9476_v17, %v3283_v46  ;;  %s5471_s4 = sld [smem:[#allocation18 + $0x2]] }
 0x434   : > { %v3638_v40 = vpop.permute.xlu0 %3637  ;;  %v3276_v24 = vpop.permute.xlu1 %3275 }
 0x435   : > { %v3647_v22 = vadd.f32 %v3638_v40, %v3610_v59  ;;  %v3284_v48 = vadd.f32 %v3276_v24, %v3247_v56  ;;  %v3295_v53 = vmul.f32 %v9479_v29, %v3289_v33  ;;  %v3307_v13 = vmul.f32 %v9486_v23, %v3289_v33  ;;  %v10505_v56 = vld [vmem:[#allocation44_spill] sm:$0xff]  ;;  %v10506_v40 = vld [vmem:[#allocation67_spill] sm:$0xff] }
 0x436   : > { %v3313_v36 = vmul.f32 %v9489_v60, %v3289_v33  ;;  %v3319_v39 = vmul.f32 %v10503_v10, %v3289_v33  ;;  %v3325_v57 = vmul.f32 %v10505_v56, %v3289_v33  ;;  %v3331_v24 = vmul.f32 %v10506_v40, %v3289_v33 }
 0x438   : > { %v3675_v8 = vpop.permute.xlu0 %3674  ;;  %v3640_v52 = vpop.permute.xlu1 %3639 }
 0x439   : > { %v3684_v0 = vadd.f32 %v3675_v8, %v3647_v22  ;;  %v3648_v54 = vadd.f32 %v3640_v52, %v3611_v20  ;;  %v3301_v20 = vmul.f32 %v9483_v4, %v3289_v33  ;;  %v10507_v22 = vld [vmem:[#allocation73_spill] sm:$0xff]  ;;  %v3290_v52 = vadd.f32 %v9476_v17, %v3284_v48 }
 0x43a   : > { %v3337_v8 = vmul.f32 %v10507_v22, %v3289_v33 }
 0x43b   : > { %v3713_v11 = vadd.f32 %v10500_v49, %v3684_v0 }
 0x43c   : > { %v3741_v6 = vpop.permute.xlu0 %3740  ;;  %v3677_v63 = vpop.permute.xlu1 %3676 }
 0x43d   : > { %v3685_v55 = vadd.f32 %v3677_v63, %v3648_v54  ;;  %v3750_v19 = vadd.f32 %v3741_v6, %v3713_v11 }
 0x43f   : > { %v3714_v30 = vadd.f32 %v10501_v2, %v3685_v55 }
 0x440   : > { %v3778_v59 = vpop.permute.xlu0 %3777  ;;  %v3743_v45 = vpop.permute.xlu1 %3742 }
 0x441   : > { %v3787_v61 = vadd.f32 %v3778_v59, %v3750_v19  ;;  %v3751_v5 = vadd.f32 %v3743_v45, %v3714_v30 }
 0x443   : > { %v3793_v46 = vadd.f32 %v10504_v38, %v3787_v61 }
 0x444   : > { %v3780_v0 = vpop.permute.xlu1 %3779  ;;  %v4078_v54 = vpop.permute.xlu0 %4077 }
 0x445   : > { %v3799_v6 = vmul.f32 %v9517_v14, %v3793_v46  ;;  %v3809_v63 = vmul.f32 %v9521_v32, %v3793_v46  ;;  %v3819_v49 = vmul.f32 %v9524_v31, %v3793_v46  ;;  %v3829_v11 = vmul.f32 %v9527_v41, %v3793_v46 }
 0x446   : > { %v3839_v55 = vmul.f32 %v9532_v28, %v3793_v46  ;;  %v3849_v19 = vmul.f32 %v9535_v16, %v3793_v46  ;;  %v3859_v2 = vmul.f32 %v9541_v7, %v3793_v46  ;;  %v3869_v33 = vmul.f32 %v9544_v62, %v3793_v46  ;;  %v10516_v46 = vld [vmem:[#allocation63_spill] sm:$0xff] }
 0x447   : > { %v9692_v30 = vadd.f32 %v3799_v6, %v3295_v53  ;;  %v9694_v17 = vadd.f32 %v3809_v63, %v3301_v20  ;;  %v9696_v48 = vadd.f32 %v3819_v49, %v3307_v13  ;;  %v9698_v59 = vadd.f32 %v3829_v11, %v3313_v36  ;;  %v10517_v20 = vld [vmem:[#allocation62_spill] sm:$0xff] }
 0x448   : > { %v9700_v45 = vadd.f32 %v3839_v55, %v3319_v39  ;;  %v9702_v61 = vadd.f32 %v3849_v19, %v3325_v57  ;;  %v9704_v18 = vadd.f32 %v3859_v2, %v3331_v24  ;;  %v9706_v43 = vadd.f32 %v3869_v33, %v3337_v8  ;;  %v4104_v21 = vpop.permute.xlu0 %4103  ;;  %v4080_v37 = vpop.permute.xlu1 %4079  ;;  %v10527_v2 = vld [vmem:[#allocation51_spill] sm:$0xff] }
 0x449   : > { %10508 = vst [vmem:[#allocation72_spill] sm:$0xff] %v9692_v30  ;;  %10509 = vst [vmem:[#allocation45_spill] sm:$0xff] %v9694_v17  ;;  %v3788_v3 = vadd.f32 %v3780_v0, %v3751_v5  ;;  %v4064_v53 = vmul.f32 %v9668_v34, %v10516_v46  ;;  %v4599_v13 = vmul.f32 %v9674_v42, %v10517_v20  ;;  %v10528_v20 = vld [vmem:[#allocation52_spill] sm:$0xff] }
 0x44a   : > { %10510 = vst [vmem:[#allocation46_spill] sm:$0xff] %v9696_v48  ;;  %10511 = vst [vmem:[#allocation75_spill] sm:$0xff] %v9698_v59  ;;  %v3296_v36 = vmul.f32 %v9479_v29, %v3290_v52  ;;  %v3302_v39 = vmul.f32 %v9483_v4, %v3290_v52  ;;  %v3308_v57 = vmul.f32 %v9486_v23, %v3290_v52 }
 0x44b   : > { %10512 = vst [vmem:[#allocation58_spill] sm:$0xff] %v9700_v45  ;;  %10513 = vst [vmem:[#allocation59_spill] sm:$0xff] %v9702_v61  ;;  %v4089_v6 = vadd.f32 %v4078_v54, %v4063_v26  ;;  %v3314_v24 = vmul.f32 %v9489_v60, %v3290_v52  ;;  %v3320_v8 = vmul.f32 %v10503_v10, %v3290_v52  ;;  %v10545_v61 = vld [vmem:[#allocation71_spill] sm:$0xff] }
 0x44c   : > { %10514 = vst [vmem:[#allocation61_spill] sm:$0xff] %v9704_v18  ;;  %10515 = vst [vmem:[#allocation78_spill] sm:$0xff] %v9706_v43  ;;  %v3326_v63 = vmul.f32 %v10505_v56, %v3290_v52  ;;  %v3794_v5 = vadd.f32 %v10504_v38, %v3788_v3  ;;  %v3332_v0 = vmul.f32 %v10506_v40, %v3290_v52  ;;  %v4614_v29 = vpop.permute.xlu0 %4613  ;;  %v4106_v19 = vpop.permute.xlu1 %4105  ;;  %v10544_v18 = vld [vmem:[#allocation57_spill] sm:$0xff] }
 0x44d   : > { %v3338_v49 = vmul.f32 %v10507_v22, %v3290_v52  ;;  %v4115_v11 = vadd.f32 %v4104_v21, %v4089_v6  ;;  %v4090_v55 = vadd.f32 %v4080_v37, %v4064_v53  ;;  %v4625_v22 = vadd.f32 %v4614_v29, %v4599_v13  ;;  %v10526_v52 = vld [vmem:[#allocation64_spill] sm:$0xff] }
 0x44e   : > { %v3800_v4 = vmul.f32 %v9517_v14, %v3794_v5  ;;  %v3810_v23 = vmul.f32 %v9521_v32, %v3794_v5  ;;  %v3820_v60 = vmul.f32 %v9524_v31, %v3794_v5  ;;  %v3830_v26 = vmul.f32 %v9527_v41, %v3794_v5 }
 0x44f   : > { %v3840_v10 = vmul.f32 %v9532_v28, %v3794_v5  ;;  %v3850_v3 = vmul.f32 %v9535_v16, %v3794_v5  ;;  %v3860_v38 = vmul.f32 %v9541_v7, %v3794_v5  ;;  %v3870_v56 = vmul.f32 %v9544_v62, %v3794_v5  ;;  %v10530_v5 = vld [vmem:[#allocation86_spill] sm:$0xff] }
 0x450   : > { %v9729_v21 = vadd.f32 %v3800_v4, %v3296_v36  ;;  %v9731_v37 = vadd.f32 %v3810_v23, %v3302_v39  ;;  %v9733_v40 = vadd.f32 %v3820_v60, %v3308_v57  ;;  %v9735_v14 = vadd.f32 %v3830_v26, %v3314_v24  ;;  %v4640_v16 = vpop.permute.xlu0 %4639  ;;  %v4616_v7 = vpop.permute.xlu1 %4615  ;;  %v10529_v24 = vld [vmem:[#allocation53_spill] sm:$0xff] }
 0x451   : > { %v9737_v32 = vadd.f32 %v3840_v10, %v3320_v8  ;;  %v9739_v31 = vadd.f32 %v3850_v3, %v3326_v63  ;;  %v9741_v41 = vadd.f32 %v3860_v38, %v3332_v0  ;;  %v9743_v28 = vadd.f32 %v3870_v56, %v3338_v49  ;;  %v10532_v10 = vld [vmem:[#allocation54_spill] sm:$0xff] }
 0x452   : > { %10518 = vst [vmem:[#allocation79_spill] sm:$0xff] %v9729_v21  ;;  %10519 = vst [vmem:[#allocation47_spill] sm:$0xff] %v9731_v37  ;;  %v4116_v62 = vadd.f32 %v4106_v19, %v4090_v55  ;;  %v4600_v54 = vmul.f32 %v9674_v42, %v10526_v52  ;;  %v4144_v33 = vadd.f32 %v10527_v2, %v4115_v11  ;;  %v10531_v19 = vld [vmem:[#allocation87_spill] sm:$0xff]  ;;  %v10543_v21 = vld [vmem:[#allocation74_spill] sm:$0xff] }
 0x453   : > { %10520 = vst [vmem:[#allocation80_spill] sm:$0xff] %v9733_v40  ;;  %10521 = vst [vmem:[#allocation81_spill] sm:$0xff] %v9735_v14  ;;  %v4651_v46 = vadd.f32 %v4640_v16, %v4625_v22  ;;  %v10533_v22 = vld [vmem:[#allocation55_spill] sm:$0xff] }
 0x454   : > { %10522 = vst [vmem:[#allocation82_spill] sm:$0xff] %v9737_v32  ;;  %10523 = vst [vmem:[#allocation83_spill] sm:$0xff] %v9739_v31  ;;  %v4626_v53 = vadd.f32 %v4616_v7, %v4600_v54  ;;  %v4145_v36 = vadd.f32 %v10528_v20, %v4116_v62  ;;  %v4170_v39 = vpop.permute.xlu0 %4169  ;;  %v4642_v57 = vpop.permute.xlu1 %4641  ;;  %v9771_v20 = vstv %s5471_s4  ;;  %s9827_s4 = sld [smem:[#allocation21 + $0x2]] }
 0x455   : > { %10524 = vst [vmem:[#allocation48_spill] sm:$0xff] %v9741_v41  ;;  %10525 = vst [vmem:[#allocation49_spill] sm:$0xff] %v9743_v28  ;;  %v4680_v8 = vadd.f32 %v10529_v24, %v4651_v46  ;;  %v4181_v63 = vadd.f32 %v4170_v39, %v4144_v33  ;;  %v10534_v46 = vld [vmem:[#allocation88_spill] sm:$0xff]  ;;  %v9781_v24 = vstv %s5472_s26  ;;  %s9829_s26 = sld [smem:[#allocation21 + $0x3]] }
 0x456   : > { %v4652_v6 = vadd.f32 %v4642_v57, %v4626_v53  ;;  %v10535_v57 = vld [vmem:[#allocation65_spill] sm:$0xff] }
 0x458   : > { %v4681_v0 = vadd.f32 %v10530_v5, %v4652_v6  ;;  %v4207_v49 = vpop.permute.xlu0 %4206  ;;  %v4172_v13 = vpop.permute.xlu1 %4171  ;;  %v9779_v6 = vmul.f32 %v9668_v34, %v10535_v57 }
 0x459   : > { %v4218_v55 = vadd.f32 %v4207_v49, %v4181_v63  ;;  %v4182_v29 = vadd.f32 %v4172_v13, %v4145_v36  ;;  %v10536_v63 = vld [vmem:[#allocation69_spill] sm:$0xff]  ;;  %v9795_v13 = vstv %s5473_s11  ;;  %s9867_s11 = sld [smem:[#allocation21 + $0x4]] }
 0x45a   : > { %v9789_v5 = vmul.f32 %v9668_v34, %v10536_v63  ;;  %v9808_v34 = vstv %s9753_s17  ;;  %s5304_s17 = sshll.u32 %s7157_s23, 8 }
 0x45b   : > { %v4247_v4 = vadd.f32 %v10531_v19, %v4218_v55  ;;  %v9797_v55 = vstv %s5474_s24  ;;  %v9801_v19 = vstv %s5476_s27  ;;  %10539 = vst [vmem:[#allocation85_spill] sm:$0xff] %v9808_v34  ;;  %s9878_s24 = sld [smem:[#allocation21 + $0x5]]  ;;  %s9892_s27 = sld [smem:[#allocation21 + $0x7]] }
 0x45c   : > { %v4706_v23 = vpop.permute.xlu0 %4705  ;;  %v4209_v11 = vpop.permute.xlu1 %4208  ;;  %10538 = vst [vmem:[#allocation84_spill] sm:$0xff] %v9801_v19 }
 0x45d   : > { %v4219_v60 = vadd.f32 %v4209_v11, %v4182_v29  ;;  %v4717_v26 = vadd.f32 %v4706_v23, %v4680_v8  ;;  %v9799_v29 = vstv %s5475_s6  ;;  %v9814_v23 = vstv %s9757_s18  ;;  %s9880_s6 = sld [smem:[#allocation21 + $0x6]]  ;;  %s10575_s18 = sld [smem:[#allocation36_spill]] }
 0x45e   : > { %10541 = vst [vmem:[#allocation60_spill] sm:$0xff] %v9814_v23 }
 0x45f   : > { %v4248_v3 = vadd.f32 %v10532_v10, %v4219_v60 }
 0x460   : > { %v4743_v38 = vpop.permute.xlu0 %4742  ;;  %v4708_v56 = vpop.permute.xlu1 %4707 }
 0x461   : > { %v4754_v16 = vadd.f32 %v4743_v38, %v4717_v26  ;;  %v4718_v7 = vadd.f32 %v4708_v56, %v4681_v0  ;;  %v10537_v0 = vld [vmem:[#allocation68_spill] sm:$0xff]  ;;  %v9822_v38 = vstv %s9762_s30  ;;  %v9825_v56 = vstv %s9764_s15 }
 0x462   : > { %v9793_v49 = vmul.f32 %v9674_v42, %v10537_v0 }
 0x463   : > { %v9760_v62 = vadd.f32 %v10533_v22, %v4754_v16  ;;  %v10542_v16 = vld [vmem:[#allocation76_spill] sm:$0xff]  ;;  %s5553_s30 = sshll.u32 %s10575_s18, 12 }
 0x464   : > { %v4273_v52 = vpop.permute.xlu0 %4272  ;;  %v4745_v54 = vpop.permute.xlu1 %4744 }
 0x465   : > { %v4755_v2 = vadd.f32 %v4745_v54, %v4718_v7  ;;  %v4284_v33 = vadd.f32 %v4273_v52, %v4247_v4  ;;  %v9811_v4 = vstv %s9755_s22  ;;  %v9833_v7 = vmul.f32 %v9674_v42, %v10542_v16  ;;  %s9983_s22 = scalar_lea.vmem [#allocation23], %s5304_s17 }
 0x466   : > { %10540 = vst [vmem:[#allocation50_spill] sm:$0xff] %v9811_v4  ;;  %v9876_v16 = vstv %s9775_s16  ;;  %s5051_s15 = sshll.u32 %s9983_s22, 4  ;;  %s10576_s16 = sld [smem:[#allocation106_spill]]  ;;  %s10139_s15 = int_to_ptr.vmem [resolvable:$true] %s5051_s15 }
 0x467   : > { %v9769_v53 = vadd.f32 %v10534_v46, %v4755_v2 }
 0x468   : > { %v4310_v36 = vpop.permute.xlu0 %4309  ;;  %v4275_v39 = vpop.permute.xlu1 %4274 }
 0x469   : > { %v4321_v8 = vadd.f32 %v4310_v36, %v4284_v33  ;;  %v4285_v60 = vadd.f32 %v4275_v39, %v4248_v3 }
 0x46b   : > { %v4327_v11 = vadd.f32 %v9771_v20, %v4321_v8 }
 0x46c   : > { %v4809_v26 = vpop.permute.xlu0 %4808  ;;  %v4312_v10 = vpop.permute.xlu1 %4311 }
 0x46d   : > { %v4333_v22 = vmul.f32 %v9781_v24, %v4327_v11  ;;  %v4343_v52 = vmul.f32 %v9795_v13, %v4327_v11  ;;  %v4353_v3 = vmul.f32 %v9797_v55, %v4327_v11  ;;  %v4363_v54 = vmul.f32 %v9799_v29, %v4327_v11 }
 0x46e   : > { %v4373_v2 = vmul.f32 %v9801_v19, %v4327_v11  ;;  %v4383_v33 = vmul.f32 %v9808_v34, %v4327_v11  ;;  %v4393_v46 = vmul.f32 %v9811_v4, %v4327_v11  ;;  %v4403_v42 = vmul.f32 %v9814_v23, %v4327_v11 }
 0x46f   : > { %v9844_v36 = vadd.f32 %v4333_v22, %v9591_v44  ;;  %v9847_v39 = vadd.f32 %v4343_v52, %v9593_v51  ;;  %v9850_v57 = vadd.f32 %v4353_v3, %v9595_v15  ;;  %v9853_v8 = vadd.f32 %v4363_v54, %v9597_v9 }
 0x470   : > { %v9856_v63 = vadd.f32 %v4373_v2, %v9601_v50  ;;  %v9859_v0 = vadd.f32 %v4383_v33, %v9603_v25  ;;  %v9862_v44 = vadd.f32 %v4393_v46, %v9605_v12  ;;  %v9865_v51 = vadd.f32 %v4403_v42, %v9607_v1  ;;  %v4846_v9 = vpop.permute.xlu0 %4845  ;;  %v4811_v15 = vpop.permute.xlu1 %4810 }
 0x471   : > { %v4322_v50 = vadd.f32 %v4312_v10, %v4285_v60  ;;  %v9870_v11 = vstv %s9766_s29  ;;  %v9873_v25 = vstv %s9773_s3  ;;  %v4820_v12 = vadd.f32 %v4809_v26, %v9760_v62 }
 0x472   : > { %v9884_v1 = vstv %s9783_s28  ;;  %v9887_v22 = vstv %s9785_s21  ;;  %v9890_v52 = vstv %s9803_s25  ;;  %v9896_v10 = vstv %s9805_s1  ;;  %s10137_s28 = scalar_lea.hbm %s10576_s16, %s5553_s30  ;;  %s10577_s21 = sld [smem:[#allocation41_spill]] }
 0x473   : > { %v4328_v60 = vadd.f32 %v9771_v20, %v4322_v50  ;;  %v9899_v3 = vstv %s9817_s0  ;;  %v9902_v54 = vstv %s9819_s2  ;;  %v9905_v2 = vstv %s9827_s4  ;;  %s5036_s25 = scalar_lea.sflag [#allocation5], %s7157_s23  ;;  %s6622_s1 = scalar_lea.vmem %s10139_s15, 4096 }
 0x474   : > { %v9908_v33 = vstv %s9829_s26  ;;  %v4857_v62 = vadd.f32 %v4846_v9, %v4820_v12  ;;  %v4821_v26 = vadd.f32 %v4811_v15, %v9769_v53  ;;  %v4848_v46 = vpop.permute.xlu1 %4847  ;;  %v4082_v42 = vpop.permute.xlu0 %4081  ;;  %p6623_p2 = scmp.ne.s32.totalorder %s10139_s15, %s6622_s1  ;;  %s6760_s0 = smov [#allocation23]  }
 0x475   : > { %v4334_v28 = vmul.f32 %v9781_v24, %v4328_v60  ;;  %v4344_v41 = vmul.f32 %v9795_v13, %v4328_v60  ;;  %v4354_v50 = vmul.f32 %v9797_v55, %v4328_v60  ;;  %v4364_v31 = vmul.f32 %v9799_v29, %v4328_v60  ;;  %s6626_s2 = sshll.u32 %s6760_s0, 4  ;;  %s6627_s2 = int_to_ptr.vmem [resolvable:$false] %s6626_s2 }
 0x476   : > { %v4374_v32 = vmul.f32 %v9801_v19, %v4328_v60  ;;  %v4384_v14 = vmul.f32 %v9808_v34, %v4328_v60  ;;  %v4394_v9 = vmul.f32 %v9811_v4, %v4328_v60  ;;  %v4404_v53 = vmul.f32 %v9814_v23, %v4328_v60  ;;  %s6628_s4 = scalar_lea.vmem %s6627_s2, 8192  ;;  %p6629_p0 = scmp.lt.s32.totalorder %s10139_s15, %s6627_s2 }
 0x477   : > { %v9920_v15 = vadd.f32 %v4334_v28, %v9619_v47  ;;  %v9923_v12 = vadd.f32 %v4344_v41, %v9621_v35  ;;  %v9926_v40 = vadd.f32 %v4354_v50, %v9623_v27  ;;  %v9929_v37 = vadd.f32 %v4364_v31, %v9625_v58  ;;  %v10546_v47 = vld [vmem:[#allocation77_spill] sm:$0xff]  ;;  %p6630_p9 = scmp.lt.s32.totalorder %s6628_s4, %s6622_s1 }
 0x478   : > { %v9932_v43 = vadd.f32 %v4374_v32, %v10543_v21  ;;  %v9935_v60 = vadd.f32 %v4384_v14, %v10544_v18  ;;  %v9938_v45 = vadd.f32 %v4394_v9, %v10545_v61  ;;  %v9941_v28 = vadd.f32 %v4404_v53, %v10546_v47  ;;  %v4108_v35 = vpop.permute.xlu0 %4107  ;;  %v4084_v41 = vpop.permute.xlu1 %4083  ;;  %p10578_p7 = scmp.ne.s32.totalorder %s10577_s21, 0 }
 0x479   : > { %v9944_v27 = vstv %s9867_s11  ;;  %v9947_v50 = vstv %s9878_s24  ;;  %v9950_v58 = vstv %s9880_s6  ;;  %v4863_v21 = vadd.f32 %v9822_v38, %v4857_v62  ;;  %p6631_p12 = por %p6630_p9, %p6629_p0 }
 0x47a   : > { %v9954_v32 = vstv %s9892_s27  ;;  %v4858_v18 = vadd.f32 %v4848_v46, %v4821_v26  ;;  %v4091_v14 = vadd.f32 %v4082_v42, %v9779_v6  ;;  %v4092_v61 = vadd.f32 %v4084_v41, %v9789_v5  ;;  %p6624_p4 = pnand %p6623_p2, %p10578_p7 }
 0x47b   : > { %v4869_v31 = vmul.f32 %v9825_v56, %v4863_v21  ;;  %v4879_v9 = vmul.f32 %v9870_v11, %v4863_v21  ;;  %v4889_v53 = vmul.f32 %v9873_v25, %v4863_v21  ;;  %v4899_v47 = vmul.f32 %v9876_v16, %v4863_v21 }
 0x47c   : > { %v4909_v59 = vmul.f32 %v9884_v1, %v4863_v21  ;;  %v4919_v62 = vmul.f32 %v9887_v22, %v4863_v21  ;;  %v4929_v48 = vmul.f32 %v9890_v52, %v4863_v21  ;;  %v4939_v26 = vmul.f32 %v9896_v10, %v4863_v21  ;;  %v4618_v6 = vpop.permute.xlu0 %4617  ;;  %v4110_v17 = vpop.permute.xlu1 %4109  ;;  %p6625_p3 = pneg %p6624_p4 }
 0x47d   : > { %v4873_v5 = vadd.f32 %v4869_v31, %v9844_v36  ;;  %v4883_v46 = vadd.f32 %v4879_v9, %v9847_v39  ;;  %v4893_v42 = vadd.f32 %v4889_v53, %v9850_v57  ;;  %v4903_v41 = vadd.f32 %v4899_v47, %v9853_v8 }
 0x47e   : > { %v4913_v30 = vadd.f32 %v4909_v59, %v9856_v63  ;;  %v4923_v23 = vadd.f32 %v4919_v62, %v9859_v0  ;;  %v4933_v4 = vadd.f32 %v4929_v48, %v9862_v44  ;;  %v4943_v34 = vadd.f32 %v4939_v26, %v9865_v51  ;;  %p6632_p11 = pnand %p6631_p12, %p6625_p3 }
 0x47f   : > { %v4949_v21 = vadd.f32 %v9899_v3, %v4873_v5  ;;  %v4960_v19 = vadd.f32 %v9902_v54, %v4883_v46  ;;  %v4971_v36 = vadd.f32 %v9905_v2, %v4893_v42  ;;  %v4982_v39 = vadd.f32 %v9908_v33, %v4903_v41 }
 0x480   : > { %v4993_v57 = vadd.f32 %v9944_v27, %v4913_v30  ;;  %v5004_v8 = vadd.f32 %v9947_v50, %v4923_v23  ;;  %v5015_v59 = vadd.f32 %v9950_v58, %v4933_v4  ;;  %v5026_v63 = vadd.f32 %v9954_v32, %v4943_v34  ;;  %v4644_v0 = vpop.permute.xlu0 %4643  ;;  %v4620_v48 = vpop.permute.xlu1 %4619 }
 0x481   : > { %4954 = vst.msk [vmem:[%s9983_s22] sm:$0xff] %vm4953_vm11, %v4949_v21  ;;  %5511 = vst.msk [vmem:[%s9983_s22 + $0x20] sm:$0xff] %vm4953_vm11, %v4960_v19  ;;  %v4864_v30 = vadd.f32 %v9822_v38, %v4858_v18  ;;  %v4117_v34 = vadd.f32 %v4108_v35, %v4091_v14  ;;  %v4627_v4 = vadd.f32 %v4618_v6, %v9793_v49  ;;  %v10547_v21 = vld [vmem:[#allocation56_spill] sm:$0xff] }
 0x482   : > { %5516 = vst.msk [vmem:[%s9983_s22 + $0x40] sm:$0xff] %vm4953_vm11, %v4971_v36  ;;  %5521 = vst.msk [vmem:[%s9983_s22 + $0x60] sm:$0xff] %vm4953_vm11, %v4982_v39  ;;  %v4118_v23 = vadd.f32 %v4110_v17, %v4092_v61  ;;  %v4628_v19 = vadd.f32 %v4620_v48, %v9833_v7 }
 0x483   : > { %5526 = vst.msk [vmem:[%s9983_s22 + $0x80] sm:$0xff] %vm4953_vm11, %v4993_v57  ;;  %5531 = vst.msk [vmem:[%s9983_s22 + $0xa0] sm:$0xff] %vm4953_vm11, %v5004_v8  ;;  %v4870_v44 = vmul.f32 %v9825_v56, %v4864_v30  ;;  %v4880_v51 = vmul.f32 %v9870_v11, %v4864_v30  ;;  %v4890_v18 = vmul.f32 %v9873_v25, %v4864_v30  ;;  %v10548_v8 = vld [vmem:[#allocation89_spill] sm:$0xff] }
 0x484   : > { %5536 = vst.msk [vmem:[%s9983_s22 + $0xc0] sm:$0xff] %vm4953_vm11, %v5015_v59  ;;  %5541 = vst.msk [vmem:[%s9983_s22 + $0xe0] sm:$0xff] %vm4953_vm11, %v5026_v63  ;;  %v4900_v31 = vmul.f32 %v9876_v16, %v4864_v30  ;;  %v4910_v9 = vmul.f32 %v9884_v1, %v4864_v30  ;;  %v4920_v53 = vmul.f32 %v9887_v22, %v4864_v30  ;;  %v4174_v49 = vpop.permute.xlu0 %4173  ;;  %v4646_v62 = vpop.permute.xlu1 %4645 }
 0x485   : > { %v4930_v47 = vmul.f32 %v9890_v52, %v4864_v30  ;;  %v4940_v35 = vmul.f32 %v9896_v10, %v4864_v30  ;;  %v4874_v17 = vadd.f32 %v4870_v44, %v9920_v15  ;;  %v4884_v7 = vadd.f32 %v4880_v51, %v9923_v12  ;;  %v10549_v30 = vld [vmem:[#allocation90_spill] sm:$0xff]  ;;  %v10550_v44 = vld [vmem:[#allocation91_spill] sm:$0xff] }
 0x486   : > { %v4894_v14 = vadd.f32 %v4890_v18, %v9926_v40  ;;  %v4904_v61 = vadd.f32 %v4900_v31, %v9929_v37  ;;  %v4914_v26 = vadd.f32 %v4910_v9, %v9932_v43  ;;  %v4924_v6 = vadd.f32 %v4920_v53, %v9935_v60 }
 0x487   : > { %v4934_v5 = vadd.f32 %v4930_v47, %v9938_v45  ;;  %v4944_v46 = vadd.f32 %v4940_v35, %v9941_v28  ;;  %v4950_v15 = vadd.f32 %v9899_v3, %v4874_v17  ;;  %v4961_v12 = vadd.f32 %v9902_v54, %v4884_v7  ;;  %v10552_v47 = vld [vmem:[#allocation93_spill] sm:$0xff] }
 0x488   : > { %v4972_v40 = vadd.f32 %v9905_v2, %v4894_v14  ;;  %v4983_v37 = vadd.f32 %v9908_v33, %v4904_v61  ;;  %v4994_v42 = vadd.f32 %v9944_v27, %v4914_v26  ;;  %v5005_v43 = vadd.f32 %v9947_v50, %v4924_v6  ;;  %v4211_v28 = vpop.permute.xlu0 %4210  ;;  %v4176_v57 = vpop.permute.xlu1 %4175  ;;  %v10553_v14 = vld [vmem:[#allocation94_spill] sm:$0xff] }
 0x489   : > { %v5016_v45 = vadd.f32 %v9950_v58, %v4934_v5  ;;  %v5027_v60 = vadd.f32 %v9954_v32, %v4944_v46  ;;  %4955 = vst.msk [vmem:[%s9983_s22 + $0x8] sm:$0xff] %vm4953_vm11, %v4950_v15  ;;  %5512 = vst.msk [vmem:[%s9983_s22 + $0x28] sm:$0xff] %vm4953_vm11, %v4961_v12  ;;  %v4653_v41 = vadd.f32 %v4644_v0, %v4627_v4  ;;  %v10554_v15 = vld [vmem:[#allocation95_spill] sm:$0xff] }
 0x48a   : > { %5517 = vst.msk [vmem:[%s9983_s22 + $0x48] sm:$0xff] %vm4953_vm11, %v4972_v40  ;;  %5522 = vst.msk [vmem:[%s9983_s22 + $0x68] sm:$0xff] %vm4953_vm11, %v4983_v37  ;;  %v4146_v36 = vadd.f32 %v10547_v21, %v4117_v34  ;;  %v4654_v39 = vadd.f32 %v4646_v62, %v4628_v19  ;;  %v4147_v59 = vadd.f32 %v10548_v8, %v4118_v23  ;;  %v10551_v23 = vld [vmem:[#allocation92_spill] sm:$0xff]  ;;  %v10556_v8 = vld [vmem:[#allocation85_spill] sm:$0xff] }
 0x48b   : > { %5527 = vst.msk [vmem:[%s9983_s22 + $0x88] sm:$0xff] %vm4953_vm11, %v4994_v42  ;;  %5532 = vst.msk [vmem:[%s9983_s22 + $0xa8] sm:$0xff] %vm4953_vm11, %v5005_v43  ;;  %v4682_v48 = vadd.f32 %v10549_v30, %v4653_v41 }
 0x48c   : > { %5537 = vst.msk [vmem:[%s9983_s22 + $0xc8] sm:$0xff] %vm4953_vm11, %v5016_v45  ;;  %5542 = vst.msk [vmem:[%s9983_s22 + $0xe8] sm:$0xff] %vm4953_vm11, %v5027_v60  ;;  %v4183_v63 = vadd.f32 %v4174_v49, %v4146_v36  ;;  %v4683_v51 = vadd.f32 %v10550_v44, %v4654_v39  ;;  %v4184_v0 = vadd.f32 %v4176_v57, %v4147_v59  ;;  %v4710_v4 = vpop.permute.xlu0 %4709  ;;  %v10555_v39 = vld [vmem:[#allocation84_spill] sm:$0xff] }
 0x48d   : > { %v4213_v19 = vpop.permute.xlu1 %4212  ;;  %v4719_v31 = vadd.f32 %v4710_v4, %v4682_v48  ;;  %v10558_v48 = vld [vmem:[#allocation60_spill] sm:$0xff]  ;;  %v10560_v4 = vld [vmem:[#allocation45_spill] sm:$0xff] }
 0x48e   : > { %v4220_v34 = vadd.f32 %v4211_v28, %v4183_v63  ;;  %v4221_v18 = vadd.f32 %v4213_v19, %v4184_v0  ;;  %v10557_v63 = vld [vmem:[#allocation50_spill] sm:$0xff] }
 0x48f   : > { %v10561_v19 = vld [vmem:[#allocation46_spill] sm:$0xff] }
 0x490   : > { %v4249_v9 = vadd.f32 %v10551_v23, %v4220_v34  ;;  %v4747_v53 = vpop.permute.xlu0 %4746  ;;  %v4250_v35 = vadd.f32 %v10552_v47, %v4221_v18  ;;  %v10564_v47 = vld [vmem:[#allocation59_spill] sm:$0xff] }
 0x491   : > { %v4756_v17 = vadd.f32 %v4747_v53, %v4719_v31  ;;  %v4712_v7 = vpop.permute.xlu1 %4711  ;;  %v10562_v31 = vld [vmem:[#allocation75_spill] sm:$0xff] }
 0x492   : > { %v4720_v49 = vadd.f32 %v4712_v7, %v4683_v51  ;;  %v10559_v51 = vld [vmem:[#allocation72_spill] sm:$0xff] }
 0x493   : > { %v4785_v61 = vadd.f32 %v10553_v14, %v4756_v17  ;;  %v10565_v17 = vld [vmem:[#allocation61_spill] sm:$0xff]  ;;  %v10566_v14 = vld [vmem:[#allocation78_spill] sm:$0xff] }
 0x494   : > { %v4277_v62 = vpop.permute.xlu0 %4276 }
 0x495   : > { %v4749_v26 = vpop.permute.xlu1 %4748  ;;  %v4286_v5 = vadd.f32 %v4277_v62, %v4249_v9  ;;  %v10563_v9 = vld [vmem:[#allocation58_spill] sm:$0xff] }
 0x496   : > { %v4757_v6 = vadd.f32 %v4749_v26, %v4720_v49 }
 0x498   : > { %v4314_v46 = vpop.permute.xlu0 %4313  ;;  %v4786_v12 = vadd.f32 %v10554_v15, %v4757_v6 }
 0x499   : > { %v4323_v40 = vadd.f32 %v4314_v46, %v4286_v5  ;;  %v4279_v37 = vpop.permute.xlu1 %4278 }
 0x49a   : > { %v4287_v43 = vadd.f32 %v4279_v37, %v4250_v35 }
 0x49b   : > { %v4329_v42 = vadd.f32 %v9771_v20, %v4323_v40 }
 0x49c   : > { %v4813_v45 = vpop.permute.xlu0 %4812 }
 0x49d   : > { %v4335_v60 = vmul.f32 %v9781_v24, %v4329_v42  ;;  %v4345_v28 = vmul.f32 %v9795_v13, %v4329_v42  ;;  %v4355_v41 = vmul.f32 %v9797_v55, %v4329_v42  ;;  %v4365_v21 = vmul.f32 %v9799_v29, %v4329_v42  ;;  %v4316_v36 = vpop.permute.xlu1 %4315 }
 0x49e   : > { %v4375_v57 = vmul.f32 %v10555_v39, %v4329_v42  ;;  %v4385_v59 = vmul.f32 %v10556_v8, %v4329_v42  ;;  %v4395_v30 = vmul.f32 %v10557_v63, %v4329_v42  ;;  %v4405_v44 = vmul.f32 %v10558_v48, %v4329_v42 }
 0x49f   : > { %v4339_v0 = vadd.f32 %v4335_v60, %v10559_v51  ;;  %v4349_v34 = vadd.f32 %v4345_v28, %v10560_v4  ;;  %v4359_v18 = vadd.f32 %v4355_v41, %v10561_v19  ;;  %v4369_v23 = vadd.f32 %v4365_v21, %v10562_v31 }
 0x4a0   : > { %v4379_v53 = vadd.f32 %v4375_v57, %v10563_v9  ;;  %v4389_v35 = vadd.f32 %v4385_v59, %v10564_v47  ;;  %v4399_v7 = vadd.f32 %v4395_v30, %v10565_v17  ;;  %v4409_v49 = vadd.f32 %v4405_v44, %v10566_v14  ;;  %v4850_v26 = vpop.permute.xlu0 %4849  ;;  %v10569_v57 = vld [vmem:[#allocation80_spill] sm:$0xff]  ;;  %v10570_v59 = vld [vmem:[#allocation81_spill] sm:$0xff] }
 0x4a1   : > { %v4324_v62 = vadd.f32 %v4316_v36, %v4287_v43  ;;  %v4815_v6 = vpop.permute.xlu1 %4814  ;;  %v4822_v5 = vadd.f32 %v4813_v45, %v4785_v61  ;;  %v10567_v45 = vld [vmem:[#allocation79_spill] sm:$0xff] }
 0x4a2   : > { %v4823_v40 = vadd.f32 %v4815_v6, %v4786_v12  ;;  %v10568_v36 = vld [vmem:[#allocation47_spill] sm:$0xff] }
 0x4a3   : > { %v4330_v46 = vadd.f32 %v9771_v20, %v4324_v62  ;;  %v4859_v15 = vadd.f32 %v4850_v26, %v4822_v5 }
 0x4a5   : > { %v4336_v37 = vmul.f32 %v9781_v24, %v4330_v46  ;;  %v4346_v42 = vmul.f32 %v9795_v13, %v4330_v46  ;;  %v4356_v60 = vmul.f32 %v9797_v55, %v4330_v46  ;;  %v4366_v28 = vmul.f32 %v9799_v29, %v4330_v46  ;;  %v4852_v30 = vpop.permute.xlu1 %4851  ;;  %v10571_v55 = vld [vmem:[#allocation82_spill] sm:$0xff]  ;;  %v10572_v29 = vld [vmem:[#allocation83_spill] sm:$0xff] }
 0x4a6   : > { %v4376_v41 = vmul.f32 %v10555_v39, %v4330_v46  ;;  %v4386_v21 = vmul.f32 %v10556_v8, %v4330_v46  ;;  %v4396_v43 = vmul.f32 %v10557_v63, %v4330_v46  ;;  %v4406_v61 = vmul.f32 %v10558_v48, %v4330_v46  ;;  %v10573_v39 = vld [vmem:[#allocation48_spill] sm:$0xff]  ;;  %v10574_v8 = vld [vmem:[#allocation49_spill] sm:$0xff] }
 0x4a7   : > { %v4340_v20 = vadd.f32 %v4336_v37, %v10567_v45  ;;  %v4350_v12 = vadd.f32 %v4346_v42, %v10568_v36  ;;  %v4360_v24 = vadd.f32 %v4356_v60, %v10569_v57  ;;  %v4370_v13 = vadd.f32 %v4366_v28, %v10570_v59 }
 0x4a8   : > { %v4380_v44 = vadd.f32 %v4376_v41, %v10571_v55  ;;  %v4390_v51 = vadd.f32 %v4386_v21, %v10572_v29  ;;  %v4400_v4 = vadd.f32 %v4396_v43, %v10573_v39  ;;  %v4410_v19 = vadd.f32 %v4406_v61, %v10574_v8 }
 0x4a9   : > { %v4865_v63 = vadd.f32 %v9822_v38, %v4859_v15  ;;  %v4860_v48 = vadd.f32 %v4852_v30, %v4823_v40 }
 0x4ab   : > { %v4871_v31 = vmul.f32 %v9825_v56, %v4865_v63  ;;  %v4881_v9 = vmul.f32 %v9870_v11, %v4865_v63  ;;  %v4891_v47 = vmul.f32 %v9873_v25, %v4865_v63  ;;  %v4901_v17 = vmul.f32 %v9876_v16, %v4865_v63 }
 0x4ac   : > { %v4911_v14 = vmul.f32 %v9884_v1, %v4865_v63  ;;  %v4921_v62 = vmul.f32 %v9887_v22, %v4865_v63  ;;  %v4931_v26 = vmul.f32 %v9890_v52, %v4865_v63  ;;  %v4941_v6 = vmul.f32 %v9896_v10, %v4865_v63 }
 0x4ad   : > { %v4875_v5 = vadd.f32 %v4871_v31, %v4339_v0  ;;  %v4885_v46 = vadd.f32 %v4881_v9, %v4349_v34  ;;  %v4895_v15 = vadd.f32 %v4891_v47, %v4359_v18  ;;  %v4905_v40 = vadd.f32 %v4901_v17, %v4369_v23 }
 0x4ae   : > { %v4915_v37 = vadd.f32 %v4911_v14, %v4379_v53  ;;  %v4925_v42 = vadd.f32 %v4921_v62, %v4389_v35  ;;  %v4935_v60 = vadd.f32 %v4931_v26, %v4399_v7  ;;  %v4945_v28 = vadd.f32 %v4941_v6, %v4409_v49 }
 0x4af   : > { %v4951_v41 = vadd.f32 %v9899_v3, %v4875_v5  ;;  %v4962_v21 = vadd.f32 %v9902_v54, %v4885_v46  ;;  %v4973_v0 = vadd.f32 %v9905_v2, %v4895_v15  ;;  %v4984_v34 = vadd.f32 %v9908_v33, %v4905_v40 }
 0x4b0   : > { %v4995_v18 = vadd.f32 %v9944_v27, %v4915_v37  ;;  %v5006_v23 = vadd.f32 %v9947_v50, %v4925_v42  ;;  %v5017_v53 = vadd.f32 %v9950_v58, %v4935_v60  ;;  %v5028_v35 = vadd.f32 %v9954_v32, %v4945_v28 }
 0x4b1   : > { %4956 = vst.msk [vmem:[%s9983_s22 + $0x10] sm:$0xff] %vm4953_vm11, %v4951_v41  ;;  %5513 = vst.msk [vmem:[%s9983_s22 + $0x30] sm:$0xff] %vm4953_vm11, %v4962_v21  ;;  %v4866_v7 = vadd.f32 %v9822_v38, %v4860_v48 }
 0x4b2   : > { %5518 = vst.msk [vmem:[%s9983_s22 + $0x50] sm:$0xff] %vm4953_vm11, %v4973_v0  ;;  %5523 = vst.msk [vmem:[%s9983_s22 + $0x70] sm:$0xff] %vm4953_vm11, %v4984_v34 }
 0x4b3   : > { %5528 = vst.msk [vmem:[%s9983_s22 + $0x90] sm:$0xff] %vm4953_vm11, %v4995_v18  ;;  %5533 = vst.msk [vmem:[%s9983_s22 + $0xb0] sm:$0xff] %vm4953_vm11, %v5006_v23  ;;  %v4872_v49 = vmul.f32 %v9825_v56, %v4866_v7  ;;  %v4882_v43 = vmul.f32 %v9870_v11, %v4866_v7  ;;  %v4892_v61 = vmul.f32 %v9873_v25, %v4866_v7 }
 0x4b4   : > { %5538 = vst.msk [vmem:[%s9983_s22 + $0xd0] sm:$0xff] %vm4953_vm11, %v5017_v53  ;;  %5543 = vst.msk [vmem:[%s9983_s22 + $0xf0] sm:$0xff] %vm4953_vm11, %v5028_v35  ;;  %v4902_v45 = vmul.f32 %v9876_v16, %v4866_v7  ;;  %v4912_v36 = vmul.f32 %v9884_v1, %v4866_v7  ;;  %v4922_v38 = vmul.f32 %v9887_v22, %v4866_v7 }
 0x4b5   : > { %v4932_v57 = vmul.f32 %v9890_v52, %v4866_v7  ;;  %v4942_v59 = vmul.f32 %v9896_v10, %v4866_v7  ;;  %v4876_v30 = vadd.f32 %v4872_v49, %v4340_v20  ;;  %v4886_v55 = vadd.f32 %v4882_v43, %v4350_v12 }
 0x4b6   : > { %v4896_v29 = vadd.f32 %v4892_v61, %v4360_v24  ;;  %v4906_v56 = vadd.f32 %v4902_v45, %v4370_v13  ;;  %v4916_v11 = vadd.f32 %v4912_v36, %v4380_v44  ;;  %v4926_v25 = vadd.f32 %v4922_v38, %v4390_v51 }
 0x4b7   : > { %v4936_v16 = vadd.f32 %v4932_v57, %v4400_v4  ;;  %v4946_v1 = vadd.f32 %v4942_v59, %v4410_v19  ;;  %v4952_v22 = vadd.f32 %v9899_v3, %v4876_v30  ;;  %v4963_v52 = vadd.f32 %v9902_v54, %v4886_v55 }
 0x4b8   : > { %v4974_v10 = vadd.f32 %v9905_v2, %v4896_v29  ;;  %v4985_v20 = vadd.f32 %v9908_v33, %v4906_v56  ;;  %v4996_v3 = vadd.f32 %v9944_v27, %v4916_v11  ;;  %v5007_v54 = vadd.f32 %v9947_v50, %v4926_v25 }
 0x4b9   : > { %v5018_v12 = vadd.f32 %v9950_v58, %v4936_v16  ;;  %v5029_v2 = vadd.f32 %v9954_v32, %v4946_v1  ;;  %4957 = vst.msk [vmem:[%s9983_s22 + $0x18] sm:$0xff] %vm4953_vm11, %v4952_v22  ;;  %5514 = vst.msk [vmem:[%s9983_s22 + $0x38] sm:$0xff] %vm4953_vm11, %v4963_v52 }
 0x4ba   : > { %5519 = vst.msk [vmem:[%s9983_s22 + $0x58] sm:$0xff] %vm4953_vm11, %v4974_v10  ;;  %5524 = vst.msk [vmem:[%s9983_s22 + $0x78] sm:$0xff] %vm4953_vm11, %v4985_v20 }
 0x4bb   : > { %5529 = vst.msk [vmem:[%s9983_s22 + $0x98] sm:$0xff] %vm4953_vm11, %v4996_v3  ;;  %5534 = vst.msk [vmem:[%s9983_s22 + $0xb8] sm:$0xff] %vm4953_vm11, %v5007_v54 }
 0x4bc   : > { %5539 = vst.msk [vmem:[%s9983_s22 + $0xd8] sm:$0xff] %vm4953_vm11, %v5018_v12  ;;  %5544 = vst.msk [vmem:[%s9983_s22 + $0xf8] sm:$0xff] %vm4953_vm11, %v5029_v2 }
 0x4bd   : > { %6635 = shalt.err (!%p6632_p11)
}
 0x4be   : > { %s6636_s26 = scalar_lea.hbm %s10137_s28, 4096  ;;  %s6640_s6 = scalar_lea.hbm %s10576_s16, 8192 }
 0x4bf   : > { %p6637_p6 = scmp.ne.s32.totalorder %s10137_s28, %s6636_s26  ;;  %p6641_p1 = scmp.lt.u32.totalorder %s10137_s28, %s10576_s16 }
 0x4c0   : > { %p6642_p10 = scmp.lt.u32.totalorder %s6640_s6, %s6636_s26  ;;  %p6644_p2 = scmp.lt.u32.totalorder %s6636_s26, %s10137_s28 }
 0x4c1   : > { %p6638_p8 = pnand %p6637_p6, %p10578_p7 }
 0x4c2   : > { %p6643_p5 = por %p6642_p10, %p6641_p1 }
 0x4c3   : > { %p6639_p13 = pneg %p6638_p8 }
 0x4c4   : > { %p6645_p4 = por %p6644_p2, %p6643_p5 }
 0x4c6   : > { %p6646_p3 = pnand %p6645_p4, %p6639_p13 }
 0x4c8   : > { %6649 = shalt.err (!%p6646_p3)
}
 0x4c9   : > { %s6761_s22 = smov 128   ;;  %s6762_s18 = smov 8  }
 0x4ca   : > { %6272 = dma.vmem_to_hbm [thread:$0]  (%p10578_p7), %s10139_s15, 4096, %s10137_s28, %s5036_s25, %s6761_s22, %s6761_s22, %s6762_s18  }
 0x4cb PF: > { %s10579_s30 = sld [smem:[#allocation35_spill]]  ;;  %s10580_s29 = sld [smem:[#allocation43_spill]] }
 0x4cc   : > { %s10581_s3 = sld [smem:[#allocation38_spill]] }
 0x4d1   : > { %s5066_s1 = sand.u32 1, %s10579_s30   ;;  %p10582_p0 = scmp.ne.s32.totalorder %s10580_s29, 0 }
 0x4d2   : > { %p10583_p9 = scmp.ge.s32.totalorder %s10581_s3, 2  ;;  %s5067_s0 = scalar_lea.sflag [#allocation5], %s5066_s1 }
 0x4d4   : > { %p6310_p12 = pnand %p10583_p9, %p10582_p0 }
 0x4d6   : > { %6715 = dma.done.wait (!%p6310_p12), %s5067_s0, 4096  }
 0x4d7   : > { %6717 = vsyncadd (!%p6310_p12), %s5067_s0, 4294963200  ;;  %s40_s23 = sadd.s32 1, %s10581_s3   ;;  %s10584_s2 = sld [smem:[#allocation42_spill]] }
 0x4d8   : > { %p37_p11 = scmp.ge.s32.totalorder %s40_s23, 4   ;;  %s10585_s21 = sld [smem:[#allocation37_spill]] }
 0x4d9   : > { %s10586_s22 = sld [smem:[#allocation40_spill]]  ;;  %s10587_s18 = smov %s6724_s19 }
 0x4da   : > { %s10588_s19 = smov %s6728_s20  ;;  %39 = sbr.rel (!%p37_p11) target bundleno = 26 (0x1a), region = 192 }
 0x4dd   : > { %s10589_s20 = smov %s10584_s2 }
 0x4e1   :  { %5072 = vsyncpa [#allocation4], 1 }
 0x4e2   :  { %5074 = vsyncpa [#allocation4 + $0x1], 1 }
 0x4e3   :  { %5075 = vsyncpa [#allocation9], 1 }
 0x4e4   :  { %5077 = vsyncpa [#allocation9 + $0x1], 1 }
 0x4e5   :  { %5078 = vsyncpa [#allocation5], 1 }
 0x4e6   :  { %5080 = vsyncpa [#allocation5 + $0x1], 1 }
 0x4e7   :  { %5081 = vsyncpa [#allocation6], 1 }
 0x4e8   :  { %5083 = vsyncpa [#allocation6 + $0x1], 1 }
 0x4e9   :  { %5084 = vsyncpa [#allocation13], 1 }
 0x4ea   :  { %5085 = vsyncpa [#allocation19], 1 }
 0x4eb   :  { %5086 = vsyncpa [#allocation7], 1 }
 0x4ec   :  { %5088 = vsyncpa [#allocation7 + $0x1], 1 }
 0x4ed   :  { %5089 = vsyncpa [#allocation17], 1 }
 0x4ee   :  { %5090 = vsyncpa [#allocation22], 1 }

</bundles_post_ra>
